<compile_context>
chip_gen: v7x
topology: tpu7x:2x2x1
jax: 0.10.0
libtpu: 0.0.40
codegen_flags: <defaults>
</compile_context>

<pallas_src>
import math
import functools

import jax
import jax.numpy as jnp
from jax.experimental import pallas as pl
from jax.experimental.pallas import tpu as pltpu


# ---------------------------------------------------------------------------
# Tiling helper
# ---------------------------------------------------------------------------

def _pick_tile(dim, candidates, min_blocks=1):
    """Largest candidate dividing dim that still yields >= min_blocks grid blocks."""
    for c in candidates:
        if c <= dim and dim % c == 0 and dim // c >= min_blocks:
            return c
    for c in candidates:
        if c <= dim and dim % c == 0:
            return c
    return dim


_TM = (1024, 512, 256, 128, 64, 32, 16)   # bf16-friendly sublane tiles (multiples of 16)
_TN = (512, 384, 256, 128)
_TK = (512, 256, 128)


# ---------------------------------------------------------------------------
# Plain tiled linear: o = x @ w + b   (bf16 in / bf16 (or f32) out, f32 accumulate)
# ---------------------------------------------------------------------------

def _linear_kernel(x_ref, w_ref, b_ref, o_ref, acc_ref):
    @pl.when(pl.program_id(2) == 0)
    def _():
        acc_ref[...] = jnp.zeros_like(acc_ref)

    acc_ref[...] += jnp.dot(x_ref[...], w_ref[...],
                            preferred_element_type=jnp.float32)

    @pl.when(pl.program_id(2) == pl.num_programs(2) - 1)
    def _():
        o_ref[...] = (acc_ref[...] + b_ref[...]).astype(o_ref.dtype)


def pallas_linear(x2d, w, b, out_dtype=jnp.bfloat16):
    """x2d: (M, K) bf16 @ w: (K, N) bf16 + b: (N,) f32 -> (M, N) out_dtype."""
    M, K = x2d.shape
    N = w.shape[1]
    tm = _pick_tile(M, _TM, min_blocks=2)
    tn = _pick_tile(N, _TN)
    tk = _pick_tile(K, _TK)
    return pl.pallas_call(
        _linear_kernel,
        out_shape=jax.ShapeDtypeStruct((M, N), out_dtype),
        grid=(M // tm, N // tn, K // tk),
        in_specs=[
            pl.BlockSpec((tm, tk), lambda i, j, k: (i, k)),
            pl.BlockSpec((tk, tn), lambda i, j, k: (k, j)),
            pl.BlockSpec((1, tn), lambda i, j, k: (0, j)),
        ],
        out_specs=pl.BlockSpec((tm, tn), lambda i, j, k: (i, j)),
        scratch_shapes=[pltpu.VMEM((tm, tn), jnp.float32)],
        compiler_params=pltpu.CompilerParams(
            dimension_semantics=("parallel", "parallel", "arbitrary")),
    )(x2d, w, b.reshape(1, N))


# ---------------------------------------------------------------------------
# Linear + residual add + LayerNorm fused (attention output projection epilogue)
# ---------------------------------------------------------------------------

def _linear_add_ln_kernel(x_ref, w_ref, b_ref, res_ref, g_ref, bt_ref,
                          o_ref, acc_ref, *, eps):
    @pl.when(pl.program_id(1) == 0)
    def _():
        acc_ref[...] = jnp.zeros_like(acc_ref)

    acc_ref[...] += jnp.dot(x_ref[...], w_ref[...],
                            preferred_element_type=jnp.float32)

    @pl.when(pl.program_id(1) == pl.num_programs(1) - 1)
    def _():
        y = acc_ref[...] + b_ref[...] + res_ref[...].astype(jnp.float32)
        mu = jnp.mean(y, axis=-1, keepdims=True)
        var = jnp.mean(jnp.square(y - mu), axis=-1, keepdims=True)
        o_ref[...] = ((y - mu) * jax.lax.rsqrt(var + eps)
                      * g_ref[...] + bt_ref[...]).astype(o_ref.dtype)


def pallas_linear_add_ln(x2d, w, b, res2d, gamma, beta, eps=1e-5):
    """LayerNorm(res + x @ w + b) over the last dim (N == E, full-width output tile)."""
    M, K = x2d.shape
    E = w.shape[1]
    tm = _pick_tile(M, _TM, min_blocks=2)
    tk = _pick_tile(K, _TK)
    kernel = functools.partial(_linear_add_ln_kernel, eps=eps)
    return pl.pallas_call(
        kernel,
        out_shape=jax.ShapeDtypeStruct((M, E), jnp.bfloat16),
        grid=(M // tm, K // tk),
        in_specs=[
            pl.BlockSpec((tm, tk), lambda i, k: (i, k)),
            pl.BlockSpec((tk, E), lambda i, k: (k, 0)),
            pl.BlockSpec((1, E), lambda i, k: (0, 0)),
            pl.BlockSpec((tm, E), lambda i, k: (i, 0)),
            pl.BlockSpec((1, E), lambda i, k: (0, 0)),
            pl.BlockSpec((1, E), lambda i, k: (0, 0)),
        ],
        out_specs=pl.BlockSpec((tm, E), lambda i, k: (i, 0)),
        scratch_shapes=[pltpu.VMEM((tm, E), jnp.float32)],
        compiler_params=pltpu.CompilerParams(
            dimension_semantics=("parallel", "arbitrary")),
    )(x2d, w, b.reshape(1, E), res2d, gamma.reshape(1, E), beta.reshape(1, E))


# ---------------------------------------------------------------------------
# Fused FFN + residual add + LayerNorm: LN(res + relu(x@w1+b1)@w2 + b2)
# ---------------------------------------------------------------------------

def _ffn_add_ln_kernel(x_ref, w1_ref, b1_ref, w2_ref, b2_ref, res_ref,
                       g_ref, bt_ref, o_ref, acc_ref, *, eps):
    f = pl.program_id(1)

    @pl.when(f == 0)
    def _():
        acc_ref[...] = jnp.zeros_like(acc_ref)

    h = jnp.dot(x_ref[...], w1_ref[...],
                preferred_element_type=jnp.float32) + b1_ref[...]
    h = jnp.maximum(h, 0.0)
    acc_ref[...] += jnp.dot(h.astype(jnp.bfloat16), w2_ref[...],
                            preferred_element_type=jnp.float32)

    @pl.when(f == pl.num_programs(1) - 1)
    def _():
        y = acc_ref[...] + b2_ref[...] + res_ref[...].astype(jnp.float32)
        mu = jnp.mean(y, axis=-1, keepdims=True)
        var = jnp.mean(jnp.square(y - mu), axis=-1, keepdims=True)
        o_ref[...] = ((y - mu) * jax.lax.rsqrt(var + eps)
                      * g_ref[...] + bt_ref[...]).astype(o_ref.dtype)


def pallas_ffn_add_ln(x2d, w1, b1, w2, b2, res2d, gamma, beta, eps=1e-5):
    """No (M, F) hidden in HBM; F is the accumulation grid axis."""
    M, E = x2d.shape
    F = w1.shape[1]
    Eo = w2.shape[1]
    tm = _pick_tile(M, _TM, min_blocks=2)
    tf = _pick_tile(F, _TK)
    kernel = functools.partial(_ffn_add_ln_kernel, eps=eps)
    return pl.pallas_call(
        kernel,
        out_shape=jax.ShapeDtypeStruct((M, Eo), jnp.bfloat16),
        grid=(M // tm, F // tf),
        in_specs=[
            pl.BlockSpec((tm, E), lambda i, f: (i, 0)),
            pl.BlockSpec((E, tf), lambda i, f: (0, f)),
            pl.BlockSpec((1, tf), lambda i, f: (0, f)),
            pl.BlockSpec((tf, Eo), lambda i, f: (f, 0)),
            pl.BlockSpec((1, Eo), lambda i, f: (0, 0)),
            pl.BlockSpec((tm, Eo), lambda i, f: (i, 0)),
            pl.BlockSpec((1, Eo), lambda i, f: (0, 0)),
            pl.BlockSpec((1, Eo), lambda i, f: (0, 0)),
        ],
        out_specs=pl.BlockSpec((tm, Eo), lambda i, f: (i, 0)),
        scratch_shapes=[pltpu.VMEM((tm, Eo), jnp.float32)],
        compiler_params=pltpu.CompilerParams(
            dimension_semantics=("parallel", "arbitrary")),
    )(x2d, w1, b1.reshape(1, F), w2, b2.reshape(1, Eo),
      res2d, gamma.reshape(1, Eo), beta.reshape(1, Eo))


# ---------------------------------------------------------------------------
# Attention: head split/merge in-kernel, masks built in-kernel, lane-dense I/O
# ---------------------------------------------------------------------------

def _attn_mask_bias(pad_row, Lq, Lk, causal):
    """Additive mask bias (Lq, Lk) f32: 0 = keep, -1e9 = masked."""
    neg = jnp.float32(-1e9)
    bias = jnp.where(pad_row > 0.0, jnp.float32(0.0), neg)          # (1, Lk)
    bias = jnp.broadcast_to(bias, (Lq, Lk))
    if causal:
        row = jax.lax.broadcasted_iota(jnp.int32, (Lq, Lk), 0)
        col = jax.lax.broadcasted_iota(jnp.int32, (Lq, Lk), 1)
        bias = jnp.where(row >= col, bias, neg)
    return bias


def _attn_core(q_all, k_all, v_all, bias, H, D, scale, out_dtype):
    """Per-head scaled-dot-product attention; concat heads into a lane-dense (Lq, E)."""
    outs = []
    for h in range(H):
        sl = slice(h * D, (h + 1) * D)
        qh, kh, vh = q_all[:, sl], k_all[:, sl], v_all[:, sl]
        s = jax.lax.dot_general(qh, kh, (((1,), (1,)), ((), ())),
                                preferred_element_type=jnp.float32)
        s = s * scale + bias
        smax = jnp.max(s, axis=-1, keepdims=True)
        p = jnp.exp(s - smax)
        denom = jnp.sum(p, axis=-1, keepdims=True)
        p = p * pl.reciprocal(denom, approx=True)                    # EUP, nearly free
        outs.append(jnp.dot(p.astype(vh.dtype), vh,
                            preferred_element_type=jnp.float32))
    return jnp.concatenate(outs, axis=-1).astype(out_dtype)


def _attn_self_kernel(qkv_ref, pad_ref, o_ref, *, H, D, scale, causal):
    E = H * D
    qkv = qkv_ref[0]                       # (L, 3E) bf16
    q_all = qkv[:, :E]
    k_all = qkv[:, E:2 * E]
    v_all = qkv[:, 2 * E:]
    L = q_all.shape[0]
    bias = _attn_mask_bias(pad_ref[0], L, L, causal)
    o_ref[0] = _attn_core(q_all, k_all, v_all, bias, H, D, scale, o_ref.dtype)


def _attn_cross_kernel(q_ref, kv_ref, pad_ref, o_ref, *, H, D, scale):
    E = H * D
    q_all = q_ref[0]                       # (Lq, E) bf16
    kv = kv_ref[0]                         # (Lk, 2E) bf16
    k_all = kv[:, :E]
    v_all = kv[:, E:]
    Lq = q_all.shape[0]
    Lk = k_all.shape[0]
    bias = _attn_mask_bias(pad_ref[0], Lq, Lk, False)
    o_ref[0] = _attn_core(q_all, k_all, v_all, bias, H, D, scale, o_ref.dtype)


def pallas_attention_self(qkv, pad_mask, num_heads, causal):
    """qkv: (B, L, 3E) bf16, pad_mask: (B, 1, L) f32 (1=keep). -> (B, L, E) bf16."""
    B, L, E3 = qkv.shape
    E = E3 // 3
    D = E // num_heads
    kernel = functools.partial(_attn_self_kernel, H=num_heads, D=D,
                               scale=1.0 / math.sqrt(D), causal=causal)
    return pl.pallas_call(
        kernel,
        out_shape=jax.ShapeDtypeStruct((B, L, E), jnp.bfloat16),
        grid=(B,),
        in_specs=[
            pl.BlockSpec((1, L, E3), lambda b: (b, 0, 0)),
            pl.BlockSpec((1, 1, L), lambda b: (b, 0, 0)),
        ],
        out_specs=pl.BlockSpec((1, L, E), lambda b: (b, 0, 0)),
        compiler_params=pltpu.CompilerParams(dimension_semantics=("parallel",)),
    )(qkv, pad_mask)


def pallas_attention_cross(q, kv, pad_mask, num_heads):
    """q: (B, Lq, E), kv: (B, Lk, 2E) bf16, pad_mask: (B, 1, Lk) f32. -> (B, Lq, E) bf16."""
    B, Lq, E = q.shape
    Lk = kv.shape[1]
    D = E // num_heads
    kernel = functools.partial(_attn_cross_kernel, H=num_heads, D=D,
                               scale=1.0 / math.sqrt(D))
    return pl.pallas_call(
        kernel,
        out_shape=jax.ShapeDtypeStruct((B, Lq, E), jnp.bfloat16),
        grid=(B,),
        in_specs=[
            pl.BlockSpec((1, Lq, E), lambda b: (b, 0, 0)),
            pl.BlockSpec((1, Lk, 2 * E), lambda b: (b, 0, 0)),
            pl.BlockSpec((1, 1, Lk), lambda b: (b, 0, 0)),
        ],
        out_specs=pl.BlockSpec((1, Lq, E), lambda b: (b, 0, 0)),
        compiler_params=pltpu.CompilerParams(dimension_semantics=("parallel",)),
    )(q, kv, pad_mask)


# ---------------------------------------------------------------------------
# Model glue (plain JAX): embeddings, layer stacking
# ---------------------------------------------------------------------------

def mha_self(x, p, pad_mask, causal, num_heads, ln_g, ln_b):
    """Self-attention: fused (E,3E) QKV projection; out-proj fused with add+LN."""
    B, L, E = x.shape
    qkv = pallas_linear(x.reshape(-1, E), p["wqkv"], p["bqkv"]).reshape(B, L, 3 * E)
    attn = pallas_attention_self(qkv, pad_mask, num_heads, causal)        # (B, L, E)
    out = pallas_linear_add_ln(attn.reshape(-1, E), p["wo"], p["bo"],
                               x.reshape(-1, E), ln_g, ln_b)
    return out.reshape(B, L, E)


def mha_cross(x_q, x_kv, p, pad_mask, num_heads, ln_g, ln_b):
    """Cross-attention: Q projection + fused (E,2E) KV projection; out-proj fused add+LN."""
    B, Lq, E = x_q.shape
    Lk = x_kv.shape[1]
    q = pallas_linear(x_q.reshape(-1, E), p["wq"], p["bq"]).reshape(B, Lq, E)
    kv = pallas_linear(x_kv.reshape(-1, E), p["wkv"], p["bkv"]).reshape(B, Lk, 2 * E)
    attn = pallas_attention_cross(q, kv, pad_mask, num_heads)             # (B, Lq, E)
    out = pallas_linear_add_ln(attn.reshape(-1, E), p["wo"], p["bo"],
                               x_q.reshape(-1, E), ln_g, ln_b)
    return out.reshape(B, Lq, E)


def encoder_block(x, pad_mask, p, num_heads):
    """Post-norm block: MHA (+add&norm fused) -> FFN (+add&norm fused)."""
    B, L, E = x.shape
    x1 = mha_self(x, p["attn"], pad_mask, False, num_heads, p["ln1_g"], p["ln1_b"])
    out = pallas_ffn_add_ln(x1.reshape(-1, E), p["ff_w1"], p["ff_b1"],
                            p["ff_w2"], p["ff_b2"], x1.reshape(-1, E),
                            p["ln2_g"], p["ln2_b"])
    return out.reshape(B, L, E)


def decoder_block(y, enc_out, src_pad_mask, tgt_keep, p, num_heads):
    B, Lt, E = y.shape
    query = mha_self(y, p["self_attn"], tgt_keep, True, num_heads,
                     p["ln_g"], p["ln_b"])
    bp = p["block"]
    x1 = mha_cross(query, enc_out, bp["attn"], src_pad_mask, num_heads,
                   bp["ln1_g"], bp["ln1_b"])
    out = pallas_ffn_add_ln(x1.reshape(-1, E), bp["ff_w1"], bp["ff_b1"],
                            bp["ff_w2"], bp["ff_b2"], x1.reshape(-1, E),
                            bp["ln2_g"], bp["ln2_b"])
    return out.reshape(B, Lt, E)


def transformer_forward(params, src_seq, tgt_seq, src_pad_idx, num_heads, tgt_vocab):
    B, Ls = src_seq.shape
    _, Lt = tgt_seq.shape
    E = params["enc"]["tok_emb"].shape[1]

    # compact masks: pad keep-mask (B,1,Ls); decoder self-attn is causal-only (as in ref)
    src_pad = (src_seq != src_pad_idx).astype(jnp.float32)[:, None, :]    # (B,1,Ls)
    tgt_keep = jnp.ones((B, 1, Lt), jnp.float32)

    # ---------------- encoder ----------------
    # TODO(synk): embedding gather stays in XLA (no clean Pallas gather for tiny vocab).
    x = (params["enc"]["tok_emb"][src_seq]
         + params["enc"]["pos_emb"][:Ls][None]).astype(jnp.bfloat16)
    for lp in params["enc"]["layers"]:
        x = encoder_block(x, src_pad, lp, num_heads)
    enc_out = x

    # ---------------- decoder ----------------
    y = (params["dec"]["tok_emb"][tgt_seq]
         + params["dec"]["pos_emb"][:Lt][None]).astype(jnp.bfloat16)
    for lp in params["dec"]["layers"]:
        y = decoder_block(y, enc_out, src_pad, tgt_keep, lp, num_heads)

    # final projection: vocab padded to a 128-multiple for lane-dense stores, sliced after
    logits = pallas_linear(y.reshape(-1, E), params["dec"]["fc_w"],
                           params["dec"]["fc_b"], out_dtype=jnp.float32)
    v_pad = params["dec"]["fc_w"].shape[1]
    return logits.reshape(B, Lt, v_pad)[:, :, :tgt_vocab]


# ---------------------------------------------------------------------------
# Deterministic parameter init (weights/embeddings bf16 for MXU/DMA, biases / LN f32)
# ---------------------------------------------------------------------------

def _linear_init(key, fan_in, fan_out):
    w = (jax.random.normal(key, (fan_in, fan_out), jnp.float32) * 0.02).astype(jnp.bfloat16)
    b = jnp.zeros((fan_out,), jnp.float32)
    return w, b


def _attn_params(key, E, fused=True):
    ks = jax.random.split(key, 4)
    wo, bo = _linear_init(ks[3], E, E)
    if fused:
        wqkv, bqkv = _linear_init(ks[0], E, 3 * E)
        return dict(wqkv=wqkv, bqkv=bqkv, wo=wo, bo=bo)
    wq, bq = _linear_init(ks[0], E, E)
    wkv, bkv = _linear_init(ks[1], E, 2 * E)
    return dict(wq=wq, bq=bq, wkv=wkv, bkv=bkv, wo=wo, bo=bo)


def _block_params(key, E, F, cross=False):
    ks = jax.random.split(key, 3)
    w1, b1 = _linear_init(ks[1], E, F)
    w2, b2 = _linear_init(ks[2], F, E)
    return dict(attn=_attn_params(ks[0], E, fused=not cross),
                ln1_g=jnp.ones((E,), jnp.float32), ln1_b=jnp.zeros((E,), jnp.float32),
                ff_w1=w1, ff_b1=b1, ff_w2=w2, ff_b2=b2,
                ln2_g=jnp.ones((E,), jnp.float32), ln2_b=jnp.zeros((E,), jnp.float32))


def init_params(key, src_vocab, tgt_vocab, E, F, n_enc, n_dec, max_len):
    k = jax.random.split(key, 8)
    enc_layers = [_block_params(kk, E, F, cross=False)
                  for kk in jax.random.split(k[2], n_enc)]
    dec_layers = []
    for kk in jax.random.split(k[3], n_dec):
        kks = jax.random.split(kk, 2)
        dec_layers.append(dict(
            self_attn=_attn_params(kks[0], E, fused=True),
            ln_g=jnp.ones((E,), jnp.float32), ln_b=jnp.zeros((E,), jnp.float32),
            block=_block_params(kks[1], E, F, cross=True)))

    # lane-dense (128-padded) output projection; padded columns sliced off in forward
    v_pad = ((tgt_vocab + 127) // 128) * 128
    fc_w_raw = jax.random.normal(k[6], (E, tgt_vocab), jnp.float32) * 0.02
    fc_w = jnp.zeros((E, v_pad), jnp.float32).at[:, :tgt_vocab].set(fc_w_raw).astype(jnp.bfloat16)
    fc_b = jnp.zeros((v_pad,), jnp.float32)

    def emb(kk, n):
        return (jax.random.normal(kk, (n, E), jnp.float32) * 0.02).astype(jnp.bfloat16)

    return dict(
        enc=dict(tok_emb=emb(k[0], src_vocab), pos_emb=emb(k[4], max_len),
                 layers=enc_layers),
        dec=dict(tok_emb=emb(k[1], tgt_vocab), pos_emb=emb(k[5], max_len),
                 layers=dec_layers, fc_w=fc_w, fc_b=fc_b))


# ---------------------------------------------------------------------------
# Main
# ---------------------------------------------------------------------------

if __name__ == "__main__":
    # small, forward-consistent hyperparameters (E / FF / 3E all multiples of 128)
    SRC_VOCAB, TGT_VOCAB = 50, 50
    SRC_PAD_IDX = 0
    EMBED, HEADS, FF = 128, 4, 256
    N_ENC, N_DEC = 2, 2
    MAX_LEN = 16
    B, L_SRC, L_TGT = 2, 8, 8

    key = jax.random.PRNGKey(0)
    k_src, k_tgt, k_par = jax.random.split(key, 3)

    src_seq = jax.random.randint(k_src, (B, L_SRC), 1, SRC_VOCAB, dtype=jnp.int32)
    src_seq = src_seq.at[:, -2:].set(SRC_PAD_IDX)          # exercise the padding mask
    tgt_seq = jax.random.randint(k_tgt, (B, L_TGT), 1, TGT_VOCAB, dtype=jnp.int32)

    params = init_params(k_par, SRC_VOCAB, TGT_VOCAB, EMBED, FF, N_ENC, N_DEC, MAX_LEN)

    fwd = jax.jit(functools.partial(transformer_forward,
                                    src_pad_idx=SRC_PAD_IDX, num_heads=HEADS,
                                    tgt_vocab=TGT_VOCAB))
    out = fwd(params, src_seq, tgt_seq)
    out = jax.block_until_ready(out)

    assert out.shape == (B, L_TGT, TGT_VOCAB)
    assert bool(jnp.all(jnp.isfinite(out)))
    print("KERNEL_OK")
</pallas_src>

<mosaic_0001>
module attributes {stable_mosaic.version = 11 : i64} {
  func.func @_linear_kernel(%arg0: i32, %arg1: i32, %arg2: i32, %arg3: memref<16x128xbf16, #tpu.memory_space<vmem>>, %arg4: memref<128x384xbf16, #tpu.memory_space<vmem>>, %arg5: memref<1x384xf32, #tpu.memory_space<vmem>>, %arg6: memref<16x384xbf16, #tpu.memory_space<vmem>>, %arg7: memref<16x384xf32, #tpu.memory_space<vmem>>) attributes {dimension_semantics = [#tpu.dimension_semantics<parallel>, #tpu.dimension_semantics<parallel>, #tpu.dimension_semantics<arbitrary>], iteration_bounds = array<i64: 1, 1, 1>, scalar_prefetch = 0 : i64, scratch_operands = 1 : i64, tpu.core_type = #tpu.core_type<tc>, window_params = [{transform_indices = @transform_0, window_bounds = array<i64: 16, 128>}, {transform_indices = @transform_1, window_bounds = array<i64: 128, 384>}, {transform_indices = @transform_2, window_bounds = array<i64: 1, 384>}, {transform_indices = @transform_3, window_bounds = array<i64: 16, 384>}]} {
    %c0_i32 = arith.constant 0 : i32
    %0 = arith.cmpi eq, %arg2, %c0_i32 : i32
    %1 = arith.extui %0 : i1 to i32
    %c0_i32_0 = arith.constant 0 : i32
    %2 = arith.cmpi ne, %1, %c0_i32_0 : i32
    scf.if %2 {
      %cst_10 = arith.constant 0.000000e+00 : f32
      %12 = vector.broadcast %cst_10 : f32 to vector<16x384xf32>
      %c0_11 = arith.constant 0 : index
      %c0_12 = arith.constant 0 : index
      %13 = vector.load %arg7[%c0_11, %c0_12] : memref<16x384xf32, #tpu.memory_space<vmem>>, vector<16x384xf32>
      tpu.vector_store %arg7[%c0_11, %c0_12], %12 {strides = array<i32>} : memref<16x384xf32, #tpu.memory_space<vmem>>, vector<16x384xf32>,
    } else {
    }
    %c0 = arith.constant 0 : index
    %c0_1 = arith.constant 0 : index
    %3 = vector.load %arg7[%c0, %c0_1] : memref<16x384xf32, #tpu.memory_space<vmem>>, vector<16x384xf32>
    %c0_2 = arith.constant 0 : index
    %c0_3 = arith.constant 0 : index
    %4 = vector.load %arg3[%c0_2, %c0_3] : memref<16x128xbf16, #tpu.memory_space<vmem>>, vector<16x128xbf16>
    %c0_4 = arith.constant 0 : index
    %c0_5 = arith.constant 0 : index
    %5 = vector.load %arg4[%c0_4, %c0_5] : memref<128x384xbf16, #tpu.memory_space<vmem>>, vector<128x384xbf16>
    %cst = arith.constant dense<0.000000e+00> : vector<16x384xf32>
    %6 = tpu.matmul %4, %5, %cst {dimension_numbers = #tpu.dot_dimension_numbers<[1], [0], [0], [1], [0, 0, 1, 1], [], []>} : vector<16x128xbf16>, vector<128x384xbf16>, vector<16x384xf32> -> vector<16x384xf32>
    %7 = arith.addf %3, %6 : vector<16x384xf32>
    %c0_6 = arith.constant 0 : index
    %c0_7 = arith.constant 0 : index
    %8 = vector.load %arg7[%c0_6, %c0_7] : memref<16x384xf32, #tpu.memory_space<vmem>>, vector<16x384xf32>
    tpu.vector_store %arg7[%c0_6, %c0_7], %7 {strides = array<i32>} : memref<16x384xf32, #tpu.memory_space<vmem>>, vector<16x384xf32>,
    %c0_i32_8 = arith.constant 0 : i32
    %9 = arith.cmpi eq, %arg2, %c0_i32_8 : i32
    %10 = arith.extui %9 : i1 to i32
    %c0_i32_9 = arith.constant 0 : i32
    %11 = arith.cmpi ne, %10, %c0_i32_9 : i32
    scf.if %11 {
      %c0_10 = arith.constant 0 : index
      %c0_11 = arith.constant 0 : index
      %12 = vector.load %arg7[%c0_10, %c0_11] : memref<16x384xf32, #tpu.memory_space<vmem>>, vector<16x384xf32>
      %c0_12 = arith.constant 0 : index
      %c0_13 = arith.constant 0 : index
      %13 = vector.load %arg5[%c0_12, %c0_13] : memref<1x384xf32, #tpu.memory_space<vmem>>, vector<1x384xf32>
      %14 = vector.broadcast %13 : vector<1x384xf32> to vector<16x384xf32>
      %15 = arith.addf %12, %14 : vector<16x384xf32>
      %16 = arith.truncf %15 : vector<16x384xf32> to vector<16x384xbf16>
      %c0_14 = arith.constant 0 : index
      %c0_15 = arith.constant 0 : index
      %17 = vector.load %arg6[%c0_14, %c0_15] : memref<16x384xbf16, #tpu.memory_space<vmem>>, vector<16x384xbf16>
      tpu.vector_store %arg6[%c0_14, %c0_15], %16 {strides = array<i32>} : memref<16x384xbf16, #tpu.memory_space<vmem>>, vector<16x384xbf16>,
    } else {
    }
    return
  }
  func.func @transform_0(%arg0: i32, %arg1: i32, %arg2: i32) -> (i32, i32) {
    %c0_i32 = arith.constant 0 : i32
    return %arg0, %arg2 : i32, i32
  }
  func.func @transform_1(%arg0: i32, %arg1: i32, %arg2: i32) -> (i32, i32) {
    %c0_i32 = arith.constant 0 : i32
    return %arg2, %arg1 : i32, i32
  }
  func.func @transform_2(%arg0: i32, %arg1: i32, %arg2: i32) -> (i32, i32) {
    %c0_i32 = arith.constant 0 : i32
    %c0_i32_0 = arith.constant 0 : i32
    return %c0_i32, %arg1 : i32, i32
  }
  func.func @transform_3(%arg0: i32, %arg1: i32, %arg2: i32) -> (i32, i32) {
    %c0_i32 = arith.constant 0 : i32
    return %arg0, %arg1 : i32, i32
  }
}

module attributes {stable_mosaic.version = 11 : i64} {
  func.func @_attn_self_kernel(%arg0: i32, %arg1: memref<1x8x384xbf16, #tpu.memory_space<vmem>>, %arg2: memref<1x1x8xf32, #tpu.memory_space<vmem>>, %arg3: memref<1x8x128xbf16, #tpu.memory_space<vmem>>) attributes {dimension_semantics = [#tpu.dimension_semantics<parallel>], iteration_bounds = array<i64: 2>, scalar_prefetch = 0 : i64, scratch_operands = 0 : i64, tpu.core_type = #tpu.core_type<tc>, window_params = [{transform_indices = @transform_0, window_bounds = array<i64: 1, 8, 384>}, {transform_indices = @transform_1, window_bounds = array<i64: 1, 1, 8>}, {transform_indices = @transform_2, window_bounds = array<i64: 1, 8, 128>}]} {
    %c0 = arith.constant 0 : index
    %c0_0 = arith.constant 0 : index
    %c0_1 = arith.constant 0 : index
    %0 = vector.load %arg1[%c0, %c0_0, %c0_1] : memref<1x8x384xbf16, #tpu.memory_space<vmem>>, vector<1x8x384xbf16>
    %1 = vector.shape_cast %0 : vector<1x8x384xbf16> to vector<8x384xbf16>
    %2 = vector.extract_strided_slice %1 {offsets = [0, 0], sizes = [8, 128], strides = [1, 1]} : vector<8x384xbf16> to vector<8x128xbf16>
    %3 = vector.extract_strided_slice %1 {offsets = [0, 128], sizes = [8, 128], strides = [1, 1]} : vector<8x384xbf16> to vector<8x128xbf16>
    %4 = vector.extract_strided_slice %1 {offsets = [0, 256], sizes = [8, 128], strides = [1, 1]} : vector<8x384xbf16> to vector<8x128xbf16>
    %c0_2 = arith.constant 0 : index
    %c0_3 = arith.constant 0 : index
    %c0_4 = arith.constant 0 : index
    %5 = vector.load %arg2[%c0_2, %c0_3, %c0_4] : memref<1x1x8xf32, #tpu.memory_space<vmem>>, vector<1x1x8xf32>
    %6 = vector.shape_cast %5 : vector<1x1x8xf32> to vector<1x8xf32>
    %cst = arith.constant 0.000000e+00 : f32
    %7 = vector.broadcast %cst : f32 to vector<1x8xf32>
    %8 = arith.cmpf ogt, %6, %7 : vector<1x8xf32>
    %cst_5 = arith.constant 0.000000e+00 : f32
    %cst_6 = arith.constant -1.000000e+09 : f32
    %9 = vector.broadcast %cst_5 : f32 to vector<1x8xf32>
    %10 = vector.broadcast %cst_6 : f32 to vector<1x8xf32>
    %11 = arith.select %8, %9, %10 : vector<1x8xi1>, vector<1x8xf32>
    %12 = vector.shape_cast %11 : vector<1x8xf32> to vector<1x8xf32>
    %13 = vector.broadcast %12 : vector<1x8xf32> to vector<8x8xf32>
    %14 = tpu.iota {dimensions = array<i32: 0>} : vector<8x8xi32>
    %15 = tpu.iota {dimensions = array<i32: 1>} : vector<8x8xi32>
    %16 = arith.cmpi sge, %14, %15 : vector<8x8xi32>
    %cst_7 = arith.constant -1.000000e+09 : f32
    %17 = vector.broadcast %cst_7 : f32 to vector<8x8xf32>
    %18 = arith.select %16, %13, %17 : vector<8x8xi1>, vector<8x8xf32>
    %19 = vector.extract_strided_slice %2 {offsets = [0, 0], sizes = [8, 32], strides = [1, 1]} : vector<8x128xbf16> to vector<8x32xbf16>
    %20 = vector.extract_strided_slice %3 {offsets = [0, 0], sizes = [8, 32], strides = [1, 1]} : vector<8x128xbf16> to vector<8x32xbf16>
    %21 = vector.extract_strided_slice %4 {offsets = [0, 0], sizes = [8, 32], strides = [1, 1]} : vector<8x128xbf16> to vector<8x32xbf16>
    %cst_8 = arith.constant dense<0.000000e+00> : vector<8x8xf32>
    %22 = tpu.matmul %19, %20, %cst_8 {dimension_numbers = #tpu.dot_dimension_numbers<[1], [1], [0], [0], [0, 0, 1, 0], [], []>} : vector<8x32xbf16>, vector<8x32xbf16>, vector<8x8xf32> -> vector<8x8xf32>
    %cst_9 = arith.constant 0.176776692 : f32
    %23 = vector.broadcast %cst_9 : f32 to vector<8x8xf32>
    %24 = arith.mulf %22, %23 : vector<8x8xf32>
    %25 = arith.addf %24, %18 : vector<8x8xf32>
    %cst_10 = arith.constant dense<0xFF800000> : vector<8xf32>
    %26 = vector.multi_reduction <maximumf>, %25, %cst_10 [1] : vector<8x8xf32> to vector<8xf32>
    %27 = vector.shape_cast %26 : vector<8xf32> to vector<8x1xf32>
    %28 = vector.broadcast %27 : vector<8x1xf32> to vector<8x8xf32>
    %29 = arith.subf %25, %28 : vector<8x8xf32>
    %30 = math.exp %29 : vector<8x8xf32>
    %cst_11 = arith.constant dense<0.000000e+00> : vector<8xf32>
    %31 = vector.multi_reduction <add>, %30, %cst_11 [1] : vector<8x8xf32> to vector<8xf32>
    %32 = vector.shape_cast %31 : vector<8xf32> to vector<8x1xf32>
    %33 = tpu.reciprocal %32 {approx = true} : vector<8x1xf32> -> vector<8x1xf32>
    %34 = vector.broadcast %33 : vector<8x1xf32> to vector<8x8xf32>
    %35 = arith.mulf %30, %34 : vector<8x8xf32>
    %36 = arith.truncf %35 : vector<8x8xf32> to vector<8x8xbf16>
    %cst_12 = arith.constant dense<0.000000e+00> : vector<8x32xf32>
    %37 = tpu.matmul %36, %21, %cst_12 {dimension_numbers = #tpu.dot_dimension_numbers<[1], [0], [0], [1], [0, 0, 1, 1], [], []>} : vector<8x8xbf16>, vector<8x32xbf16>, vector<8x32xf32> -> vector<8x32xf32>
    %38 = vector.extract_strided_slice %2 {offsets = [0, 32], sizes = [8, 32], strides = [1, 1]} : vector<8x128xbf16> to vector<8x32xbf16>
    %39 = vector.extract_strided_slice %3 {offsets = [0, 32], sizes = [8, 32], strides = [1, 1]} : vector<8x128xbf16> to vector<8x32xbf16>
    %40 = vector.extract_strided_slice %4 {offsets = [0, 32], sizes = [8, 32], strides = [1, 1]} : vector<8x128xbf16> to vector<8x32xbf16>
    %cst_13 = arith.constant dense<0.000000e+00> : vector<8x8xf32>
    %41 = tpu.matmul %38, %39, %cst_13 {dimension_numbers = #tpu.dot_dimension_numbers<[1], [1], [0], [0], [0, 0, 1, 0], [], []>} : vector<8x32xbf16>, vector<8x32xbf16>, vector<8x8xf32> -> vector<8x8xf32>
    %cst_14 = arith.constant 0.176776692 : f32
    %42 = vector.broadcast %cst_14 : f32 to vector<8x8xf32>
    %43 = arith.mulf %41, %42 : vector<8x8xf32>
    %44 = arith.addf %43, %18 : vector<8x8xf32>
    %cst_15 = arith.constant dense<0xFF800000> : vector<8xf32>
    %45 = vector.multi_reduction <maximumf>, %44, %cst_15 [1] : vector<8x8xf32> to vector<8xf32>
    %46 = vector.shape_cast %45 : vector<8xf32> to vector<8x1xf32>
    %47 = vector.broadcast %46 : vector<8x1xf32> to vector<8x8xf32>
    %48 = arith.subf %44, %47 : vector<8x8xf32>
    %49 = math.exp %48 : vector<8x8xf32>
    %cst_16 = arith.constant dense<0.000000e+00> : vector<8xf32>
    %50 = vector.multi_reduction <add>, %49, %cst_16 [1] : vector<8x8xf32> to vector<8xf32>
    %51 = vector.shape_cast %50 : vector<8xf32> to vector<8x1xf32>
    %52 = tpu.reciprocal %51 {approx = true} : vector<8x1xf32> -> vector<8x1xf32>
    %53 = vector.broadcast %52 : vector<8x1xf32> to vector<8x8xf32>
    %54 = arith.mulf %49, %53 : vector<8x8xf32>
    %55 = arith.truncf %54 : vector<8x8xf32> to vector<8x8xbf16>
    %cst_17 = arith.constant dense<0.000000e+00> : vector<8x32xf32>
    %56 = tpu.matmul %55, %40, %cst_17 {dimension_numbers = #tpu.dot_dimension_numbers<[1], [0], [0], [1], [0, 0, 1, 1], [], []>} : vector<8x8xbf16>, vector<8x32xbf16>, vector<8x32xf32> -> vector<8x32xf32>
    %57 = vector.extract_strided_slice %2 {offsets = [0, 64], sizes = [8, 32], strides = [1, 1]} : vector<8x128xbf16> to vector<8x32xbf16>
    %58 = vector.extract_strided_slice %3 {offsets = [0, 64], sizes = [8, 32], strides = [1, 1]} : vector<8x128xbf16> to vector<8x32xbf16>
    %59 = vector.extract_strided_slice %4 {offsets = [0, 64], sizes = [8, 32], strides = [1, 1]} : vector<8x128xbf16> to vector<8x32xbf16>
    %cst_18 = arith.constant dense<0.000000e+00> : vector<8x8xf32>
    %60 = tpu.matmul %57, %58, %cst_18 {dimension_numbers = #tpu.dot_dimension_numbers<[1], [1], [0], [0], [0, 0, 1, 0], [], []>} : vector<8x32xbf16>, vector<8x32xbf16>, vector<8x8xf32> -> vector<8x8xf32>
    %cst_19 = arith.constant 0.176776692 : f32
    %61 = vector.broadcast %cst_19 : f32 to vector<8x8xf32>
    %62 = arith.mulf %60, %61 : vector<8x8xf32>
    %63 = arith.addf %62, %18 : vector<8x8xf32>
    %cst_20 = arith.constant dense<0xFF800000> : vector<8xf32>
    %64 = vector.multi_reduction <maximumf>, %63, %cst_20 [1] : vector<8x8xf32> to vector<8xf32>
    %65 = vector.shape_cast %64 : vector<8xf32> to vector<8x1xf32>
    %66 = vector.broadcast %65 : vector<8x1xf32> to vector<8x8xf32>
    %67 = arith.subf %63, %66 : vector<8x8xf32>
    %68 = math.exp %67 : vector<8x8xf32>
    %cst_21 = arith.constant dense<0.000000e+00> : vector<8xf32>
    %69 = vector.multi_reduction <add>, %68, %cst_21 [1] : vector<8x8xf32> to vector<8xf32>
    %70 = vector.shape_cast %69 : vector<8xf32> to vector<8x1xf32>
    %71 = tpu.reciprocal %70 {approx = true} : vector<8x1xf32> -> vector<8x1xf32>
    %72 = vector.broadcast %71 : vector<8x1xf32> to vector<8x8xf32>
    %73 = arith.mulf %68, %72 : vector<8x8xf32>
    %74 = arith.truncf %73 : vector<8x8xf32> to vector<8x8xbf16>
    %cst_22 = arith.constant dense<0.000000e+00> : vector<8x32xf32>
    %75 = tpu.matmul %74, %59, %cst_22 {dimension_numbers = #tpu.dot_dimension_numbers<[1], [0], [0], [1], [0, 0, 1, 1], [], []>} : vector<8x8xbf16>, vector<8x32xbf16>, vector<8x32xf32> -> vector<8x32xf32>
    %76 = vector.extract_strided_slice %2 {offsets = [0, 96], sizes = [8, 32], strides = [1, 1]} : vector<8x128xbf16> to vector<8x32xbf16>
    %77 = vector.extract_strided_slice %3 {offsets = [0, 96], sizes = [8, 32], strides = [1, 1]} : vector<8x128xbf16> to vector<8x32xbf16>
    %78 = vector.extract_strided_slice %4 {offsets = [0, 96], sizes = [8, 32], strides = [1, 1]} : vector<8x128xbf16> to vector<8x32xbf16>
    %cst_23 = arith.constant dense<0.000000e+00> : vector<8x8xf32>
    %79 = tpu.matmul %76, %77, %cst_23 {dimension_numbers = #tpu.dot_dimension_numbers<[1], [1], [0], [0], [0, 0, 1, 0], [], []>} : vector<8x32xbf16>, vector<8x32xbf16>, vector<8x8xf32> -> vector<8x8xf32>
    %cst_24 = arith.constant 0.176776692 : f32
    %80 = vector.broadcast %cst_24 : f32 to vector<8x8xf32>
    %81 = arith.mulf %79, %80 : vector<8x8xf32>
    %82 = arith.addf %81, %18 : vector<8x8xf32>
    %cst_25 = arith.constant dense<0xFF800000> : vector<8xf32>
    %83 = vector.multi_reduction <maximumf>, %82, %cst_25 [1] : vector<8x8xf32> to vector<8xf32>
    %84 = vector.shape_cast %83 : vector<8xf32> to vector<8x1xf32>
    %85 = vector.broadcast %84 : vector<8x1xf32> to vector<8x8xf32>
    %86 = arith.subf %82, %85 : vector<8x8xf32>
    %87 = math.exp %86 : vector<8x8xf32>
    %cst_26 = arith.constant dense<0.000000e+00> : vector<8xf32>
    %88 = vector.multi_reduction <add>, %87, %cst_26 [1] : vector<8x8xf32> to vector<8xf32>
    %89 = vector.shape_cast %88 : vector<8xf32> to vector<8x1xf32>
    %90 = tpu.reciprocal %89 {approx = true} : vector<8x1xf32> -> vector<8x1xf32>
    %91 = vector.broadcast %90 : vector<8x1xf32> to vector<8x8xf32>
    %92 = arith.mulf %87, %91 : vector<8x8xf32>
    %93 = arith.truncf %92 : vector<8x8xf32> to vector<8x8xbf16>
    %cst_27 = arith.constant dense<0.000000e+00> : vector<8x32xf32>
    %94 = tpu.matmul %93, %78, %cst_27 {dimension_numbers = #tpu.dot_dimension_numbers<[1], [0], [0], [1], [0, 0, 1, 1], [], []>} : vector<8x8xbf16>, vector<8x32xbf16>, vector<8x32xf32> -> vector<8x32xf32>
    %95 = tpu.concatenate %37, %56, %75, %94 in 1 : vector<8x32xf32>, vector<8x32xf32>, vector<8x32xf32>, vector<8x32xf32> -> vector<8x128xf32>
    %96 = arith.truncf %95 : vector<8x128xf32> to vector<8x128xbf16>
    %c0_28 = arith.constant 0 : index
    %c0_29 = arith.constant 0 : index
    %c0_30 = arith.constant 0 : index
    %97 = vector.load %arg3[%c0_28, %c0_29, %c0_30] : memref<1x8x128xbf16, #tpu.memory_space<vmem>>, vector<1x8x128xbf16>
    %98 = vector.shape_cast %97 : vector<1x8x128xbf16> to vector<8x128xbf16>
    %99 = vector.shape_cast %96 : vector<8x128xbf16> to vector<1x8x128xbf16>
    tpu.vector_store %arg3[%c0_28, %c0_29, %c0_30], %99 {strides = array<i32>} : memref<1x8x128xbf16, #tpu.memory_space<vmem>>, vector<1x8x128xbf16>,
    return
  }
  func.func @transform_0(%arg0: i32) -> (i32, i32, i32) {
    %c0_i32 = arith.constant 0 : i32
    %c0_i32_0 = arith.constant 0 : i32
    %c0_i32_1 = arith.constant 0 : i32
    return %arg0, %c0_i32, %c0_i32_0 : i32, i32, i32
  }
  func.func @transform_1(%arg0: i32) -> (i32, i32, i32) {
    %c0_i32 = arith.constant 0 : i32
    %c0_i32_0 = arith.constant 0 : i32
    %c0_i32_1 = arith.constant 0 : i32
    return %arg0, %c0_i32, %c0_i32_0 : i32, i32, i32
  }
  func.func @transform_2(%arg0: i32) -> (i32, i32, i32) {
    %c0_i32 = arith.constant 0 : i32
    %c0_i32_0 = arith.constant 0 : i32
    %c0_i32_1 = arith.constant 0 : i32
    return %arg0, %c0_i32, %c0_i32_0 : i32, i32, i32
  }
}

module attributes {stable_mosaic.version = 11 : i64} {
  func.func @_linear_add_ln_kernel(%arg0: i32, %arg1: i32, %arg2: memref<16x128xbf16, #tpu.memory_space<vmem>>, %arg3: memref<128x128xbf16, #tpu.memory_space<vmem>>, %arg4: memref<1x128xf32, #tpu.memory_space<vmem>>, %arg5: memref<16x128xbf16, #tpu.memory_space<vmem>>, %arg6: memref<1x128xf32, #tpu.memory_space<vmem>>, %arg7: memref<1x128xf32, #tpu.memory_space<vmem>>, %arg8: memref<16x128xbf16, #tpu.memory_space<vmem>>, %arg9: memref<16x128xf32, #tpu.memory_space<vmem>>) attributes {dimension_semantics = [#tpu.dimension_semantics<parallel>, #tpu.dimension_semantics<arbitrary>], iteration_bounds = array<i64: 1, 1>, scalar_prefetch = 0 : i64, scratch_operands = 1 : i64, tpu.core_type = #tpu.core_type<tc>, window_params = [{transform_indices = @transform_0, window_bounds = array<i64: 16, 128>}, {transform_indices = @transform_1, window_bounds = array<i64: 128, 128>}, {pipeline_mode = #tpu.pipeline_mode<synchronous>, transform_indices = @transform_2, window_bounds = array<i64: 1, 128>}, {transform_indices = @transform_3, window_bounds = array<i64: 16, 128>}, {pipeline_mode = #tpu.pipeline_mode<synchronous>, transform_indices = @transform_4, window_bounds = array<i64: 1, 128>}, {pipeline_mode = #tpu.pipeline_mode<synchronous>, transform_indices = @transform_5, window_bounds = array<i64: 1, 128>}, {transform_indices = @transform_6, window_bounds = array<i64: 16, 128>}]} {
    %c0_i32 = arith.constant 0 : i32
    %0 = arith.cmpi eq, %arg1, %c0_i32 : i32
    %1 = arith.extui %0 : i1 to i32
    %c0_i32_0 = arith.constant 0 : i32
    %2 = arith.cmpi ne, %1, %c0_i32_0 : i32
    scf.if %2 {
      %cst_10 = arith.constant 0.000000e+00 : f32
      %12 = vector.broadcast %cst_10 : f32 to vector<16x128xf32>
      %c0_11 = arith.constant 0 : index
      %c0_12 = arith.constant 0 : index
      %13 = vector.load %arg9[%c0_11, %c0_12] : memref<16x128xf32, #tpu.memory_space<vmem>>, vector<16x128xf32>
      tpu.vector_store %arg9[%c0_11, %c0_12], %12 {strides = array<i32>} : memref<16x128xf32, #tpu.memory_space<vmem>>, vector<16x128xf32>,
    } else {
    }
    %c0 = arith.constant 0 : index
    %c0_1 = arith.constant 0 : index
    %3 = vector.load %arg9[%c0, %c0_1] : memref<16x128xf32, #tpu.memory_space<vmem>>, vector<16x128xf32>
    %c0_2 = arith.constant 0 : index
    %c0_3 = arith.constant 0 : index
    %4 = vector.load %arg2[%c0_2, %c0_3] : memref<16x128xbf16, #tpu.memory_space<vmem>>, vector<16x128xbf16>
    %c0_4 = arith.constant 0 : index
    %c0_5 = arith.constant 0 : index
    %5 = vector.load %arg3[%c0_4, %c0_5] : memref<128x128xbf16, #tpu.memory_space<vmem>>, vector<128x128xbf16>
    %cst = arith.constant dense<0.000000e+00> : vector<16x128xf32>
    %6 = tpu.matmul %4, %5, %cst {dimension_numbers = #tpu.dot_dimension_numbers<[1], [0], [0], [1], [0, 0, 1, 1], [], []>} : vector<16x128xbf16>, vector<128x128xbf16>, vector<16x128xf32> -> vector<16x128xf32>
    %7 = arith.addf %3, %6 : vector<16x128xf32>
    %c0_6 = arith.constant 0 : index
    %c0_7 = arith.constant 0 : index
    %8 = vector.load %arg9[%c0_6, %c0_7] : memref<16x128xf32, #tpu.memory_space<vmem>>, vector<16x128xf32>
    tpu.vector_store %arg9[%c0_6, %c0_7], %7 {strides = array<i32>} : memref<16x128xf32, #tpu.memory_space<vmem>>, vector<16x128xf32>,
    %c0_i32_8 = arith.constant 0 : i32
    %9 = arith.cmpi eq, %arg1, %c0_i32_8 : i32
    %10 = arith.extui %9 : i1 to i32
    %c0_i32_9 = arith.constant 0 : i32
    %11 = arith.cmpi ne, %10, %c0_i32_9 : i32
    scf.if %11 {
      %c0_10 = arith.constant 0 : index
      %c0_11 = arith.constant 0 : index
      %12 = vector.load %arg9[%c0_10, %c0_11] : memref<16x128xf32, #tpu.memory_space<vmem>>, vector<16x128xf32>
      %c0_12 = arith.constant 0 : index
      %c0_13 = arith.constant 0 : index
      %13 = vector.load %arg4[%c0_12, %c0_13] : memref<1x128xf32, #tpu.memory_space<vmem>>, vector<1x128xf32>
      %14 = vector.broadcast %13 : vector<1x128xf32> to vector<16x128xf32>
      %15 = arith.addf %12, %14 : vector<16x128xf32>
      %c0_14 = arith.constant 0 : index
      %c0_15 = arith.constant 0 : index
      %16 = vector.load %arg5[%c0_14, %c0_15] : memref<16x128xbf16, #tpu.memory_space<vmem>>, vector<16x128xbf16>
      %17 = arith.extf %16 : vector<16x128xbf16> to vector<16x128xf32>
      %18 = arith.addf %15, %17 : vector<16x128xf32>
      %cst_16 = arith.constant dense<0.000000e+00> : vector<16xf32>
      %19 = vector.multi_reduction <add>, %18, %cst_16 [1] : vector<16x128xf32> to vector<16xf32>
      %20 = vector.shape_cast %19 : vector<16xf32> to vector<16x1xf32>
      %cst_17 = arith.constant 1.280000e+02 : f32
      %21 = vector.broadcast %cst_17 : f32 to vector<16x1xf32>
      %22 = arith.divf %20, %21 : vector<16x1xf32>
      %23 = vector.broadcast %22 : vector<16x1xf32> to vector<16x128xf32>
      %24 = arith.subf %18, %23 : vector<16x128xf32>
      %25 = arith.mulf %24, %24 : vector<16x128xf32>
      %cst_18 = arith.constant dense<0.000000e+00> : vector<16xf32>
      %26 = vector.multi_reduction <add>, %25, %cst_18 [1] : vector<16x128xf32> to vector<16xf32>
      %27 = vector.shape_cast %26 : vector<16xf32> to vector<16x1xf32>
      %cst_19 = arith.constant 1.280000e+02 : f32
      %28 = vector.broadcast %cst_19 : f32 to vector<16x1xf32>
      %29 = arith.divf %27, %28 : vector<16x1xf32>
      %30 = vector.broadcast %22 : vector<16x1xf32> to vector<16x128xf32>
      %31 = arith.subf %18, %30 : vector<16x128xf32>
      %cst_20 = arith.constant 9.99999974E-6 : f32
      %32 = vector.broadcast %cst_20 : f32 to vector<16x1xf32>
      %33 = arith.addf %29, %32 : vector<16x1xf32>
      %34 = math.rsqrt %33 : vector<16x1xf32>
      %35 = vector.broadcast %34 : vector<16x1xf32> to vector<16x128xf32>
      %36 = arith.mulf %31, %35 : vector<16x128xf32>
      %c0_21 = arith.constant 0 : index
      %c0_22 = arith.constant 0 : index
      %37 = vector.load %arg6[%c0_21, %c0_22] : memref<1x128xf32, #tpu.memory_space<vmem>>, vector<1x128xf32>
      %38 = vector.broadcast %37 : vector<1x128xf32> to vector<16x128xf32>
      %39 = arith.mulf %36, %38 : vector<16x128xf32>
      %c0_23 = arith.constant 0 : index
      %c0_24 = arith.constant 0 : index
      %40 = vector.load %arg7[%c0_23, %c0_24] : memref<1x128xf32, #tpu.memory_space<vmem>>, vector<1x128xf32>
      %41 = vector.broadcast %40 : vector<1x128xf32> to vector<16x128xf32>
      %42 = arith.addf %39, %41 : vector<16x128xf32>
      %43 = arith.truncf %42 : vector<16x128xf32> to vector<16x128xbf16>
      %c0_25 = arith.constant 0 : index
      %c0_26 = arith.constant 0 : index
      %44 = vector.load %arg8[%c0_25, %c0_26] : memref<16x128xbf16, #tpu.memory_space<vmem>>, vector<16x128xbf16>
      tpu.vector_store %arg8[%c0_25, %c0_26], %43 {strides = array<i32>} : memref<16x128xbf16, #tpu.memory_space<vmem>>, vector<16x128xbf16>,
    } else {
    }
    return
  }
  func.func @transform_0(%arg0: i32, %arg1: i32) -> (i32, i32) {
    %c0_i32 = arith.constant 0 : i32
    return %arg0, %arg1 : i32, i32
  }
  func.func @transform_1(%arg0: i32, %arg1: i32) -> (i32, i32) {
    %c0_i32 = arith.constant 0 : i32
    %c0_i32_0 = arith.constant 0 : i32
    return %arg1, %c0_i32 : i32, i32
  }
  func.func @transform_2(%arg0: i32, %arg1: i32) -> (i32, i32) {
    %c0_i32 = arith.constant 0 : i32
    %c0_i32_0 = arith.constant 0 : i32
    %c0_i32_1 = arith.constant 0 : i32
    return %c0_i32, %c0_i32_0 : i32, i32
  }
  func.func @transform_3(%arg0: i32, %arg1: i32) -> (i32, i32) {
    %c0_i32 = arith.constant 0 : i32
    %c0_i32_0 = arith.constant 0 : i32
    return %arg0, %c0_i32 : i32, i32
  }
  func.func @transform_4(%arg0: i32, %arg1: i32) -> (i32, i32) {
    %c0_i32 = arith.constant 0 : i32
    %c0_i32_0 = arith.constant 0 : i32
    %c0_i32_1 = arith.constant 0 : i32
    return %c0_i32, %c0_i32_0 : i32, i32
  }
  func.func @transform_5(%arg0: i32, %arg1: i32) -> (i32, i32) {
    %c0_i32 = arith.constant 0 : i32
    %c0_i32_0 = arith.constant 0 : i32
    %c0_i32_1 = arith.constant 0 : i32
    return %c0_i32, %c0_i32_0 : i32, i32
  }
  func.func @transform_6(%arg0: i32, %arg1: i32) -> (i32, i32) {
    %c0_i32 = arith.constant 0 : i32
    %c0_i32_0 = arith.constant 0 : i32
    return %arg0, %c0_i32 : i32, i32
  }
}

module attributes {stable_mosaic.version = 11 : i64} {
  func.func @_linear_kernel(%arg0: i32, %arg1: i32, %arg2: i32, %arg3: memref<16x128xbf16, #tpu.memory_space<vmem>>, %arg4: memref<128x128xbf16, #tpu.memory_space<vmem>>, %arg5: memref<1x128xf32, #tpu.memory_space<vmem>>, %arg6: memref<16x128xbf16, #tpu.memory_space<vmem>>, %arg7: memref<16x128xf32, #tpu.memory_space<vmem>>) attributes {dimension_semantics = [#tpu.dimension_semantics<parallel>, #tpu.dimension_semantics<parallel>, #tpu.dimension_semantics<arbitrary>], iteration_bounds = array<i64: 1, 1, 1>, scalar_prefetch = 0 : i64, scratch_operands = 1 : i64, tpu.core_type = #tpu.core_type<tc>, window_params = [{transform_indices = @transform_0, window_bounds = array<i64: 16, 128>}, {transform_indices = @transform_1, window_bounds = array<i64: 128, 128>}, {transform_indices = @transform_2, window_bounds = array<i64: 1, 128>}, {transform_indices = @transform_3, window_bounds = array<i64: 16, 128>}]} {
    %c0_i32 = arith.constant 0 : i32
    %0 = arith.cmpi eq, %arg2, %c0_i32 : i32
    %1 = arith.extui %0 : i1 to i32
    %c0_i32_0 = arith.constant 0 : i32
    %2 = arith.cmpi ne, %1, %c0_i32_0 : i32
    scf.if %2 {
      %cst_10 = arith.constant 0.000000e+00 : f32
      %12 = vector.broadcast %cst_10 : f32 to vector<16x128xf32>
      %c0_11 = arith.constant 0 : index
      %c0_12 = arith.constant 0 : index
      %13 = vector.load %arg7[%c0_11, %c0_12] : memref<16x128xf32, #tpu.memory_space<vmem>>, vector<16x128xf32>
      tpu.vector_store %arg7[%c0_11, %c0_12], %12 {strides = array<i32>} : memref<16x128xf32, #tpu.memory_space<vmem>>, vector<16x128xf32>,
    } else {
    }
    %c0 = arith.constant 0 : index
    %c0_1 = arith.constant 0 : index
    %3 = vector.load %arg7[%c0, %c0_1] : memref<16x128xf32, #tpu.memory_space<vmem>>, vector<16x128xf32>
    %c0_2 = arith.constant 0 : index
    %c0_3 = arith.constant 0 : index
    %4 = vector.load %arg3[%c0_2, %c0_3] : memref<16x128xbf16, #tpu.memory_space<vmem>>, vector<16x128xbf16>
    %c0_4 = arith.constant 0 : index
    %c0_5 = arith.constant 0 : index
    %5 = vector.load %arg4[%c0_4, %c0_5] : memref<128x128xbf16, #tpu.memory_space<vmem>>, vector<128x128xbf16>
    %cst = arith.constant dense<0.000000e+00> : vector<16x128xf32>
    %6 = tpu.matmul %4, %5, %cst {dimension_numbers = #tpu.dot_dimension_numbers<[1], [0], [0], [1], [0, 0, 1, 1], [], []>} : vector<16x128xbf16>, vector<128x128xbf16>, vector<16x128xf32> -> vector<16x128xf32>
    %7 = arith.addf %3, %6 : vector<16x128xf32>
    %c0_6 = arith.constant 0 : index
    %c0_7 = arith.constant 0 : index
    %8 = vector.load %arg7[%c0_6, %c0_7] : memref<16x128xf32, #tpu.memory_space<vmem>>, vector<16x128xf32>
    tpu.vector_store %arg7[%c0_6, %c0_7], %7 {strides = array<i32>} : memref<16x128xf32, #tpu.memory_space<vmem>>, vector<16x128xf32>,
    %c0_i32_8 = arith.constant 0 : i32
    %9 = arith.cmpi eq, %arg2, %c0_i32_8 : i32
    %10 = arith.extui %9 : i1 to i32
    %c0_i32_9 = arith.constant 0 : i32
    %11 = arith.cmpi ne, %10, %c0_i32_9 : i32
    scf.if %11 {
      %c0_10 = arith.constant 0 : index
      %c0_11 = arith.constant 0 : index
      %12 = vector.load %arg7[%c0_10, %c0_11] : memref<16x128xf32, #tpu.memory_space<vmem>>, vector<16x128xf32>
      %c0_12 = arith.constant 0 : index
      %c0_13 = arith.constant 0 : index
      %13 = vector.load %arg5[%c0_12, %c0_13] : memref<1x128xf32, #tpu.memory_space<vmem>>, vector<1x128xf32>
      %14 = vector.broadcast %13 : vector<1x128xf32> to vector<16x128xf32>
      %15 = arith.addf %12, %14 : vector<16x128xf32>
      %16 = arith.truncf %15 : vector<16x128xf32> to vector<16x128xbf16>
      %c0_14 = arith.constant 0 : index
      %c0_15 = arith.constant 0 : index
      %17 = vector.load %arg6[%c0_14, %c0_15] : memref<16x128xbf16, #tpu.memory_space<vmem>>, vector<16x128xbf16>
      tpu.vector_store %arg6[%c0_14, %c0_15], %16 {strides = array<i32>} : memref<16x128xbf16, #tpu.memory_space<vmem>>, vector<16x128xbf16>,
    } else {
    }
    return
  }
  func.func @transform_0(%arg0: i32, %arg1: i32, %arg2: i32) -> (i32, i32) {
    %c0_i32 = arith.constant 0 : i32
    return %arg0, %arg2 : i32, i32
  }
  func.func @transform_1(%arg0: i32, %arg1: i32, %arg2: i32) -> (i32, i32) {
    %c0_i32 = arith.constant 0 : i32
    return %arg2, %arg1 : i32, i32
  }
  func.func @transform_2(%arg0: i32, %arg1: i32, %arg2: i32) -> (i32, i32) {
    %c0_i32 = arith.constant 0 : i32
    %c0_i32_0 = arith.constant 0 : i32
    return %c0_i32, %arg1 : i32, i32
  }
  func.func @transform_3(%arg0: i32, %arg1: i32, %arg2: i32) -> (i32, i32) {
    %c0_i32 = arith.constant 0 : i32
    return %arg0, %arg1 : i32, i32
  }
}

module attributes {stable_mosaic.version = 11 : i64} {
  func.func @_linear_kernel(%arg0: i32, %arg1: i32, %arg2: i32, %arg3: memref<16x128xbf16, #tpu.memory_space<vmem>>, %arg4: memref<128x256xbf16, #tpu.memory_space<vmem>>, %arg5: memref<1x256xf32, #tpu.memory_space<vmem>>, %arg6: memref<16x256xbf16, #tpu.memory_space<vmem>>, %arg7: memref<16x256xf32, #tpu.memory_space<vmem>>) attributes {dimension_semantics = [#tpu.dimension_semantics<parallel>, #tpu.dimension_semantics<parallel>, #tpu.dimension_semantics<arbitrary>], iteration_bounds = array<i64: 1, 1, 1>, scalar_prefetch = 0 : i64, scratch_operands = 1 : i64, tpu.core_type = #tpu.core_type<tc>, window_params = [{transform_indices = @transform_0, window_bounds = array<i64: 16, 128>}, {transform_indices = @transform_1, window_bounds = array<i64: 128, 256>}, {transform_indices = @transform_2, window_bounds = array<i64: 1, 256>}, {transform_indices = @transform_3, window_bounds = array<i64: 16, 256>}]} {
    %c0_i32 = arith.constant 0 : i32
    %0 = arith.cmpi eq, %arg2, %c0_i32 : i32
    %1 = arith.extui %0 : i1 to i32
    %c0_i32_0 = arith.constant 0 : i32
    %2 = arith.cmpi ne, %1, %c0_i32_0 : i32
    scf.if %2 {
      %cst_10 = arith.constant 0.000000e+00 : f32
      %12 = vector.broadcast %cst_10 : f32 to vector<16x256xf32>
      %c0_11 = arith.constant 0 : index
      %c0_12 = arith.constant 0 : index
      %13 = vector.load %arg7[%c0_11, %c0_12] : memref<16x256xf32, #tpu.memory_space<vmem>>, vector<16x256xf32>
      tpu.vector_store %arg7[%c0_11, %c0_12], %12 {strides = array<i32>} : memref<16x256xf32, #tpu.memory_space<vmem>>, vector<16x256xf32>,
    } else {
    }
    %c0 = arith.constant 0 : index
    %c0_1 = arith.constant 0 : index
    %3 = vector.load %arg7[%c0, %c0_1] : memref<16x256xf32, #tpu.memory_space<vmem>>, vector<16x256xf32>
    %c0_2 = arith.constant 0 : index
    %c0_3 = arith.constant 0 : index
    %4 = vector.load %arg3[%c0_2, %c0_3] : memref<16x128xbf16, #tpu.memory_space<vmem>>, vector<16x128xbf16>
    %c0_4 = arith.constant 0 : index
    %c0_5 = arith.constant 0 : index
    %5 = vector.load %arg4[%c0_4, %c0_5] : memref<128x256xbf16, #tpu.memory_space<vmem>>, vector<128x256xbf16>
    %cst = arith.constant dense<0.000000e+00> : vector<16x256xf32>
    %6 = tpu.matmul %4, %5, %cst {dimension_numbers = #tpu.dot_dimension_numbers<[1], [0], [0], [1], [0, 0, 1, 1], [], []>} : vector<16x128xbf16>, vector<128x256xbf16>, vector<16x256xf32> -> vector<16x256xf32>
    %7 = arith.addf %3, %6 : vector<16x256xf32>
    %c0_6 = arith.constant 0 : index
    %c0_7 = arith.constant 0 : index
    %8 = vector.load %arg7[%c0_6, %c0_7] : memref<16x256xf32, #tpu.memory_space<vmem>>, vector<16x256xf32>
    tpu.vector_store %arg7[%c0_6, %c0_7], %7 {strides = array<i32>} : memref<16x256xf32, #tpu.memory_space<vmem>>, vector<16x256xf32>,
    %c0_i32_8 = arith.constant 0 : i32
    %9 = arith.cmpi eq, %arg2, %c0_i32_8 : i32
    %10 = arith.extui %9 : i1 to i32
    %c0_i32_9 = arith.constant 0 : i32
    %11 = arith.cmpi ne, %10, %c0_i32_9 : i32
    scf.if %11 {
      %c0_10 = arith.constant 0 : index
      %c0_11 = arith.constant 0 : index
      %12 = vector.load %arg7[%c0_10, %c0_11] : memref<16x256xf32, #tpu.memory_space<vmem>>, vector<16x256xf32>
      %c0_12 = arith.constant 0 : index
      %c0_13 = arith.constant 0 : index
      %13 = vector.load %arg5[%c0_12, %c0_13] : memref<1x256xf32, #tpu.memory_space<vmem>>, vector<1x256xf32>
      %14 = vector.broadcast %13 : vector<1x256xf32> to vector<16x256xf32>
      %15 = arith.addf %12, %14 : vector<16x256xf32>
      %16 = arith.truncf %15 : vector<16x256xf32> to vector<16x256xbf16>
      %c0_14 = arith.constant 0 : index
      %c0_15 = arith.constant 0 : index
      %17 = vector.load %arg6[%c0_14, %c0_15] : memref<16x256xbf16, #tpu.memory_space<vmem>>, vector<16x256xbf16>
      tpu.vector_store %arg6[%c0_14, %c0_15], %16 {strides = array<i32>} : memref<16x256xbf16, #tpu.memory_space<vmem>>, vector<16x256xbf16>,
    } else {
    }
    return
  }
  func.func @transform_0(%arg0: i32, %arg1: i32, %arg2: i32) -> (i32, i32) {
    %c0_i32 = arith.constant 0 : i32
    return %arg0, %arg2 : i32, i32
  }
  func.func @transform_1(%arg0: i32, %arg1: i32, %arg2: i32) -> (i32, i32) {
    %c0_i32 = arith.constant 0 : i32
    return %arg2, %arg1 : i32, i32
  }
  func.func @transform_2(%arg0: i32, %arg1: i32, %arg2: i32) -> (i32, i32) {
    %c0_i32 = arith.constant 0 : i32
    %c0_i32_0 = arith.constant 0 : i32
    return %c0_i32, %arg1 : i32, i32
  }
  func.func @transform_3(%arg0: i32, %arg1: i32, %arg2: i32) -> (i32, i32) {
    %c0_i32 = arith.constant 0 : i32
    return %arg0, %arg1 : i32, i32
  }
}

module attributes {stable_mosaic.version = 11 : i64} {
  func.func @_attn_self_kernel(%arg0: i32, %arg1: memref<1x8x384xbf16, #tpu.memory_space<vmem>>, %arg2: memref<1x1x8xf32, #tpu.memory_space<vmem>>, %arg3: memref<1x8x128xbf16, #tpu.memory_space<vmem>>) attributes {dimension_semantics = [#tpu.dimension_semantics<parallel>], iteration_bounds = array<i64: 2>, scalar_prefetch = 0 : i64, scratch_operands = 0 : i64, tpu.core_type = #tpu.core_type<tc>, window_params = [{transform_indices = @transform_0, window_bounds = array<i64: 1, 8, 384>}, {transform_indices = @transform_1, window_bounds = array<i64: 1, 1, 8>}, {transform_indices = @transform_2, window_bounds = array<i64: 1, 8, 128>}]} {
    %c0 = arith.constant 0 : index
    %c0_0 = arith.constant 0 : index
    %c0_1 = arith.constant 0 : index
    %0 = vector.load %arg1[%c0, %c0_0, %c0_1] : memref<1x8x384xbf16, #tpu.memory_space<vmem>>, vector<1x8x384xbf16>
    %1 = vector.shape_cast %0 : vector<1x8x384xbf16> to vector<8x384xbf16>
    %2 = vector.extract_strided_slice %1 {offsets = [0, 0], sizes = [8, 128], strides = [1, 1]} : vector<8x384xbf16> to vector<8x128xbf16>
    %3 = vector.extract_strided_slice %1 {offsets = [0, 128], sizes = [8, 128], strides = [1, 1]} : vector<8x384xbf16> to vector<8x128xbf16>
    %4 = vector.extract_strided_slice %1 {offsets = [0, 256], sizes = [8, 128], strides = [1, 1]} : vector<8x384xbf16> to vector<8x128xbf16>
    %c0_2 = arith.constant 0 : index
    %c0_3 = arith.constant 0 : index
    %c0_4 = arith.constant 0 : index
    %5 = vector.load %arg2[%c0_2, %c0_3, %c0_4] : memref<1x1x8xf32, #tpu.memory_space<vmem>>, vector<1x1x8xf32>
    %6 = vector.shape_cast %5 : vector<1x1x8xf32> to vector<1x8xf32>
    %cst = arith.constant 0.000000e+00 : f32
    %7 = vector.broadcast %cst : f32 to vector<1x8xf32>
    %8 = arith.cmpf ogt, %6, %7 : vector<1x8xf32>
    %cst_5 = arith.constant 0.000000e+00 : f32
    %cst_6 = arith.constant -1.000000e+09 : f32
    %9 = vector.broadcast %cst_5 : f32 to vector<1x8xf32>
    %10 = vector.broadcast %cst_6 : f32 to vector<1x8xf32>
    %11 = arith.select %8, %9, %10 : vector<1x8xi1>, vector<1x8xf32>
    %12 = vector.shape_cast %11 : vector<1x8xf32> to vector<1x8xf32>
    %13 = vector.broadcast %12 : vector<1x8xf32> to vector<8x8xf32>
    %14 = vector.extract_strided_slice %2 {offsets = [0, 0], sizes = [8, 32], strides = [1, 1]} : vector<8x128xbf16> to vector<8x32xbf16>
    %15 = vector.extract_strided_slice %3 {offsets = [0, 0], sizes = [8, 32], strides = [1, 1]} : vector<8x128xbf16> to vector<8x32xbf16>
    %16 = vector.extract_strided_slice %4 {offsets = [0, 0], sizes = [8, 32], strides = [1, 1]} : vector<8x128xbf16> to vector<8x32xbf16>
    %cst_7 = arith.constant dense<0.000000e+00> : vector<8x8xf32>
    %17 = tpu.matmul %14, %15, %cst_7 {dimension_numbers = #tpu.dot_dimension_numbers<[1], [1], [0], [0], [0, 0, 1, 0], [], []>} : vector<8x32xbf16>, vector<8x32xbf16>, vector<8x8xf32> -> vector<8x8xf32>
    %cst_8 = arith.constant 0.176776692 : f32
    %18 = vector.broadcast %cst_8 : f32 to vector<8x8xf32>
    %19 = arith.mulf %17, %18 : vector<8x8xf32>
    %20 = arith.addf %19, %13 : vector<8x8xf32>
    %cst_9 = arith.constant dense<0xFF800000> : vector<8xf32>
    %21 = vector.multi_reduction <maximumf>, %20, %cst_9 [1] : vector<8x8xf32> to vector<8xf32>
    %22 = vector.shape_cast %21 : vector<8xf32> to vector<8x1xf32>
    %23 = vector.broadcast %22 : vector<8x1xf32> to vector<8x8xf32>
    %24 = arith.subf %20, %23 : vector<8x8xf32>
    %25 = math.exp %24 : vector<8x8xf32>
    %cst_10 = arith.constant dense<0.000000e+00> : vector<8xf32>
    %26 = vector.multi_reduction <add>, %25, %cst_10 [1] : vector<8x8xf32> to vector<8xf32>
    %27 = vector.shape_cast %26 : vector<8xf32> to vector<8x1xf32>
    %28 = tpu.reciprocal %27 {approx = true} : vector<8x1xf32> -> vector<8x1xf32>
    %29 = vector.broadcast %28 : vector<8x1xf32> to vector<8x8xf32>
    %30 = arith.mulf %25, %29 : vector<8x8xf32>
    %31 = arith.truncf %30 : vector<8x8xf32> to vector<8x8xbf16>
    %cst_11 = arith.constant dense<0.000000e+00> : vector<8x32xf32>
    %32 = tpu.matmul %31, %16, %cst_11 {dimension_numbers = #tpu.dot_dimension_numbers<[1], [0], [0], [1], [0, 0, 1, 1], [], []>} : vector<8x8xbf16>, vector<8x32xbf16>, vector<8x32xf32> -> vector<8x32xf32>
    %33 = vector.extract_strided_slice %2 {offsets = [0, 32], sizes = [8, 32], strides = [1, 1]} : vector<8x128xbf16> to vector<8x32xbf16>
    %34 = vector.extract_strided_slice %3 {offsets = [0, 32], sizes = [8, 32], strides = [1, 1]} : vector<8x128xbf16> to vector<8x32xbf16>
    %35 = vector.extract_strided_slice %4 {offsets = [0, 32], sizes = [8, 32], strides = [1, 1]} : vector<8x128xbf16> to vector<8x32xbf16>
    %cst_12 = arith.constant dense<0.000000e+00> : vector<8x8xf32>
    %36 = tpu.matmul %33, %34, %cst_12 {dimension_numbers = #tpu.dot_dimension_numbers<[1], [1], [0], [0], [0, 0, 1, 0], [], []>} : vector<8x32xbf16>, vector<8x32xbf16>, vector<8x8xf32> -> vector<8x8xf32>
    %cst_13 = arith.constant 0.176776692 : f32
    %37 = vector.broadcast %cst_13 : f32 to vector<8x8xf32>
    %38 = arith.mulf %36, %37 : vector<8x8xf32>
    %39 = arith.addf %38, %13 : vector<8x8xf32>
    %cst_14 = arith.constant dense<0xFF800000> : vector<8xf32>
    %40 = vector.multi_reduction <maximumf>, %39, %cst_14 [1] : vector<8x8xf32> to vector<8xf32>
    %41 = vector.shape_cast %40 : vector<8xf32> to vector<8x1xf32>
    %42 = vector.broadcast %41 : vector<8x1xf32> to vector<8x8xf32>
    %43 = arith.subf %39, %42 : vector<8x8xf32>
    %44 = math.exp %43 : vector<8x8xf32>
    %cst_15 = arith.constant dense<0.000000e+00> : vector<8xf32>
    %45 = vector.multi_reduction <add>, %44, %cst_15 [1] : vector<8x8xf32> to vector<8xf32>
    %46 = vector.shape_cast %45 : vector<8xf32> to vector<8x1xf32>
    %47 = tpu.reciprocal %46 {approx = true} : vector<8x1xf32> -> vector<8x1xf32>
    %48 = vector.broadcast %47 : vector<8x1xf32> to vector<8x8xf32>
    %49 = arith.mulf %44, %48 : vector<8x8xf32>
    %50 = arith.truncf %49 : vector<8x8xf32> to vector<8x8xbf16>
    %cst_16 = arith.constant dense<0.000000e+00> : vector<8x32xf32>
    %51 = tpu.matmul %50, %35, %cst_16 {dimension_numbers = #tpu.dot_dimension_numbers<[1], [0], [0], [1], [0, 0, 1, 1], [], []>} : vector<8x8xbf16>, vector<8x32xbf16>, vector<8x32xf32> -> vector<8x32xf32>
    %52 = vector.extract_strided_slice %2 {offsets = [0, 64], sizes = [8, 32], strides = [1, 1]} : vector<8x128xbf16> to vector<8x32xbf16>
    %53 = vector.extract_strided_slice %3 {offsets = [0, 64], sizes = [8, 32], strides = [1, 1]} : vector<8x128xbf16> to vector<8x32xbf16>
    %54 = vector.extract_strided_slice %4 {offsets = [0, 64], sizes = [8, 32], strides = [1, 1]} : vector<8x128xbf16> to vector<8x32xbf16>
    %cst_17 = arith.constant dense<0.000000e+00> : vector<8x8xf32>
    %55 = tpu.matmul %52, %53, %cst_17 {dimension_numbers = #tpu.dot_dimension_numbers<[1], [1], [0], [0], [0, 0, 1, 0], [], []>} : vector<8x32xbf16>, vector<8x32xbf16>, vector<8x8xf32> -> vector<8x8xf32>
    %cst_18 = arith.constant 0.176776692 : f32
    %56 = vector.broadcast %cst_18 : f32 to vector<8x8xf32>
    %57 = arith.mulf %55, %56 : vector<8x8xf32>
    %58 = arith.addf %57, %13 : vector<8x8xf32>
    %cst_19 = arith.constant dense<0xFF800000> : vector<8xf32>
    %59 = vector.multi_reduction <maximumf>, %58, %cst_19 [1] : vector<8x8xf32> to vector<8xf32>
    %60 = vector.shape_cast %59 : vector<8xf32> to vector<8x1xf32>
    %61 = vector.broadcast %60 : vector<8x1xf32> to vector<8x8xf32>
    %62 = arith.subf %58, %61 : vector<8x8xf32>
    %63 = math.exp %62 : vector<8x8xf32>
    %cst_20 = arith.constant dense<0.000000e+00> : vector<8xf32>
    %64 = vector.multi_reduction <add>, %63, %cst_20 [1] : vector<8x8xf32> to vector<8xf32>
    %65 = vector.shape_cast %64 : vector<8xf32> to vector<8x1xf32>
    %66 = tpu.reciprocal %65 {approx = true} : vector<8x1xf32> -> vector<8x1xf32>
    %67 = vector.broadcast %66 : vector<8x1xf32> to vector<8x8xf32>
    %68 = arith.mulf %63, %67 : vector<8x8xf32>
    %69 = arith.truncf %68 : vector<8x8xf32> to vector<8x8xbf16>
    %cst_21 = arith.constant dense<0.000000e+00> : vector<8x32xf32>
    %70 = tpu.matmul %69, %54, %cst_21 {dimension_numbers = #tpu.dot_dimension_numbers<[1], [0], [0], [1], [0, 0, 1, 1], [], []>} : vector<8x8xbf16>, vector<8x32xbf16>, vector<8x32xf32> -> vector<8x32xf32>
    %71 = vector.extract_strided_slice %2 {offsets = [0, 96], sizes = [8, 32], strides = [1, 1]} : vector<8x128xbf16> to vector<8x32xbf16>
    %72 = vector.extract_strided_slice %3 {offsets = [0, 96], sizes = [8, 32], strides = [1, 1]} : vector<8x128xbf16> to vector<8x32xbf16>
    %73 = vector.extract_strided_slice %4 {offsets = [0, 96], sizes = [8, 32], strides = [1, 1]} : vector<8x128xbf16> to vector<8x32xbf16>
    %cst_22 = arith.constant dense<0.000000e+00> : vector<8x8xf32>
    %74 = tpu.matmul %71, %72, %cst_22 {dimension_numbers = #tpu.dot_dimension_numbers<[1], [1], [0], [0], [0, 0, 1, 0], [], []>} : vector<8x32xbf16>, vector<8x32xbf16>, vector<8x8xf32> -> vector<8x8xf32>
    %cst_23 = arith.constant 0.176776692 : f32
    %75 = vector.broadcast %cst_23 : f32 to vector<8x8xf32>
    %76 = arith.mulf %74, %75 : vector<8x8xf32>
    %77 = arith.addf %76, %13 : vector<8x8xf32>
    %cst_24 = arith.constant dense<0xFF800000> : vector<8xf32>
    %78 = vector.multi_reduction <maximumf>, %77, %cst_24 [1] : vector<8x8xf32> to vector<8xf32>
    %79 = vector.shape_cast %78 : vector<8xf32> to vector<8x1xf32>
    %80 = vector.broadcast %79 : vector<8x1xf32> to vector<8x8xf32>
    %81 = arith.subf %77, %80 : vector<8x8xf32>
    %82 = math.exp %81 : vector<8x8xf32>
    %cst_25 = arith.constant dense<0.000000e+00> : vector<8xf32>
    %83 = vector.multi_reduction <add>, %82, %cst_25 [1] : vector<8x8xf32> to vector<8xf32>
    %84 = vector.shape_cast %83 : vector<8xf32> to vector<8x1xf32>
    %85 = tpu.reciprocal %84 {approx = true} : vector<8x1xf32> -> vector<8x1xf32>
    %86 = vector.broadcast %85 : vector<8x1xf32> to vector<8x8xf32>
    %87 = arith.mulf %82, %86 : vector<8x8xf32>
    %88 = arith.truncf %87 : vector<8x8xf32> to vector<8x8xbf16>
    %cst_26 = arith.constant dense<0.000000e+00> : vector<8x32xf32>
    %89 = tpu.matmul %88, %73, %cst_26 {dimension_numbers = #tpu.dot_dimension_numbers<[1], [0], [0], [1], [0, 0, 1, 1], [], []>} : vector<8x8xbf16>, vector<8x32xbf16>, vector<8x32xf32> -> vector<8x32xf32>
    %90 = tpu.concatenate %32, %51, %70, %89 in 1 : vector<8x32xf32>, vector<8x32xf32>, vector<8x32xf32>, vector<8x32xf32> -> vector<8x128xf32>
    %91 = arith.truncf %90 : vector<8x128xf32> to vector<8x128xbf16>
    %c0_27 = arith.constant 0 : index
    %c0_28 = arith.constant 0 : index
    %c0_29 = arith.constant 0 : index
    %92 = vector.load %arg3[%c0_27, %c0_28, %c0_29] : memref<1x8x128xbf16, #tpu.memory_space<vmem>>, vector<1x8x128xbf16>
    %93 = vector.shape_cast %92 : vector<1x8x128xbf16> to vector<8x128xbf16>
    %94 = vector.shape_cast %91 : vector<8x128xbf16> to vector<1x8x128xbf16>
    tpu.vector_store %arg3[%c0_27, %c0_28, %c0_29], %94 {strides = array<i32>} : memref<1x8x128xbf16, #tpu.memory_space<vmem>>, vector<1x8x128xbf16>,
    return
  }
  func.func @transform_0(%arg0: i32) -> (i32, i32, i32) {
    %c0_i32 = arith.constant 0 : i32
    %c0_i32_0 = arith.constant 0 : i32
    %c0_i32_1 = arith.constant 0 : i32
    return %arg0, %c0_i32, %c0_i32_0 : i32, i32, i32
  }
  func.func @transform_1(%arg0: i32) -> (i32, i32, i32) {
    %c0_i32 = arith.constant 0 : i32
    %c0_i32_0 = arith.constant 0 : i32
    %c0_i32_1 = arith.constant 0 : i32
    return %arg0, %c0_i32, %c0_i32_0 : i32, i32, i32
  }
  func.func @transform_2(%arg0: i32) -> (i32, i32, i32) {
    %c0_i32 = arith.constant 0 : i32
    %c0_i32_0 = arith.constant 0 : i32
    %c0_i32_1 = arith.constant 0 : i32
    return %arg0, %c0_i32, %c0_i32_0 : i32, i32, i32
  }
}

module attributes {stable_mosaic.version = 11 : i64} {
  func.func @_ffn_add_ln_kernel(%arg0: i32, %arg1: i32, %arg2: memref<16x128xbf16, #tpu.memory_space<vmem>>, %arg3: memref<128x256xbf16, #tpu.memory_space<vmem>>, %arg4: memref<1x256xf32, #tpu.memory_space<vmem>>, %arg5: memref<256x128xbf16, #tpu.memory_space<vmem>>, %arg6: memref<1x128xf32, #tpu.memory_space<vmem>>, %arg7: memref<16x128xbf16, #tpu.memory_space<vmem>>, %arg8: memref<1x128xf32, #tpu.memory_space<vmem>>, %arg9: memref<1x128xf32, #tpu.memory_space<vmem>>, %arg10: memref<16x128xbf16, #tpu.memory_space<vmem>>, %arg11: memref<16x128xf32, #tpu.memory_space<vmem>>) attributes {dimension_semantics = [#tpu.dimension_semantics<parallel>, #tpu.dimension_semantics<arbitrary>], iteration_bounds = array<i64: 1, 1>, scalar_prefetch = 0 : i64, scratch_operands = 1 : i64, tpu.core_type = #tpu.core_type<tc>, window_params = [{transform_indices = @transform_0, window_bounds = array<i64: 16, 128>}, {transform_indices = @transform_1, window_bounds = array<i64: 128, 256>}, {transform_indices = @transform_2, window_bounds = array<i64: 1, 256>}, {transform_indices = @transform_3, window_bounds = array<i64: 256, 128>}, {pipeline_mode = #tpu.pipeline_mode<synchronous>, transform_indices = @transform_4, window_bounds = array<i64: 1, 128>}, {transform_indices = @transform_5, window_bounds = array<i64: 16, 128>}, {pipeline_mode = #tpu.pipeline_mode<synchronous>, transform_indices = @transform_6, window_bounds = array<i64: 1, 128>}, {pipeline_mode = #tpu.pipeline_mode<synchronous>, transform_indices = @transform_7, window_bounds = array<i64: 1, 128>}, {transform_indices = @transform_8, window_bounds = array<i64: 16, 128>}]} {
    %c0_i32 = arith.constant 0 : i32
    %0 = arith.cmpi eq, %arg1, %c0_i32 : i32
    %1 = arith.extui %0 : i1 to i32
    %c0_i32_0 = arith.constant 0 : i32
    %2 = arith.cmpi ne, %1, %c0_i32_0 : i32
    scf.if %2 {
      %cst_16 = arith.constant 0.000000e+00 : f32
      %20 = vector.broadcast %cst_16 : f32 to vector<16x128xf32>
      %c0_17 = arith.constant 0 : index
      %c0_18 = arith.constant 0 : index
      %21 = vector.load %arg11[%c0_17, %c0_18] : memref<16x128xf32, #tpu.memory_space<vmem>>, vector<16x128xf32>
      tpu.vector_store %arg11[%c0_17, %c0_18], %20 {strides = array<i32>} : memref<16x128xf32, #tpu.memory_space<vmem>>, vector<16x128xf32>,
    } else {
    }
    %c0 = arith.constant 0 : index
    %c0_1 = arith.constant 0 : index
    %3 = vector.load %arg2[%c0, %c0_1] : memref<16x128xbf16, #tpu.memory_space<vmem>>, vector<16x128xbf16>
    %c0_2 = arith.constant 0 : index
    %c0_3 = arith.constant 0 : index
    %4 = vector.load %arg3[%c0_2, %c0_3] : memref<128x256xbf16, #tpu.memory_space<vmem>>, vector<128x256xbf16>
    %cst = arith.constant dense<0.000000e+00> : vector<16x256xf32>
    %5 = tpu.matmul %3, %4, %cst {dimension_numbers = #tpu.dot_dimension_numbers<[1], [0], [0], [1], [0, 0, 1, 1], [], []>} : vector<16x128xbf16>, vector<128x256xbf16>, vector<16x256xf32> -> vector<16x256xf32>
    %c0_4 = arith.constant 0 : index
    %c0_5 = arith.constant 0 : index
    %6 = vector.load %arg4[%c0_4, %c0_5] : memref<1x256xf32, #tpu.memory_space<vmem>>, vector<1x256xf32>
    %7 = vector.broadcast %6 : vector<1x256xf32> to vector<16x256xf32>
    %8 = arith.addf %5, %7 : vector<16x256xf32>
    %cst_6 = arith.constant 0.000000e+00 : f32
    %9 = vector.broadcast %cst_6 : f32 to vector<16x256xf32>
    %10 = arith.maximumf %8, %9 : vector<16x256xf32>
    %c0_7 = arith.constant 0 : index
    %c0_8 = arith.constant 0 : index
    %11 = vector.load %arg11[%c0_7, %c0_8] : memref<16x128xf32, #tpu.memory_space<vmem>>, vector<16x128xf32>
    %12 = arith.truncf %10 : vector<16x256xf32> to vector<16x256xbf16>
    %c0_9 = arith.constant 0 : index
    %c0_10 = arith.constant 0 : index
    %13 = vector.load %arg5[%c0_9, %c0_10] : memref<256x128xbf16, #tpu.memory_space<vmem>>, vector<256x128xbf16>
    %cst_11 = arith.constant dense<0.000000e+00> : vector<16x128xf32>
    %14 = tpu.matmul %12, %13, %cst_11 {dimension_numbers = #tpu.dot_dimension_numbers<[1], [0], [0], [1], [0, 0, 1, 1], [], []>} : vector<16x256xbf16>, vector<256x128xbf16>, vector<16x128xf32> -> vector<16x128xf32>
    %15 = arith.addf %11, %14 : vector<16x128xf32>
    %c0_12 = arith.constant 0 : index
    %c0_13 = arith.constant 0 : index
    %16 = vector.load %arg11[%c0_12, %c0_13] : memref<16x128xf32, #tpu.memory_space<vmem>>, vector<16x128xf32>
    tpu.vector_store %arg11[%c0_12, %c0_13], %15 {strides = array<i32>} : memref<16x128xf32, #tpu.memory_space<vmem>>, vector<16x128xf32>,
    %c0_i32_14 = arith.constant 0 : i32
    %17 = arith.cmpi eq, %arg1, %c0_i32_14 : i32
    %18 = arith.extui %17 : i1 to i32
    %c0_i32_15 = arith.constant 0 : i32
    %19 = arith.cmpi ne, %18, %c0_i32_15 : i32
    scf.if %19 {
      %c0_16 = arith.constant 0 : index
      %c0_17 = arith.constant 0 : index
      %20 = vector.load %arg11[%c0_16, %c0_17] : memref<16x128xf32, #tpu.memory_space<vmem>>, vector<16x128xf32>
      %c0_18 = arith.constant 0 : index
      %c0_19 = arith.constant 0 : index
      %21 = vector.load %arg6[%c0_18, %c0_19] : memref<1x128xf32, #tpu.memory_space<vmem>>, vector<1x128xf32>
      %22 = vector.broadcast %21 : vector<1x128xf32> to vector<16x128xf32>
      %23 = arith.addf %20, %22 : vector<16x128xf32>
      %c0_20 = arith.constant 0 : index
      %c0_21 = arith.constant 0 : index
      %24 = vector.load %arg7[%c0_20, %c0_21] : memref<16x128xbf16, #tpu.memory_space<vmem>>, vector<16x128xbf16>
      %25 = arith.extf %24 : vector<16x128xbf16> to vector<16x128xf32>
      %26 = arith.addf %23, %25 : vector<16x128xf32>
      %cst_22 = arith.constant dense<0.000000e+00> : vector<16xf32>
      %27 = vector.multi_reduction <add>, %26, %cst_22 [1] : vector<16x128xf32> to vector<16xf32>
      %28 = vector.shape_cast %27 : vector<16xf32> to vector<16x1xf32>
      %cst_23 = arith.constant 1.280000e+02 : f32
      %29 = vector.broadcast %cst_23 : f32 to vector<16x1xf32>
      %30 = arith.divf %28, %29 : vector<16x1xf32>
      %31 = vector.broadcast %30 : vector<16x1xf32> to vector<16x128xf32>
      %32 = arith.subf %26, %31 : vector<16x128xf32>
      %33 = arith.mulf %32, %32 : vector<16x128xf32>
      %cst_24 = arith.constant dense<0.000000e+00> : vector<16xf32>
      %34 = vector.multi_reduction <add>, %33, %cst_24 [1] : vector<16x128xf32> to vector<16xf32>
      %35 = vector.shape_cast %34 : vector<16xf32> to vector<16x1xf32>
      %cst_25 = arith.constant 1.280000e+02 : f32
      %36 = vector.broadcast %cst_25 : f32 to vector<16x1xf32>
      %37 = arith.divf %35, %36 : vector<16x1xf32>
      %38 = vector.broadcast %30 : vector<16x1xf32> to vector<16x128xf32>
      %39 = arith.subf %26, %38 : vector<16x128xf32>
      %cst_26 = arith.constant 9.99999974E-6 : f32
      %40 = vector.broadcast %cst_26 : f32 to vector<16x1xf32>
      %41 = arith.addf %37, %40 : vector<16x1xf32>
      %42 = math.rsqrt %41 : vector<16x1xf32>
      %43 = vector.broadcast %42 : vector<16x1xf32> to vector<16x128xf32>
      %44 = arith.mulf %39, %43 : vector<16x128xf32>
      %c0_27 = arith.constant 0 : index
      %c0_28 = arith.constant 0 : index
      %45 = vector.load %arg8[%c0_27, %c0_28] : memref<1x128xf32, #tpu.memory_space<vmem>>, vector<1x128xf32>
      %46 = vector.broadcast %45 : vector<1x128xf32> to vector<16x128xf32>
      %47 = arith.mulf %44, %46 : vector<16x128xf32>
      %c0_29 = arith.constant 0 : index
      %c0_30 = arith.constant 0 : index
      %48 = vector.load %arg9[%c0_29, %c0_30] : memref<1x128xf32, #tpu.memory_space<vmem>>, vector<1x128xf32>
      %49 = vector.broadcast %48 : vector<1x128xf32> to vector<16x128xf32>
      %50 = arith.addf %47, %49 : vector<16x128xf32>
      %51 = arith.truncf %50 : vector<16x128xf32> to vector<16x128xbf16>
      %c0_31 = arith.constant 0 : index
      %c0_32 = arith.constant 0 : index
      %52 = vector.load %arg10[%c0_31, %c0_32] : memref<16x128xbf16, #tpu.memory_space<vmem>>, vector<16x128xbf16>
      tpu.vector_store %arg10[%c0_31, %c0_32], %51 {strides = array<i32>} : memref<16x128xbf16, #tpu.memory_space<vmem>>, vector<16x128xbf16>,
    } else {
    }
    return
  }
  func.func @transform_0(%arg0: i32, %arg1: i32) -> (i32, i32) {
    %c0_i32 = arith.constant 0 : i32
    %c0_i32_0 = arith.constant 0 : i32
    return %arg0, %c0_i32 : i32, i32
  }
  func.func @transform_1(%arg0: i32, %arg1: i32) -> (i32, i32) {
    %c0_i32 = arith.constant 0 : i32
    %c0_i32_0 = arith.constant 0 : i32
    return %c0_i32, %arg1 : i32, i32
  }
  func.func @transform_2(%arg0: i32, %arg1: i32) -> (i32, i32) {
    %c0_i32 = arith.constant 0 : i32
    %c0_i32_0 = arith.constant 0 : i32
    return %c0_i32, %arg1 : i32, i32
  }
  func.func @transform_3(%arg0: i32, %arg1: i32) -> (i32, i32) {
    %c0_i32 = arith.constant 0 : i32
    %c0_i32_0 = arith.constant 0 : i32
    return %arg1, %c0_i32 : i32, i32
  }
  func.func @transform_4(%arg0: i32, %arg1: i32) -> (i32, i32) {
    %c0_i32 = arith.constant 0 : i32
    %c0_i32_0 = arith.constant 0 : i32
    %c0_i32_1 = arith.constant 0 : i32
    return %c0_i32, %c0_i32_0 : i32, i32
  }
  func.func @transform_5(%arg0: i32, %arg1: i32) -> (i32, i32) {
    %c0_i32 = arith.constant 0 : i32
    %c0_i32_0 = arith.constant 0 : i32
    return %arg0, %c0_i32 : i32, i32
  }
  func.func @transform_6(%arg0: i32, %arg1: i32) -> (i32, i32) {
    %c0_i32 = arith.constant 0 : i32
    %c0_i32_0 = arith.constant 0 : i32
    %c0_i32_1 = arith.constant 0 : i32
    return %c0_i32, %c0_i32_0 : i32, i32
  }
  func.func @transform_7(%arg0: i32, %arg1: i32) -> (i32, i32) {
    %c0_i32 = arith.constant 0 : i32
    %c0_i32_0 = arith.constant 0 : i32
    %c0_i32_1 = arith.constant 0 : i32
    return %c0_i32, %c0_i32_0 : i32, i32
  }
  func.func @transform_8(%arg0: i32, %arg1: i32) -> (i32, i32) {
    %c0_i32 = arith.constant 0 : i32
    %c0_i32_0 = arith.constant 0 : i32
    return %arg0, %c0_i32 : i32, i32
  }
}

module attributes {stable_mosaic.version = 11 : i64} {
  func.func @_attn_cross_kernel(%arg0: i32, %arg1: memref<1x8x128xbf16, #tpu.memory_space<vmem>>, %arg2: memref<1x8x256xbf16, #tpu.memory_space<vmem>>, %arg3: memref<1x1x8xf32, #tpu.memory_space<vmem>>, %arg4: memref<1x8x128xbf16, #tpu.memory_space<vmem>>) attributes {dimension_semantics = [#tpu.dimension_semantics<parallel>], iteration_bounds = array<i64: 2>, scalar_prefetch = 0 : i64, scratch_operands = 0 : i64, tpu.core_type = #tpu.core_type<tc>, window_params = [{transform_indices = @transform_0, window_bounds = array<i64: 1, 8, 128>}, {transform_indices = @transform_1, window_bounds = array<i64: 1, 8, 256>}, {transform_indices = @transform_2, window_bounds = array<i64: 1, 1, 8>}, {transform_indices = @transform_3, window_bounds = array<i64: 1, 8, 128>}]} {
    %c0 = arith.constant 0 : index
    %c0_0 = arith.constant 0 : index
    %c0_1 = arith.constant 0 : index
    %0 = vector.load %arg1[%c0, %c0_0, %c0_1] : memref<1x8x128xbf16, #tpu.memory_space<vmem>>, vector<1x8x128xbf16>
    %1 = vector.shape_cast %0 : vector<1x8x128xbf16> to vector<8x128xbf16>
    %c0_2 = arith.constant 0 : index
    %c0_3 = arith.constant 0 : index
    %c0_4 = arith.constant 0 : index
    %2 = vector.load %arg2[%c0_2, %c0_3, %c0_4] : memref<1x8x256xbf16, #tpu.memory_space<vmem>>, vector<1x8x256xbf16>
    %3 = vector.shape_cast %2 : vector<1x8x256xbf16> to vector<8x256xbf16>
    %4 = vector.extract_strided_slice %3 {offsets = [0, 0], sizes = [8, 128], strides = [1, 1]} : vector<8x256xbf16> to vector<8x128xbf16>
    %5 = vector.extract_strided_slice %3 {offsets = [0, 128], sizes = [8, 128], strides = [1, 1]} : vector<8x256xbf16> to vector<8x128xbf16>
    %c0_5 = arith.constant 0 : index
    %c0_6 = arith.constant 0 : index
    %c0_7 = arith.constant 0 : index
    %6 = vector.load %arg3[%c0_5, %c0_6, %c0_7] : memref<1x1x8xf32, #tpu.memory_space<vmem>>, vector<1x1x8xf32>
    %7 = vector.shape_cast %6 : vector<1x1x8xf32> to vector<1x8xf32>
    %cst = arith.constant 0.000000e+00 : f32
    %8 = vector.broadcast %cst : f32 to vector<1x8xf32>
    %9 = arith.cmpf ogt, %7, %8 : vector<1x8xf32>
    %cst_8 = arith.constant 0.000000e+00 : f32
    %cst_9 = arith.constant -1.000000e+09 : f32
    %10 = vector.broadcast %cst_8 : f32 to vector<1x8xf32>
    %11 = vector.broadcast %cst_9 : f32 to vector<1x8xf32>
    %12 = arith.select %9, %10, %11 : vector<1x8xi1>, vector<1x8xf32>
    %13 = vector.shape_cast %12 : vector<1x8xf32> to vector<1x8xf32>
    %14 = vector.broadcast %13 : vector<1x8xf32> to vector<8x8xf32>
    %15 = vector.extract_strided_slice %1 {offsets = [0, 0], sizes = [8, 32], strides = [1, 1]} : vector<8x128xbf16> to vector<8x32xbf16>
    %16 = vector.extract_strided_slice %4 {offsets = [0, 0], sizes = [8, 32], strides = [1, 1]} : vector<8x128xbf16> to vector<8x32xbf16>
    %17 = vector.extract_strided_slice %5 {offsets = [0, 0], sizes = [8, 32], strides = [1, 1]} : vector<8x128xbf16> to vector<8x32xbf16>
    %cst_10 = arith.constant dense<0.000000e+00> : vector<8x8xf32>
    %18 = tpu.matmul %15, %16, %cst_10 {dimension_numbers = #tpu.dot_dimension_numbers<[1], [1], [0], [0], [0, 0, 1, 0], [], []>} : vector<8x32xbf16>, vector<8x32xbf16>, vector<8x8xf32> -> vector<8x8xf32>
    %cst_11 = arith.constant 0.176776692 : f32
    %19 = vector.broadcast %cst_11 : f32 to vector<8x8xf32>
    %20 = arith.mulf %18, %19 : vector<8x8xf32>
    %21 = arith.addf %20, %14 : vector<8x8xf32>
    %cst_12 = arith.constant dense<0xFF800000> : vector<8xf32>
    %22 = vector.multi_reduction <maximumf>, %21, %cst_12 [1] : vector<8x8xf32> to vector<8xf32>
    %23 = vector.shape_cast %22 : vector<8xf32> to vector<8x1xf32>
    %24 = vector.broadcast %23 : vector<8x1xf32> to vector<8x8xf32>
    %25 = arith.subf %21, %24 : vector<8x8xf32>
    %26 = math.exp %25 : vector<8x8xf32>
    %cst_13 = arith.constant dense<0.000000e+00> : vector<8xf32>
    %27 = vector.multi_reduction <add>, %26, %cst_13 [1] : vector<8x8xf32> to vector<8xf32>
    %28 = vector.shape_cast %27 : vector<8xf32> to vector<8x1xf32>
    %29 = tpu.reciprocal %28 {approx = true} : vector<8x1xf32> -> vector<8x1xf32>
    %30 = vector.broadcast %29 : vector<8x1xf32> to vector<8x8xf32>
    %31 = arith.mulf %26, %30 : vector<8x8xf32>
    %32 = arith.truncf %31 : vector<8x8xf32> to vector<8x8xbf16>
    %cst_14 = arith.constant dense<0.000000e+00> : vector<8x32xf32>
    %33 = tpu.matmul %32, %17, %cst_14 {dimension_numbers = #tpu.dot_dimension_numbers<[1], [0], [0], [1], [0, 0, 1, 1], [], []>} : vector<8x8xbf16>, vector<8x32xbf16>, vector<8x32xf32> -> vector<8x32xf32>
    %34 = vector.extract_strided_slice %1 {offsets = [0, 32], sizes = [8, 32], strides = [1, 1]} : vector<8x128xbf16> to vector<8x32xbf16>
    %35 = vector.extract_strided_slice %4 {offsets = [0, 32], sizes = [8, 32], strides = [1, 1]} : vector<8x128xbf16> to vector<8x32xbf16>
    %36 = vector.extract_strided_slice %5 {offsets = [0, 32], sizes = [8, 32], strides = [1, 1]} : vector<8x128xbf16> to vector<8x32xbf16>
    %cst_15 = arith.constant dense<0.000000e+00> : vector<8x8xf32>
    %37 = tpu.matmul %34, %35, %cst_15 {dimension_numbers = #tpu.dot_dimension_numbers<[1], [1], [0], [0], [0, 0, 1, 0], [], []>} : vector<8x32xbf16>, vector<8x32xbf16>, vector<8x8xf32> -> vector<8x8xf32>
    %cst_16 = arith.constant 0.176776692 : f32
    %38 = vector.broadcast %cst_16 : f32 to vector<8x8xf32>
    %39 = arith.mulf %37, %38 : vector<8x8xf32>
    %40 = arith.addf %39, %14 : vector<8x8xf32>
    %cst_17 = arith.constant dense<0xFF800000> : vector<8xf32>
    %41 = vector.multi_reduction <maximumf>, %40, %cst_17 [1] : vector<8x8xf32> to vector<8xf32>
    %42 = vector.shape_cast %41 : vector<8xf32> to vector<8x1xf32>
    %43 = vector.broadcast %42 : vector<8x1xf32> to vector<8x8xf32>
    %44 = arith.subf %40, %43 : vector<8x8xf32>
    %45 = math.exp %44 : vector<8x8xf32>
    %cst_18 = arith.constant dense<0.000000e+00> : vector<8xf32>
    %46 = vector.multi_reduction <add>, %45, %cst_18 [1] : vector<8x8xf32> to vector<8xf32>
    %47 = vector.shape_cast %46 : vector<8xf32> to vector<8x1xf32>
    %48 = tpu.reciprocal %47 {approx = true} : vector<8x1xf32> -> vector<8x1xf32>
    %49 = vector.broadcast %48 : vector<8x1xf32> to vector<8x8xf32>
    %50 = arith.mulf %45, %49 : vector<8x8xf32>
    %51 = arith.truncf %50 : vector<8x8xf32> to vector<8x8xbf16>
    %cst_19 = arith.constant dense<0.000000e+00> : vector<8x32xf32>
    %52 = tpu.matmul %51, %36, %cst_19 {dimension_numbers = #tpu.dot_dimension_numbers<[1], [0], [0], [1], [0, 0, 1, 1], [], []>} : vector<8x8xbf16>, vector<8x32xbf16>, vector<8x32xf32> -> vector<8x32xf32>
    %53 = vector.extract_strided_slice %1 {offsets = [0, 64], sizes = [8, 32], strides = [1, 1]} : vector<8x128xbf16> to vector<8x32xbf16>
    %54 = vector.extract_strided_slice %4 {offsets = [0, 64], sizes = [8, 32], strides = [1, 1]} : vector<8x128xbf16> to vector<8x32xbf16>
    %55 = vector.extract_strided_slice %5 {offsets = [0, 64], sizes = [8, 32], strides = [1, 1]} : vector<8x128xbf16> to vector<8x32xbf16>
    %cst_20 = arith.constant dense<0.000000e+00> : vector<8x8xf32>
    %56 = tpu.matmul %53, %54, %cst_20 {dimension_numbers = #tpu.dot_dimension_numbers<[1], [1], [0], [0], [0, 0, 1, 0], [], []>} : vector<8x32xbf16>, vector<8x32xbf16>, vector<8x8xf32> -> vector<8x8xf32>
    %cst_21 = arith.constant 0.176776692 : f32
    %57 = vector.broadcast %cst_21 : f32 to vector<8x8xf32>
    %58 = arith.mulf %56, %57 : vector<8x8xf32>
    %59 = arith.addf %58, %14 : vector<8x8xf32>
    %cst_22 = arith.constant dense<0xFF800000> : vector<8xf32>
    %60 = vector.multi_reduction <maximumf>, %59, %cst_22 [1] : vector<8x8xf32> to vector<8xf32>
    %61 = vector.shape_cast %60 : vector<8xf32> to vector<8x1xf32>
    %62 = vector.broadcast %61 : vector<8x1xf32> to vector<8x8xf32>
    %63 = arith.subf %59, %62 : vector<8x8xf32>
    %64 = math.exp %63 : vector<8x8xf32>
    %cst_23 = arith.constant dense<0.000000e+00> : vector<8xf32>
    %65 = vector.multi_reduction <add>, %64, %cst_23 [1] : vector<8x8xf32> to vector<8xf32>
    %66 = vector.shape_cast %65 : vector<8xf32> to vector<8x1xf32>
    %67 = tpu.reciprocal %66 {approx = true} : vector<8x1xf32> -> vector<8x1xf32>
    %68 = vector.broadcast %67 : vector<8x1xf32> to vector<8x8xf32>
    %69 = arith.mulf %64, %68 : vector<8x8xf32>
    %70 = arith.truncf %69 : vector<8x8xf32> to vector<8x8xbf16>
    %cst_24 = arith.constant dense<0.000000e+00> : vector<8x32xf32>
    %71 = tpu.matmul %70, %55, %cst_24 {dimension_numbers = #tpu.dot_dimension_numbers<[1], [0], [0], [1], [0, 0, 1, 1], [], []>} : vector<8x8xbf16>, vector<8x32xbf16>, vector<8x32xf32> -> vector<8x32xf32>
    %72 = vector.extract_strided_slice %1 {offsets = [0, 96], sizes = [8, 32], strides = [1, 1]} : vector<8x128xbf16> to vector<8x32xbf16>
    %73 = vector.extract_strided_slice %4 {offsets = [0, 96], sizes = [8, 32], strides = [1, 1]} : vector<8x128xbf16> to vector<8x32xbf16>
    %74 = vector.extract_strided_slice %5 {offsets = [0, 96], sizes = [8, 32], strides = [1, 1]} : vector<8x128xbf16> to vector<8x32xbf16>
    %cst_25 = arith.constant dense<0.000000e+00> : vector<8x8xf32>
    %75 = tpu.matmul %72, %73, %cst_25 {dimension_numbers = #tpu.dot_dimension_numbers<[1], [1], [0], [0], [0, 0, 1, 0], [], []>} : vector<8x32xbf16>, vector<8x32xbf16>, vector<8x8xf32> -> vector<8x8xf32>
    %cst_26 = arith.constant 0.176776692 : f32
    %76 = vector.broadcast %cst_26 : f32 to vector<8x8xf32>
    %77 = arith.mulf %75, %76 : vector<8x8xf32>
    %78 = arith.addf %77, %14 : vector<8x8xf32>
    %cst_27 = arith.constant dense<0xFF800000> : vector<8xf32>
    %79 = vector.multi_reduction <maximumf>, %78, %cst_27 [1] : vector<8x8xf32> to vector<8xf32>
    %80 = vector.shape_cast %79 : vector<8xf32> to vector<8x1xf32>
    %81 = vector.broadcast %80 : vector<8x1xf32> to vector<8x8xf32>
    %82 = arith.subf %78, %81 : vector<8x8xf32>
    %83 = math.exp %82 : vector<8x8xf32>
    %cst_28 = arith.constant dense<0.000000e+00> : vector<8xf32>
    %84 = vector.multi_reduction <add>, %83, %cst_28 [1] : vector<8x8xf32> to vector<8xf32>
    %85 = vector.shape_cast %84 : vector<8xf32> to vector<8x1xf32>
    %86 = tpu.reciprocal %85 {approx = true} : vector<8x1xf32> -> vector<8x1xf32>
    %87 = vector.broadcast %86 : vector<8x1xf32> to vector<8x8xf32>
    %88 = arith.mulf %83, %87 : vector<8x8xf32>
    %89 = arith.truncf %88 : vector<8x8xf32> to vector<8x8xbf16>
    %cst_29 = arith.constant dense<0.000000e+00> : vector<8x32xf32>
    %90 = tpu.matmul %89, %74, %cst_29 {dimension_numbers = #tpu.dot_dimension_numbers<[1], [0], [0], [1], [0, 0, 1, 1], [], []>} : vector<8x8xbf16>, vector<8x32xbf16>, vector<8x32xf32> -> vector<8x32xf32>
    %91 = tpu.concatenate %33, %52, %71, %90 in 1 : vector<8x32xf32>, vector<8x32xf32>, vector<8x32xf32>, vector<8x32xf32> -> vector<8x128xf32>
    %92 = arith.truncf %91 : vector<8x128xf32> to vector<8x128xbf16>
    %c0_30 = arith.constant 0 : index
    %c0_31 = arith.constant 0 : index
    %c0_32 = arith.constant 0 : index
    %93 = vector.load %arg4[%c0_30, %c0_31, %c0_32] : memref<1x8x128xbf16, #tpu.memory_space<vmem>>, vector<1x8x128xbf16>
    %94 = vector.shape_cast %93 : vector<1x8x128xbf16> to vector<8x128xbf16>
    %95 = vector.shape_cast %92 : vector<8x128xbf16> to vector<1x8x128xbf16>
    tpu.vector_store %arg4[%c0_30, %c0_31, %c0_32], %95 {strides = array<i32>} : memref<1x8x128xbf16, #tpu.memory_space<vmem>>, vector<1x8x128xbf16>,
    return
  }
  func.func @transform_0(%arg0: i32) -> (i32, i32, i32) {
    %c0_i32 = arith.constant 0 : i32
    %c0_i32_0 = arith.constant 0 : i32
    %c0_i32_1 = arith.constant 0 : i32
    return %arg0, %c0_i32, %c0_i32_0 : i32, i32, i32
  }
  func.func @transform_1(%arg0: i32) -> (i32, i32, i32) {
    %c0_i32 = arith.constant 0 : i32
    %c0_i32_0 = arith.constant 0 : i32
    %c0_i32_1 = arith.constant 0 : i32
    return %arg0, %c0_i32, %c0_i32_0 : i32, i32, i32
  }
  func.func @transform_2(%arg0: i32) -> (i32, i32, i32) {
    %c0_i32 = arith.constant 0 : i32
    %c0_i32_0 = arith.constant 0 : i32
    %c0_i32_1 = arith.constant 0 : i32
    return %arg0, %c0_i32, %c0_i32_0 : i32, i32, i32
  }
  func.func @transform_3(%arg0: i32) -> (i32, i32, i32) {
    %c0_i32 = arith.constant 0 : i32
    %c0_i32_0 = arith.constant 0 : i32
    %c0_i32_1 = arith.constant 0 : i32
    return %arg0, %c0_i32, %c0_i32_0 : i32, i32, i32
  }
}

module attributes {stable_mosaic.version = 11 : i64} {
  func.func @_linear_kernel(%arg0: i32, %arg1: i32, %arg2: i32, %arg3: memref<16x128xbf16, #tpu.memory_space<vmem>>, %arg4: memref<128x128xbf16, #tpu.memory_space<vmem>>, %arg5: memref<1x128xf32, #tpu.memory_space<vmem>>, %arg6: memref<16x128xf32, #tpu.memory_space<vmem>>, %arg7: memref<16x128xf32, #tpu.memory_space<vmem>>) attributes {dimension_semantics = [#tpu.dimension_semantics<parallel>, #tpu.dimension_semantics<parallel>, #tpu.dimension_semantics<arbitrary>], iteration_bounds = array<i64: 1, 1, 1>, scalar_prefetch = 0 : i64, scratch_operands = 1 : i64, tpu.core_type = #tpu.core_type<tc>, window_params = [{transform_indices = @transform_0, window_bounds = array<i64: 16, 128>}, {transform_indices = @transform_1, window_bounds = array<i64: 128, 128>}, {transform_indices = @transform_2, window_bounds = array<i64: 1, 128>}, {transform_indices = @transform_3, window_bounds = array<i64: 16, 128>}]} {
    %c0_i32 = arith.constant 0 : i32
    %0 = arith.cmpi eq, %arg2, %c0_i32 : i32
    %1 = arith.extui %0 : i1 to i32
    %c0_i32_0 = arith.constant 0 : i32
    %2 = arith.cmpi ne, %1, %c0_i32_0 : i32
    scf.if %2 {
      %cst_10 = arith.constant 0.000000e+00 : f32
      %12 = vector.broadcast %cst_10 : f32 to vector<16x128xf32>
      %c0_11 = arith.constant 0 : index
      %c0_12 = arith.constant 0 : index
      %13 = vector.load %arg7[%c0_11, %c0_12] : memref<16x128xf32, #tpu.memory_space<vmem>>, vector<16x128xf32>
      tpu.vector_store %arg7[%c0_11, %c0_12], %12 {strides = array<i32>} : memref<16x128xf32, #tpu.memory_space<vmem>>, vector<16x128xf32>,
    } else {
    }
    %c0 = arith.constant 0 : index
    %c0_1 = arith.constant 0 : index
    %3 = vector.load %arg7[%c0, %c0_1] : memref<16x128xf32, #tpu.memory_space<vmem>>, vector<16x128xf32>
    %c0_2 = arith.constant 0 : index
    %c0_3 = arith.constant 0 : index
    %4 = vector.load %arg3[%c0_2, %c0_3] : memref<16x128xbf16, #tpu.memory_space<vmem>>, vector<16x128xbf16>
    %c0_4 = arith.constant 0 : index
    %c0_5 = arith.constant 0 : index
    %5 = vector.load %arg4[%c0_4, %c0_5] : memref<128x128xbf16, #tpu.memory_space<vmem>>, vector<128x128xbf16>
    %cst = arith.constant dense<0.000000e+00> : vector<16x128xf32>
    %6 = tpu.matmul %4, %5, %cst {dimension_numbers = #tpu.dot_dimension_numbers<[1], [0], [0], [1], [0, 0, 1, 1], [], []>} : vector<16x128xbf16>, vector<128x128xbf16>, vector<16x128xf32> -> vector<16x128xf32>
    %7 = arith.addf %3, %6 : vector<16x128xf32>
    %c0_6 = arith.constant 0 : index
    %c0_7 = arith.constant 0 : index
    %8 = vector.load %arg7[%c0_6, %c0_7] : memref<16x128xf32, #tpu.memory_space<vmem>>, vector<16x128xf32>
    tpu.vector_store %arg7[%c0_6, %c0_7], %7 {strides = array<i32>} : memref<16x128xf32, #tpu.memory_space<vmem>>, vector<16x128xf32>,
    %c0_i32_8 = arith.constant 0 : i32
    %9 = arith.cmpi eq, %arg2, %c0_i32_8 : i32
    %10 = arith.extui %9 : i1 to i32
    %c0_i32_9 = arith.constant 0 : i32
    %11 = arith.cmpi ne, %10, %c0_i32_9 : i32
    scf.if %11 {
      %c0_10 = arith.constant 0 : index
      %c0_11 = arith.constant 0 : index
      %12 = vector.load %arg7[%c0_10, %c0_11] : memref<16x128xf32, #tpu.memory_space<vmem>>, vector<16x128xf32>
      %c0_12 = arith.constant 0 : index
      %c0_13 = arith.constant 0 : index
      %13 = vector.load %arg5[%c0_12, %c0_13] : memref<1x128xf32, #tpu.memory_space<vmem>>, vector<1x128xf32>
      %14 = vector.broadcast %13 : vector<1x128xf32> to vector<16x128xf32>
      %15 = arith.addf %12, %14 : vector<16x128xf32>
      %c0_14 = arith.constant 0 : index
      %c0_15 = arith.constant 0 : index
      %16 = vector.load %arg6[%c0_14, %c0_15] : memref<16x128xf32, #tpu.memory_space<vmem>>, vector<16x128xf32>
      tpu.vector_store %arg6[%c0_14, %c0_15], %15 {strides = array<i32>} : memref<16x128xf32, #tpu.memory_space<vmem>>, vector<16x128xf32>,
    } else {
    }
    return
  }
  func.func @transform_0(%arg0: i32, %arg1: i32, %arg2: i32) -> (i32, i32) {
    %c0_i32 = arith.constant 0 : i32
    return %arg0, %arg2 : i32, i32
  }
  func.func @transform_1(%arg0: i32, %arg1: i32, %arg2: i32) -> (i32, i32) {
    %c0_i32 = arith.constant 0 : i32
    return %arg2, %arg1 : i32, i32
  }
  func.func @transform_2(%arg0: i32, %arg1: i32, %arg2: i32) -> (i32, i32) {
    %c0_i32 = arith.constant 0 : i32
    %c0_i32_0 = arith.constant 0 : i32
    return %c0_i32, %arg1 : i32, i32
  }
  func.func @transform_3(%arg0: i32, %arg1: i32, %arg2: i32) -> (i32, i32) {
    %c0_i32 = arith.constant 0 : i32
    return %arg0, %arg1 : i32, i32
  }
}

</mosaic_0001>

<bundles_post_ra>
// kernel: transformer_forward.35
= control target key start
LH: loop header
LB: loop body
LE: loop exit
PB: predicated region body
PF: predicated region fallthrough
CT: control target
= control target key end

     0   :  { %v293_v0 = vmov 0.0   ;;  %vm294_vm0 = vmmov 0   ;;  %s372_s1 = inlined_call_operand.vmem [shape: bf16[128,128], index: 1, kind: input, shape index: {}]   ;;  %s373_s0 = inlined_call_operand.vmem [shape: bf16[16,128], index: 0, kind: input, shape index: {}]   ;;  %s374_s3 = inlined_call_operand.vmem [shape: bf16[16,128], index: 3, kind: input, shape index: {}]   ;;  %s375_s2 = inlined_call_operand.vmem [shape: f32[1,128], index: 2, kind: input, shape index: {}]   ;;  %s376_s4 = inlined_call_operand.vmem [shape: f32[1,128], index: 4, kind: input, shape index: {}]   ;;  %s377_s5 = inlined_call_operand.vmem [shape: f32[1,128], index: 5, kind: input, shape index: {}]   ;;  %s378_s6 = inlined_call_operand.vmem [shape: bf16[16,128], index: 6, kind: output, shape index: {}]  }
   0x1   :  { %258 = vmatprep.subr.bf16.mxu0 %v293_v0  ;;  %v280_v1 = vld [vmem:[%s372_s1] sm:$0xff]   ;;  %274 = vmatprep.mubr.msk.bf16.mxu0 %vm294_vm0, %v293_v0  ;;  %v281_v2 = vld [vmem:[%s372_s1 + $0x8] sm:$0xff]   ;;  %v282_v3 = vld [vmem:[%s372_s1 + $0x10] sm:$0xff]  }
   0x2   :  { %259 = vmatpush3.bf16.msra.mxu0 %v280_v1  ;;  %v283_v4 = vld [vmem:[%s372_s1 + $0x18] sm:$0xff]   ;;  %v284_v5 = vld [vmem:[%s372_s1 + $0x20] sm:$0xff]   ;;  %v285_v6 = vld [vmem:[%s372_s1 + $0x28] sm:$0xff]  }
   0x3   :  { %260 = vmatprep.subr.bf16.mxu0 %v293_v0  ;;  %v286_v7 = vld [vmem:[%s372_s1 + $0x30] sm:$0xff]   ;;  %v287_v8 = vld [vmem:[%s372_s1 + $0x38] sm:$0xff]   ;;  %v288_v9 = vld [vmem:[%s373_s0] sm:$0xff]  }
   0x4   :  { %v241_v10 = vld [vmem:[%s374_s3] sm:$0xff]  }
   0x5   :  { %v233_v11 = vld [vmem:[%s375_s2] ss:$0 sm:$0xff]  ;;  %v242_v12 = vunpack.c.l.bf16 %v241_v10  ;;  %v243_v20 = vunpack.c.h.bf16 %v241_v10 }
   0x6   :  { %261 = vmatpush3.bf16.msra.mxu0 %v281_v2  ;;  %v234_v38 = vld [vmem:[%s376_s4] ss:$0 sm:$0xff] }
   0x7   :  { %262 = vmatprep.subr.bf16.mxu0 %v293_v0  ;;  %v235_v42 = vld [vmem:[%s377_s5] ss:$0 sm:$0xff] }
   0xa   :  { %263 = vmatpush3.bf16.msra.mxu0 %v282_v3 }
   0xb   :  { %264 = vmatprep.subr.bf16.mxu0 %v293_v0 }
   0xe   :  { %265 = vmatpush3.bf16.msra.mxu0 %v283_v4 }
   0xf   :  { %266 = vmatprep.subr.bf16.mxu0 %v293_v0 }
  0x12   :  { %267 = vmatpush3.bf16.msra.mxu0 %v284_v5 }
  0x13   :  { %268 = vmatprep.subr.bf16.mxu0 %v293_v0 }
  0x16   :  { %269 = vmatpush3.bf16.msra.mxu0 %v285_v6 }
  0x17   :  { %270 = vmatprep.subr.bf16.mxu0 %v293_v0 }
  0x1a   :  { %271 = vmatpush3.bf16.msra.mxu0 %v286_v7 }
  0x1b   :  { %272 = vmatprep.subr.bf16.mxu0 %v293_v0 }
  0x1e   :  { %273 = vmatpush3.bf16.msra.mxu0 %v287_v8 }
  0x21   :  { %275 = vmatmul.mubr.bf16.vlgmr.msra.gmra.mrb[0].mxu0 %v288_v9 }
  0xf4   :  { %v138_v13 = vpop.f32.mrb[0].mxu0 }
  0xf5   :  { %v161_v14 = vadd.f32 %v233_v11, %v138_v13  ;;  %v276_v15 = vpop.f32.mrb[1].mxu0 }
  0xf6   :  { %v141_v16 = vpop.f32.mrb[2].mxu0 }
  0xf7   :  { %v162_v17 = vadd.f32 %v233_v11, %v141_v16  ;;  %v277_v18 = vpop.f32.mrb[3].mxu0  ;;  %v167_v19 = vadd.f32 %v242_v12, %v161_v14 }
  0xf9   :  { %169 = vadd.xlane.f32.xlu0 %v167_v19  ;;  %v168_v21 = vadd.f32 %v243_v20, %v162_v17 }
  0xfd   :  { %171 = vadd.xlane.f32.xlu0 %v168_v21 }
 0x186   :  { %v170_v22 = vpop.xlane.xlu0 %169 }
 0x187   :  { %v174_v23 = vmul.f32 0.0078125, %v170_v22 }
 0x189   :  { %v176_v24 = vsub.f32 %v167_v19, %v174_v23 }
 0x18a   :  { %v172_v25 = vpop.xlane.xlu0 %171 }
 0x18b   :  { %v175_v26 = vmul.f32 0.0078125, %v172_v25  ;;  %v178_v27 = vmul.f32 %v176_v24, %v176_v24 }
 0x18d   :  { %v177_v28 = vsub.f32 %v168_v21, %v175_v26  ;;  %180 = vadd.xlane.f32.xlu1 %v178_v27 }
 0x18f   :  { %v179_v29 = vmul.f32 %v177_v28, %v177_v28 }
 0x191   :  { %182 = vadd.xlane.f32.xlu1 %v179_v29 }
 0x21a   :  { %v181_v30 = vpop.xlane.xlu1 %180 }
 0x21b   :  { %v184_v31 = vmul.f32 0.0078125, %v181_v30 }
 0x21d   :  { %v186_v32 = vadd.f32 1e-05, %v184_v31 }
 0x21e   :  { %v183_v33 = vpop.xlane.xlu1 %182 }
 0x21f   :  { %289 = vrsqrt.f32 %v186_v32  ;;  %v185_v34 = vmul.f32 0.0078125, %v183_v33 }
 0x221   :  { %v187_v35 = vadd.f32 1e-05, %v185_v34 }
 0x223   :  { %291 = vrsqrt.f32 %v187_v35 }
 0x229   :  { %v290_v36 = vpop.eup %289 }
 0x22a   :  { %v190_v37 = vmul.f32 %v290_v36, %v176_v24 }
 0x22c   :  { %v199_v40 = vmul.f32 %v234_v38, %v190_v37 }
 0x22d   :  { %v292_v39 = vpop.eup %291 }
 0x22e   :  { %v191_v41 = vmul.f32 %v292_v39, %v177_v28  ;;  %v208_v44 = vadd.f32 %v235_v42, %v199_v40 }
 0x230   :  { %v200_v43 = vmul.f32 %v234_v38, %v191_v41 }
 0x232   :  { %v209_v45 = vadd.f32 %v235_v42, %v200_v43 }
 0x234   :  { %v247_v46 = vpack.c.bf16 %v209_v45, %v208_v44 }
 0x236   :  { %248 = vst [vmem:[%s378_s6] sm:$0xff] %v247_v46  }

// kernel: transformer_forward.36
= control target key start
LH: loop header
LB: loop body
LE: loop exit
PB: predicated region body
PF: predicated region fallthrough
CT: control target
= control target key end

     0   :  { %v227_v0 = vmov 0.0   ;;  %vm228_vm0 = vmmov 0   ;;  %s282_s1 = inlined_call_operand.vmem [shape: bf16[128,128], index: 1, kind: input, shape index: {}]   ;;  %s283_s0 = inlined_call_operand.vmem [shape: bf16[16,128], index: 0, kind: input, shape index: {}]   ;;  %s284_s2 = inlined_call_operand.vmem [shape: f32[1,128], index: 2, kind: input, shape index: {}]   ;;  %s285_s3 = inlined_call_operand.vmem [shape: bf16[16,128], index: 3, kind: output, shape index: {}]  }
   0x1   :  { %196 = vmatprep.subr.bf16.mxu0 %v227_v0  ;;  %v218_v1 = vld [vmem:[%s282_s1] sm:$0xff]   ;;  %212 = vmatprep.mubr.msk.bf16.mxu0 %vm228_vm0, %v227_v0  ;;  %v219_v2 = vld [vmem:[%s282_s1 + $0x8] sm:$0xff]   ;;  %v220_v3 = vld [vmem:[%s282_s1 + $0x10] sm:$0xff]  }
   0x2   :  { %197 = vmatpush3.bf16.msra.mxu0 %v218_v1  ;;  %v221_v4 = vld [vmem:[%s282_s1 + $0x18] sm:$0xff]   ;;  %v222_v5 = vld [vmem:[%s282_s1 + $0x20] sm:$0xff]   ;;  %v223_v6 = vld [vmem:[%s282_s1 + $0x28] sm:$0xff]  }
   0x3   :  { %198 = vmatprep.subr.bf16.mxu0 %v227_v0  ;;  %v224_v7 = vld [vmem:[%s282_s1 + $0x30] sm:$0xff]   ;;  %v225_v8 = vld [vmem:[%s282_s1 + $0x38] sm:$0xff]   ;;  %v226_v9 = vld [vmem:[%s283_s0] sm:$0xff]  }
   0x4   :  { %v177_v11 = vld [vmem:[%s284_s2] ss:$0 sm:$0xff] }
   0x6   :  { %199 = vmatpush3.bf16.msra.mxu0 %v219_v2 }
   0x7   :  { %200 = vmatprep.subr.bf16.mxu0 %v227_v0 }
   0xa   :  { %201 = vmatpush3.bf16.msra.mxu0 %v220_v3 }
   0xb   :  { %202 = vmatprep.subr.bf16.mxu0 %v227_v0 }
   0xe   :  { %203 = vmatpush3.bf16.msra.mxu0 %v221_v4 }
   0xf   :  { %204 = vmatprep.subr.bf16.mxu0 %v227_v0 }
  0x12   :  { %205 = vmatpush3.bf16.msra.mxu0 %v222_v5 }
  0x13   :  { %206 = vmatprep.subr.bf16.mxu0 %v227_v0 }
  0x16   :  { %207 = vmatpush3.bf16.msra.mxu0 %v223_v6 }
  0x17   :  { %208 = vmatprep.subr.bf16.mxu0 %v227_v0 }
  0x1a   :  { %209 = vmatpush3.bf16.msra.mxu0 %v224_v7 }
  0x1b   :  { %210 = vmatprep.subr.bf16.mxu0 %v227_v0 }
  0x1e   :  { %211 = vmatpush3.bf16.msra.mxu0 %v225_v8 }
  0x21   :  { %213 = vmatmul.mubr.bf16.vlgmr.msra.gmra.mrb[0].mxu0 %v226_v9 }
  0xf4   :  { %v129_v10 = vpop.f32.mrb[0].mxu0 }
  0xf5   :  { %v214_v12 = vpop.f32.mrb[1].mxu0  ;;  %v152_v14 = vadd.f32 %v177_v11, %v129_v10 }
  0xf6   :  { %v132_v13 = vpop.f32.mrb[2].mxu0 }
  0xf7   :  { %v153_v15 = vadd.f32 %v177_v11, %v132_v13  ;;  %v215_v16 = vpop.f32.mrb[3].mxu0 }
  0xf9   :  { %v185_v17 = vpack.c.bf16 %v153_v15, %v152_v14 }
  0xfb   :  { %186 = vst [vmem:[%s285_s3] sm:$0xff] %v185_v17  }

// kernel: transformer_forward.34
= control target key start
LH: loop header
LB: loop body
LE: loop exit
PB: predicated region body
PF: predicated region fallthrough
CT: control target
= control target key end

     0   :  { %s855_s9 = smov 0   ;;  %s959_s0 = inlined_call_operand.vmem [shape: bf16[2,8,384], index: 0, kind: input, shape index: {}]   ;;  %s960_s1 = inlined_call_operand.vmem [shape: f32[2,1,8], index: 1, kind: input, shape index: {}]   ;;  %s961_s2 = inlined_call_operand.vmem [shape: bf16[2,8,128], index: 2, kind: output, shape index: {}]  }
   0x1 LB: > { %s708_s10 = sadd.s32 4294967295, %s832_s9   ;;  %p712_p0 = scmp.ge.s32.totalorder %s832_s9, 1  ;;  %s832_s9 = sphi %s855_s9, %s12_s9  }
   0x2   : > { %p120_p1 = scmp.lt.s32.totalorder %s832_s9, 3 }
   0x4   : > { %p121_p2 = pnand %p712_p0, %p120_p1 }
   0x5   : > { %p144_p3 = scmp.lt.s32.totalorder (!%p121_p2), %s708_s10, 1  ;;  %v834_v0 = vmov (!%p121_p2), 0.0   ;;  %vm835_vm0 = vmmov (!%p121_p2), 0   ;;  %vm177_vm1 = vcmask (!%p121_p2), 261120   ;;  %v163_v4 = vlaneseq (!%p121_p2)  ;;  %s837_s18 = smov (!%p121_p2), 96  }
   0x6   : > { %124 = sbr.rel (%p121_p2) target bundleno = 1484 (0x5cc), region = 28  ;;  %744 = vmatprep.subr.bf16.mxu0 (!%p121_p2), %v834_v0  ;;  %746 = vmatprep.mubr.msk.bf16.mxu0 (!%p121_p2), %vm835_vm0, %v834_v0  ;;  %v836_v8 = vmov (!%p121_p2), -1e+09   ;;  %vm226_vm4 = vcmask (!%p121_p2), 64512   ;;  %s838_s19 = smov (!%p121_p2), 64   ;;  %vm242_vm5 = vcmask (!%p121_p2), 1043456  }
   0x7   : > { %750 = vmatprep.subr.bf16.mxu1 (!%p121_p2), %v834_v0  ;;  %752 = vmatprep.mubr.msk.bf16.mxu1 (!%p121_p2), %vm835_vm0, %v834_v0  ;;  %v164_v6 = vshrl.u32 (!%p121_p2), %v163_v4, 7  ;;  %v171_v10 = vand.u32 (!%p121_p2), 127, %v163_v4  ;;  %s839_s20 = smov (!%p121_p2), 32   ;;  %vm640_vm6 = vcmask (!%p121_p2), 523264   ;;  %vm642_vm7 = vcmask (!%p121_p2), 785408  }
   0x9   : > { %v165_v7 = vsub.s32 (!%p121_p2), 0, %v164_v6  ;;  %vm172_vm3 = vcmp.ge.s32.totalorder (!%p121_p2), %v164_v6, %v171_v10 }
   0xd   : > { %s963_s10 = smov (!%p144_p3, %s708_s10), 1 }
   0xe   : > { %s792_s11 = smul.u32 12, %s963_s10  ;;  %s151_s17 = scalar_lea.vmem %s960_s1, %s963_s10 }
   0xf   : > { %v159_v5 = vld [vmem:[%s151_s17] sm:$0x1]  ;;  %s714_s21 = sshll.u32 %s963_s10, 2 }
  0x10   : > { %s875_s14 = scalar_lea.vmem %s959_s0, %s792_s11  ;;  %vm160_vm2 = vcmp.gt.f32.partialorder %v159_v5, 0.0  ;;  %s155_s24 = scalar_lea.vmem %s961_s2, %s714_s21 }
  0x11   : > { %v157_v1 = vld [vmem:[%s875_s14] sm:$0xff]  ;;  %v161_v9 = vsel %vm160_vm2, 0.0, %v836_v8  ;;  %v898_v26 = vld [vmem:[%s875_s14 + $0x8] sm:$0xf] }
  0x12   : > { %v715_v2 = vcombine.high %v157_v1, %v157_v1  ;;  %v166_v11 = vrot.slane %v161_v9, %v165_v7  ;;  %v718_v20 = vcombine.low %v157_v1, %v157_v1  ;;  %v244_v27 = vsel %vm242_vm5, %v898_v26, 0 }
  0x13   : > { %751 = vmatpush3.bf16.msra.mxu1 %v244_v27 }
  0x14   : > { %v182_v3 = vsel %vm177_vm1, %v715_v2, 0  ;;  %v887_v13 = vsel %vm172_vm3, %v166_v11, -1e+09  ;;  %290 = vrot.lane.b32.xlu1 %v715_v2, %s837_s18  ;;  %756 = vmatprep.subr.bf16.mxu1 %v834_v0 }
  0x15   : > { %745 = vmatpush3.bf16.xpose.msra.mxu0 %v182_v3 }
  0x16   : > { %762 = vmatprep.subr.bf16.mxu0 %v834_v0 }
  0x18   : > { %288 = vrot.lane.b32.xlu1 %v718_v20, %s837_s18 }
  0x1c   : > { %747 = vmatmul.mubr.msk.bf16.vlgmr.msra.gmra.mrb[0].mxu0 %vm177_vm1, %v157_v1  ;;  %403 = vrot.lane.b32.xlu1 %v718_v20, %s838_s19 }
  0x1d   : > { %764 = vmatprep.mubr.msk.bf16.mxu0 %vm835_vm0, %v834_v0 }
  0x20   : > { %517 = vrot.lane.b32.xlu1 %v715_v2, %s839_s20 }
  0x24   : > { %515 = vrot.lane.b32.xlu1 %v718_v20, %s839_s20 }
  0x86   : > { %v291_v30 = vpop.permute.xlu1 %290 }
  0x87   : > { %v296_v32 = vsel %vm177_vm1, %v291_v30, 0 }
  0x8a   : > { %v289_v34 = vpop.permute.xlu1 %288 }
  0x8e   : > { %v404_v36 = vpop.permute.xlu1 %403 }
  0x92   : > { %v518_v38 = vpop.permute.xlu1 %517 }
  0x93   : > { %v523_v39 = vsel %vm177_vm1, %v518_v38, 0 }
  0x96   : > { %v516_v40 = vpop.permute.xlu1 %515 }
  0xef   : > { %v218_v12 = vpop.f32.mrb[0].mxu0 }
  0xf0   : > { %v224_v14 = vmul.f32 0.17677669, %v218_v12  ;;  %v748_v15 = vpop.f32.mrb[1].mxu0 }
  0xf1   : > { %v221_v16 = vpop.f32.mrb[2].mxu0 }
  0xf2   : > { %v749_v17 = vpop.f32.mrb[3].mxu0  ;;  %v225_v18 = vadd.f32 %v224_v14, %v887_v13 }
  0xf4   : > { %v227_v19 = vsel %vm226_vm4, %v225_v18, -inf }
  0xf5   : > { %228 = vmax.xlane.f32.xlu0 %v227_v19 }
 0x182   : > { %v229_v21 = vpop.xlane.xlu0 %228 }
 0x183   : > { %v230_v22 = vsub.f32 %v225_v18, %v229_v21 }
 0x185   : > { %v231_v23 = vmul.f32 1.442695, %v230_v22 }
 0x187   : > { %810 = vpow2.f32 %v231_v23 }
 0x191   : > { %v811_v24 = vpop.eup %810 }
 0x192   : > { %v233_v25 = vsel %vm226_vm4, %v811_v24, 0.0 }
 0x193   : > { %234 = vadd.xlane.f32.xlu0 %v233_v25 }
 0x1a9   : > { %405 = vrot.lane.b32.xlu0 %v715_v2, %s838_s19 }
 0x220   : > { %v235_v28 = vpop.xlane.xlu0 %234 }
 0x221   : > { %812 = vrcp.f32 %v235_v28 }
 0x224   : > { %v406_v35 = vpop.permute.xlu0 %405 }
 0x225   : > { %v411_v37 = vsel %vm177_vm1, %v406_v35, 0 }
 0x22b   : > { %v813_v29 = vpop.eup %812 }
 0x22c   : > { %v237_v31 = vmul.f32 %v813_v29, %v811_v24 }
 0x22e   : > { %v238_v33 = vpack.c.bf16 %v237_v31, %v237_v31 }
 0x230   : > { %753 = vmatmul.mubr.msk.bf16.vlgmr.msra.gmra.mrb[0].mxu1 %vm226_vm4, %v238_v33 }
 0x231   : > { %757 = vmatpush3.bf16.xpose.msra.mxu1 %v296_v32  ;;  %758 = vmatprep.mubr.msk.bf16.mxu1 %vm835_vm0, %v834_v0 }
 0x232   : > { %768 = vmatprep.subr.bf16.mxu1 %v834_v0 }
 0x238   : > { %759 = vmatmul.mubr.msk.bf16.vlgmr.msra.gmra.mrb[4].mxu1 %vm177_vm1, %v289_v34 }
 0x239   : > { %769 = vmatpush3.bf16.xpose.msra.mxu1 %v411_v37  ;;  %770 = vmatprep.mubr.msk.bf16.mxu1 %vm835_vm0, %v834_v0 }
 0x23a   : > { %780 = vmatprep.subr.bf16.mxu1 %v834_v0 }
 0x240   : > { %771 = vmatmul.mubr.msk.bf16.vlgmr.msra.gmra.mrb[8].mxu1 %vm177_vm1, %v404_v36 }
 0x241   : > { %781 = vmatpush3.bf16.xpose.msra.mxu1 %v523_v39  ;;  %782 = vmatprep.mubr.msk.bf16.mxu1 %vm835_vm0, %v834_v0 }
 0x248   : > { %783 = vmatmul.mubr.msk.bf16.vlgmr.msra.gmra.mrb[12].mxu1 %vm177_vm1, %v516_v40 }
 0x303   : > { %v919_v41 = vpop.f32.mrb[0].mxu1 }
 0x304   : > { %v754_v42 = vpop.f32.mrb[1].mxu1 }
 0x305   : > { %v283_v43 = vpop.f32.mrb[2].mxu1 }
 0x306   : > { %v755_v44 = vpop.f32.mrb[3].mxu1 }
 0x30b   : > { %v332_v45 = vpop.f32.mrb[4].mxu1 }
 0x30c   : > { %v338_v46 = vmul.f32 0.17677669, %v332_v45  ;;  %v760_v47 = vpop.f32.mrb[5].mxu1 }
 0x30d   : > { %v335_v48 = vpop.f32.mrb[6].mxu1 }
 0x30e   : > { %v761_v49 = vpop.f32.mrb[7].mxu1  ;;  %v339_v50 = vadd.f32 %v338_v46, %v887_v13 }
 0x310   : > { %v340_v51 = vsel %vm226_vm4, %v339_v50, -inf }
 0x311   : > { %341 = vmax.xlane.f32.xlu1 %v340_v51 }
 0x313   : > { %v447_v52 = vpop.f32.mrb[8].mxu1 }
 0x314   : > { %v453_v53 = vmul.f32 0.17677669, %v447_v52  ;;  %v772_v54 = vpop.f32.mrb[9].mxu1 }
 0x315   : > { %v450_v55 = vpop.f32.mrb[10].mxu1 }
 0x316   : > { %v454_v56 = vadd.f32 %v453_v53, %v887_v13  ;;  %v773_v57 = vpop.f32.mrb[11].mxu1 }
 0x318   : > { %v455_v58 = vsel %vm226_vm4, %v454_v56, -inf }
 0x319   : > { %456 = vmax.xlane.f32.xlu0 %v455_v58 }
 0x31b   : > { %v559_v59 = vpop.f32.mrb[12].mxu1 }
 0x31c   : > { %v565_v60 = vmul.f32 0.17677669, %v559_v59  ;;  %v784_v61 = vpop.f32.mrb[13].mxu1 }
 0x31d   : > { %v562_v62 = vpop.f32.mrb[14].mxu1 }
 0x31e   : > { %v566_v63 = vadd.f32 %v565_v60, %v887_v13  ;;  %v785_v1 = vpop.f32.mrb[15].mxu1  ;;  %v720_v13 = vcombine.low %v898_v26, %v898_v26 }
 0x320   : > { %v567_v2 = vsel %vm226_vm4, %v566_v63, -inf }
 0x321   : > { %568 = vmax.xlane.f32.xlu1 %v567_v2 }
 0x39e   : > { %v342_v3 = vpop.xlane.xlu1 %341 }
 0x39f   : > { %v343_v4 = vsub.f32 %v339_v50, %v342_v3 }
 0x3a1   : > { %v344_v5 = vmul.f32 1.442695, %v343_v4 }
 0x3a3   : > { %814 = vpow2.f32 %v344_v5 }
 0x3a6   : > { %v457_v6 = vpop.xlane.xlu0 %456 }
 0x3a7   : > { %v458_v7 = vsub.f32 %v454_v56, %v457_v6 }
 0x3a9   : > { %v459_v8 = vmul.f32 1.442695, %v458_v7 }
 0x3ab   : > { %816 = vpow2.f32 %v459_v8 }
 0x3ad   : > { %v815_v9 = vpop.eup %814 }
 0x3ae   : > { %v346_v10 = vsel %vm226_vm4, %v815_v9, 0.0  ;;  %v569_v14 = vpop.xlane.xlu1 %568 }
 0x3af   : > { %347 = vadd.xlane.f32.xlu1 %v346_v10  ;;  %v570_v15 = vsub.f32 %v566_v63, %v569_v14 }
 0x3b1   : > { %v571_v16 = vmul.f32 1.442695, %v570_v15 }
 0x3b3   : > { %818 = vpow2.f32 %v571_v16 }
 0x3b5   : > { %v817_v11 = vpop.eup %816 }
 0x3b6   : > { %v461_v12 = vsel %vm226_vm4, %v817_v11, 0.0 }
 0x3b7   : > { %462 = vadd.xlane.f32.xlu0 %v461_v12 }
 0x3bd   : > { %v819_v17 = vpop.eup %818 }
 0x3be   : > { %v573_v18 = vsel %vm226_vm4, %v819_v17, 0.0 }
 0x3c0   : > { %467 = vrot.lane.b32.xlu1 %v720_v13, %s838_s19 }
 0x3cd   : > { %355 = vrot.lane.b32.xlu0 %v720_v13, %s837_s18 }
 0x3e4   : > { %574 = vadd.xlane.f32.xlu1 %v573_v18 }
 0x3f5   : > { %579 = vrot.lane.b32.xlu1 %v720_v13, %s839_s20 }
 0x43c   : > { %v348_v19 = vpop.xlane.xlu1 %347 }
 0x43d   : > { %820 = vrcp.f32 %v348_v19 }
 0x440   : > { %v468_v25 = vpop.permute.xlu1 %467 }
 0x441   : > { %v473_v27 = vsel %vm242_vm5, %v468_v25, 0 }
 0x444   : > { %v463_v20 = vpop.xlane.xlu0 %462 }
 0x445   : > { %822 = vrcp.f32 %v463_v20 }
 0x447   : > { %v821_v21 = vpop.eup %820 }
 0x448   : > { %v350_v22 = vmul.f32 %v821_v21, %v815_v9  ;;  %v356_v23 = vpop.permute.xlu0 %355 }
 0x449   : > { %v361_v24 = vsel %vm242_vm5, %v356_v23, 0 }
 0x44a   : > { %763 = vmatpush3.bf16.msra.mxu0 %v361_v24  ;;  %v351_v26 = vpack.c.bf16 %v350_v22, %v350_v22 }
 0x44b   : > { %774 = vmatprep.subr.bf16.mxu0 %v834_v0 }
 0x44d   : > { %765 = vmatmul.mubr.msk.bf16.vlgmr.msra.gmra.mrb[4].mxu0 %vm226_vm4, %v351_v26 }
 0x44e   : > { %775 = vmatpush3.bf16.msra.mxu0 %v473_v27  ;;  %776 = vmatprep.mubr.msk.bf16.mxu0 %vm835_vm0, %v834_v0 }
 0x44f   : > { %v823_v28 = vpop.eup %822  ;;  %786 = vmatprep.subr.bf16.mxu0 %v834_v0 }
 0x450   : > { %v465_v29 = vmul.f32 %v823_v28, %v817_v11 }
 0x452   : > { %v466_v30 = vpack.c.bf16 %v465_v29, %v465_v29 }
 0x455   : > { %777 = vmatmul.mubr.msk.bf16.vlgmr.msra.gmra.mrb[8].mxu0 %vm226_vm4, %v466_v30 }
 0x456   : > { %788 = vmatprep.mubr.msk.bf16.mxu0 %vm835_vm0, %v834_v0 }
 0x471   : > { %v575_v31 = vpop.xlane.xlu1 %574 }
 0x472   : > { %824 = vrcp.f32 %v575_v31 }
 0x475   : > { %v580_v32 = vpop.permute.xlu1 %579 }
 0x476   : > { %v585_v33 = vsel %vm242_vm5, %v580_v32, 0 }
 0x477   : > { %787 = vmatpush3.bf16.msra.mxu0 %v585_v33 }
 0x47c   : > { %v825_v34 = vpop.eup %824 }
 0x47d   : > { %v577_v35 = vmul.f32 %v825_v34, %v819_v17 }
 0x47f   : > { %v578_v36 = vpack.c.bf16 %v577_v35, %v577_v35 }
 0x481   : > { %789 = vmatmul.mubr.msk.bf16.vlgmr.msra.gmra.mrb[12].mxu0 %vm226_vm4, %v578_v36 }
 0x520   : > { %v397_v37 = vpop.f32.mrb[4].mxu0 }
 0x521   : > { %628 = vrot.lane.b32.xlu0 %v397_v37, %s839_s20  ;;  %v766_v38 = vpop.f32.mrb[5].mxu0 }
 0x522   : > { %v400_v39 = vpop.f32.mrb[6].mxu0 }
 0x523   : > { %v767_v40 = vpop.f32.mrb[7].mxu0 }
 0x528   : > { %v509_v42 = vpop.f32.mrb[8].mxu0 }
 0x529   : > { %632 = vrot.lane.b32.xlu1 %v509_v42, %s838_s19  ;;  %v778_v0 = vpop.f32.mrb[9].mxu0 }
 0x52a   : > { %v512_v43 = vpop.f32.mrb[10].mxu0 }
 0x52b   : > { %v779_v44 = vpop.f32.mrb[11].mxu0 }
 0x554   : > { %v621_v45 = vpop.f32.mrb[12].mxu0 }
 0x555   : > { %636 = vrot.lane.b32.xlu0 %v621_v45, %s837_s18  ;;  %v790_v46 = vpop.f32.mrb[13].mxu0 }
 0x556   : > { %v624_v47 = vpop.f32.mrb[14].mxu0 }
 0x557   : > { %v791_v48 = vpop.f32.mrb[15].mxu0 }
 0x593   : > { %v629_v49 = vpop.permute.xlu0 %628 }
 0x594   : > { %v639_v51 = vsel %vm177_vm1, %v919_v41, %v629_v49 }
 0x59b   : > { %v633_v50 = vpop.permute.xlu1 %632 }
 0x59c   : > { %v641_v52 = vsel %vm640_vm6, %v639_v51, %v633_v50 }
 0x5c7   : > { %v637_v53 = vpop.permute.xlu0 %636 }
 0x5c8   : > { %v643_v54 = vsel %vm642_vm7, %v641_v52, %v637_v53 }
 0x5c9   : > { %v644_v55 = vpack.c.bf16 %v643_v54, %v643_v54 }
 0x5cb   : > { %645 = vst [vmem:[%s155_s24] sm:$0xf] %v644_v55 }
 0x5cc PF: > { %s12_s9 = sadd.s32 1, %s832_s9  }
 0x5cd   : > { %p9_p4 = scmp.ge.s32.totalorder %s12_s9, 4  }
 0x5cf   :  { %11 = sbr.rel (!%p9_p4) target bundleno = 1 (0x1), region = 61 }

// kernel: transformer_forward.33
= control target key start
LH: loop header
LB: loop body
LE: loop exit
PB: predicated region body
PF: predicated region fallthrough
CT: control target
= control target key end

     0   :  { %v453_v0 = vmov 0.0   ;;  %vm454_vm0 = vmmov 0   ;;  %v455_v3 = vmov 0   ;;  %v306_v27 = vlaneseq  ;;  %s566_s1 = inlined_call_operand.vmem [shape: bf16[128,384], index: 1, kind: input, shape index: {}]   ;;  %s567_s0 = inlined_call_operand.vmem [shape: bf16[16,128], index: 0, kind: input, shape index: {}]   ;;  %s568_s2 = inlined_call_operand.vmem [shape: f32[1,384], index: 2, kind: input, shape index: {}]   ;;  %s569_s3 = inlined_call_operand.vmem [shape: bf16[16,384], index: 3, kind: output, shape index: {}]  }
   0x1   :  { %397 = vmatprep.subr.bf16.mxu1 %v453_v0  ;;  %v420_v1 = vld [vmem:[%s566_s1 + $0x4] ss:$12 sps:$4 sm:$0xff]   ;;  %413 = vmatprep.mubr.msk.bf16.mxu1 %vm454_vm0, %v453_v0  ;;  %v422_v2 = vld [vmem:[%s566_s1 + $0x8] ss:$12 sps:$4 sm:$0xff]   ;;  %v423_v4 = vld [vmem:[%s566_s1] ss:$12 sps:$4 sm:$0xff]  }
   0x2   :  { %231 = vmatprep.mubr.bf16.mxu0 %v455_v3  ;;  %199 = vmatprep.subr.bf16.mxu0 %v420_v1  ;;  %v424_v5 = vld [vmem:[%s566_s1 + $0x1c] ss:$12 sps:$4 sm:$0xff]   ;;  %v426_v6 = vld [vmem:[%s566_s1 + $0x20] ss:$12 sps:$4 sm:$0xff]   ;;  %v427_v7 = vld [vmem:[%s566_s1 + $0x18] ss:$12 sps:$4 sm:$0xff]  }
   0x3   :  { %398 = vmatpush3.bf16.msra.mxu1 %v422_v2  ;;  %200 = vmatpush1.bf16.msra.mxu0 %v423_v4  ;;  %v428_v8 = vld [vmem:[%s566_s1 + $0x34] ss:$12 sps:$4 sm:$0xff]   ;;  %v430_v9 = vld [vmem:[%s566_s1 + $0x38] ss:$12 sps:$4 sm:$0xff]   ;;  %v431_v10 = vld [vmem:[%s566_s1 + $0x30] ss:$12 sps:$4 sm:$0xff]  }
   0x4   :  { %399 = vmatprep.subr.bf16.mxu1 %v453_v0  ;;  %201 = vmatprep.subr.bf16.mxu0 %v424_v5  ;;  %v432_v11 = vld [vmem:[%s566_s1 + $0x4c] ss:$12 sps:$4 sm:$0xff]   ;;  %v434_v12 = vld [vmem:[%s566_s1 + $0x50] ss:$12 sps:$4 sm:$0xff]   ;;  %v435_v13 = vld [vmem:[%s566_s1 + $0x48] ss:$12 sps:$4 sm:$0xff]  }
   0x5   :  { %v436_v14 = vld [vmem:[%s566_s1 + $0x64] ss:$12 sps:$4 sm:$0xff]   ;;  %v438_v15 = vld [vmem:[%s566_s1 + $0x68] ss:$12 sps:$4 sm:$0xff]   ;;  %v439_v16 = vld [vmem:[%s566_s1 + $0x60] ss:$12 sps:$4 sm:$0xff]  }
   0x6   :  { %v440_v17 = vld [vmem:[%s566_s1 + $0x7c] ss:$12 sps:$4 sm:$0xff]   ;;  %v442_v18 = vld [vmem:[%s566_s1 + $0x80] ss:$12 sps:$4 sm:$0xff]   ;;  %v443_v19 = vld [vmem:[%s566_s1 + $0x78] ss:$12 sps:$4 sm:$0xff]  }
   0x7   :  { %400 = vmatpush3.bf16.msra.mxu1 %v426_v6  ;;  %202 = vmatpush1.bf16.msra.mxu0 %v427_v7  ;;  %v444_v20 = vld [vmem:[%s566_s1 + $0x94] ss:$12 sps:$4 sm:$0xff]   ;;  %v446_v21 = vld [vmem:[%s566_s1 + $0x98] ss:$12 sps:$4 sm:$0xff]   ;;  %v447_v22 = vld [vmem:[%s566_s1 + $0x90] ss:$12 sps:$4 sm:$0xff]  }
   0x8   :  { %401 = vmatprep.subr.bf16.mxu1 %v453_v0  ;;  %203 = vmatprep.subr.bf16.mxu0 %v428_v8  ;;  %v448_v23 = vld [vmem:[%s566_s1 + $0xac] ss:$12 sps:$4 sm:$0xff]   ;;  %v450_v24 = vld [vmem:[%s566_s1 + $0xb0] ss:$12 sps:$4 sm:$0xff]   ;;  %v451_v25 = vld [vmem:[%s566_s1 + $0xa8] ss:$12 sps:$4 sm:$0xff]  }
   0x9   :  { %v452_v26 = vld [vmem:[%s567_s0] sm:$0xff]   ;;  %v307_v28 = vshrl.u32 %v306_v27, 7 }
   0xa   :  { %v304_v30 = vld [vmem:[%s568_s2] sm:$0x7] }
   0xb   :  { %402 = vmatpush3.bf16.msra.mxu1 %v430_v9  ;;  %204 = vmatpush1.bf16.msra.mxu0 %v431_v10  ;;  %v316_v29 = vsub.s32 2, %v307_v28  ;;  %v308_v31 = vsub.s32 0, %v307_v28  ;;  %v312_v32 = vsub.s32 1, %v307_v28 }
   0xc   :  { %403 = vmatprep.subr.bf16.mxu1 %v453_v0  ;;  %205 = vmatprep.subr.bf16.mxu0 %v432_v11 }
   0xd   :  { %v317_v33 = vrot.slane %v304_v30, %v316_v29  ;;  %v309_v34 = vrot.slane %v304_v30, %v308_v31  ;;  %v313_v35 = vrot.slane %v304_v30, %v312_v32 }
   0xf   :  { %404 = vmatpush3.bf16.msra.mxu1 %v434_v12  ;;  %206 = vmatpush1.bf16.msra.mxu0 %v435_v13 }
  0x10   :  { %405 = vmatprep.subr.bf16.mxu1 %v453_v0  ;;  %207 = vmatprep.subr.bf16.mxu0 %v436_v14 }
  0x13   :  { %406 = vmatpush3.bf16.msra.mxu1 %v438_v15  ;;  %208 = vmatpush1.bf16.msra.mxu0 %v439_v16 }
  0x14   :  { %407 = vmatprep.subr.bf16.mxu1 %v453_v0  ;;  %209 = vmatprep.subr.bf16.mxu0 %v440_v17 }
  0x17   :  { %408 = vmatpush3.bf16.msra.mxu1 %v442_v18  ;;  %210 = vmatpush1.bf16.msra.mxu0 %v443_v19 }
  0x18   :  { %409 = vmatprep.subr.bf16.mxu1 %v453_v0  ;;  %211 = vmatprep.subr.bf16.mxu0 %v444_v20 }
  0x1b   :  { %410 = vmatpush3.bf16.msra.mxu1 %v446_v21  ;;  %212 = vmatpush1.bf16.msra.mxu0 %v447_v22 }
  0x1c   :  { %411 = vmatprep.subr.bf16.mxu1 %v453_v0  ;;  %213 = vmatprep.subr.bf16.mxu0 %v448_v23 }
  0x1f   :  { %412 = vmatpush3.bf16.msra.mxu1 %v450_v24  ;;  %214 = vmatpush1.bf16.msra.mxu0 %v451_v25 }
  0x22   :  { %414 = vmatmul.mubr.bf16.vlgmr.msra.gmra.mrb[0].mxu1 %v452_v26  ;;  %232 = vmatmul.mubr.bf16.vlgmr.msra.gmra.mrb[0].mxu0 %v452_v26 }
  0xf5   :  { %v276_v36 = vpop.f32.mrb[0].mxu1  ;;  %v233_v38 = vpop.f32.mrb[0].mxu0 }
  0xf6   :  { %v323_v37 = vadd.f32 %v317_v33, %v276_v36  ;;  %v415_v39 = vpop.f32.mrb[1].mxu1  ;;  %v321_v40 = vadd.f32 %v309_v34, %v233_v38  ;;  %v235_v41 = vpop.f32.mrb[1].mxu0 }
  0xf7   :  { %v279_v42 = vpop.f32.mrb[2].mxu1  ;;  %v322_v44 = vadd.f32 %v313_v35, %v235_v41  ;;  %v237_v46 = vpop.f32.mrb[2].mxu0 }
  0xf8   :  { %v385_v43 = vpack.c.bf16 %v323_v37, %v323_v37  ;;  %v326_v45 = vadd.f32 %v317_v33, %v279_v42  ;;  %v416_v47 = vpop.f32.mrb[3].mxu1  ;;  %v324_v48 = vadd.f32 %v309_v34, %v237_v46  ;;  %v239_v49 = vpop.f32.mrb[3].mxu0 }
  0xf9   :  { %v384_v50 = vpack.c.bf16 %v322_v44, %v321_v40  ;;  %v325_v52 = vadd.f32 %v313_v35, %v239_v49 }
  0xfa   :  { %348 = vst [vmem:[%s569_s3 + $0x8] sm:$0xf] %v385_v43  ;;  %v387_v51 = vpack.c.bf16 %v326_v45, %v326_v45 }
  0xfb   :  { %347 = vst [vmem:[%s569_s3] sm:$0xff] %v384_v50  ;;  %v386_v53 = vpack.c.bf16 %v325_v52, %v324_v48 }
  0xfc   :  { %350 = vst [vmem:[%s569_s3 + $0x14] sm:$0xf] %v387_v51 }
  0xfd   :  { %349 = vst [vmem:[%s569_s3 + $0xc] sm:$0xff] %v386_v53 }

// kernel: transformer_forward.37
= control target key start
LH: loop header
LB: loop body
LE: loop exit
PB: predicated region body
PF: predicated region fallthrough
CT: control target
= control target key end

     0   :  { %v270_v1 = vmov 0   ;;  %v191_v18 = vlaneseq  ;;  %s351_s1 = inlined_call_operand.vmem [shape: bf16[128,256], index: 1, kind: input, shape index: {}]   ;;  %s352_s0 = inlined_call_operand.vmem [shape: bf16[16,128], index: 0, kind: input, shape index: {}]   ;;  %s353_s2 = inlined_call_operand.vmem [shape: f32[1,256], index: 2, kind: input, shape index: {}]   ;;  %s354_s3 = inlined_call_operand.vmem [shape: bf16[16,256], index: 3, kind: output, shape index: {}]  }
   0x1   :  { %v245_v0 = vld [vmem:[%s351_s1 + $0x4] ss:$8 sps:$4 sm:$0xff]   ;;  %163 = vmatprep.mubr.bf16.mxu0 %v270_v1  ;;  %v247_v2 = vld [vmem:[%s351_s1] ss:$8 sps:$4 sm:$0xff]   ;;  %v248_v3 = vld [vmem:[%s351_s1 + $0x14] ss:$8 sps:$4 sm:$0xff]  }
   0x2   :  { %131 = vmatprep.subr.bf16.mxu0 %v245_v0  ;;  %v250_v4 = vld [vmem:[%s351_s1 + $0x10] ss:$8 sps:$4 sm:$0xff]   ;;  %v251_v5 = vld [vmem:[%s351_s1 + $0x24] ss:$8 sps:$4 sm:$0xff]   ;;  %v253_v6 = vld [vmem:[%s351_s1 + $0x20] ss:$8 sps:$4 sm:$0xff]  }
   0x3   :  { %132 = vmatpush1.bf16.msra.mxu0 %v247_v2  ;;  %v254_v7 = vld [vmem:[%s351_s1 + $0x34] ss:$8 sps:$4 sm:$0xff]   ;;  %v256_v8 = vld [vmem:[%s351_s1 + $0x30] ss:$8 sps:$4 sm:$0xff]   ;;  %v257_v9 = vld [vmem:[%s351_s1 + $0x44] ss:$8 sps:$4 sm:$0xff]  }
   0x4   :  { %133 = vmatprep.subr.bf16.mxu0 %v248_v3  ;;  %v259_v10 = vld [vmem:[%s351_s1 + $0x40] ss:$8 sps:$4 sm:$0xff]   ;;  %v260_v11 = vld [vmem:[%s351_s1 + $0x54] ss:$8 sps:$4 sm:$0xff]   ;;  %v262_v12 = vld [vmem:[%s351_s1 + $0x50] ss:$8 sps:$4 sm:$0xff]  }
   0x5   :  { %v263_v13 = vld [vmem:[%s351_s1 + $0x64] ss:$8 sps:$4 sm:$0xff]   ;;  %v265_v14 = vld [vmem:[%s351_s1 + $0x60] ss:$8 sps:$4 sm:$0xff]   ;;  %v266_v15 = vld [vmem:[%s351_s1 + $0x74] ss:$8 sps:$4 sm:$0xff]  }
   0x6   :  { %v268_v16 = vld [vmem:[%s351_s1 + $0x70] ss:$8 sps:$4 sm:$0xff]   ;;  %v269_v17 = vld [vmem:[%s352_s0] sm:$0xff]   ;;  %v192_v19 = vshrl.u32 %v191_v18, 7 }
   0x7   :  { %134 = vmatpush1.bf16.msra.mxu0 %v250_v4  ;;  %v189_v21 = vld [vmem:[%s353_s2] sm:$0x3] }
   0x8   :  { %135 = vmatprep.subr.bf16.mxu0 %v251_v5  ;;  %v193_v20 = vsub.s32 0, %v192_v19  ;;  %v197_v22 = vsub.s32 1, %v192_v19 }
   0xa   :  { %v194_v23 = vrot.slane %v189_v21, %v193_v20  ;;  %v198_v24 = vrot.slane %v189_v21, %v197_v22 }
   0xb   :  { %136 = vmatpush1.bf16.msra.mxu0 %v253_v6 }
   0xc   :  { %137 = vmatprep.subr.bf16.mxu0 %v254_v7 }
   0xf   :  { %138 = vmatpush1.bf16.msra.mxu0 %v256_v8 }
  0x10   :  { %139 = vmatprep.subr.bf16.mxu0 %v257_v9 }
  0x13   :  { %140 = vmatpush1.bf16.msra.mxu0 %v259_v10 }
  0x14   :  { %141 = vmatprep.subr.bf16.mxu0 %v260_v11 }
  0x17   :  { %142 = vmatpush1.bf16.msra.mxu0 %v262_v12 }
  0x18   :  { %143 = vmatprep.subr.bf16.mxu0 %v263_v13 }
  0x1b   :  { %144 = vmatpush1.bf16.msra.mxu0 %v265_v14 }
  0x1c   :  { %145 = vmatprep.subr.bf16.mxu0 %v266_v15 }
  0x1f   :  { %146 = vmatpush1.bf16.msra.mxu0 %v268_v16 }
  0x22   :  { %164 = vmatmul.mubr.bf16.vlgmr.msra.gmra.mrb[0].mxu0 %v269_v17 }
  0xf5   :  { %v165_v25 = vpop.f32.mrb[0].mxu0 }
  0xf6   :  { %v201_v26 = vadd.f32 %v194_v23, %v165_v25  ;;  %v167_v27 = vpop.f32.mrb[1].mxu0 }
  0xf7   :  { %v202_v28 = vadd.f32 %v198_v24, %v167_v27  ;;  %v169_v29 = vpop.f32.mrb[2].mxu0 }
  0xf8   :  { %v203_v30 = vadd.f32 %v194_v23, %v169_v29  ;;  %v171_v31 = vpop.f32.mrb[3].mxu0 }
  0xf9   :  { %v242_v32 = vpack.c.bf16 %v202_v28, %v201_v26  ;;  %v204_v33 = vadd.f32 %v198_v24, %v171_v31 }
  0xfb   :  { %217 = vst [vmem:[%s354_s3] sm:$0xff] %v242_v32  ;;  %v243_v34 = vpack.c.bf16 %v204_v33, %v203_v30 }
  0xfd   :  { %218 = vst [vmem:[%s354_s3 + $0x8] sm:$0xff] %v243_v34 }

// kernel: transformer_forward.26
= control target key start
LH: loop header
LB: loop body
LE: loop exit
PB: predicated region body
PF: predicated region fallthrough
CT: control target
= control target key end

     0   :  { %s849_s9 = smov 0   ;;  %s953_s0 = inlined_call_operand.vmem [shape: bf16[2,8,384], index: 0, kind: input, shape index: {}]   ;;  %s954_s1 = inlined_call_operand.vmem [shape: f32[2,1,8], index: 1, kind: input, shape index: {}]   ;;  %s955_s2 = inlined_call_operand.vmem [shape: bf16[2,8,128], index: 2, kind: output, shape index: {}]  }
   0x1 LB: > { %s702_s10 = sadd.s32 4294967295, %s826_s9   ;;  %p706_p0 = scmp.ge.s32.totalorder %s826_s9, 1  ;;  %s826_s9 = sphi %s849_s9, %s12_s9  }
   0x2   : > { %p120_p1 = scmp.lt.s32.totalorder %s826_s9, 3 }
   0x4   : > { %p121_p2 = pnand %p706_p0, %p120_p1 }
   0x5   : > { %p144_p3 = scmp.lt.s32.totalorder (!%p121_p2), %s702_s10, 1  ;;  %v828_v0 = vmov (!%p121_p2), 0.0   ;;  %vm829_vm0 = vmmov (!%p121_p2), 0   ;;  %vm171_vm1 = vcmask (!%p121_p2), 261120   ;;  %v163_v4 = vlaneseq (!%p121_p2)  ;;  %s831_s18 = smov (!%p121_p2), 96  }
   0x6   : > { %124 = sbr.rel (%p121_p2) target bundleno = 1484 (0x5cc), region = 28  ;;  %738 = vmatprep.subr.bf16.mxu0 (!%p121_p2), %v828_v0  ;;  %740 = vmatprep.mubr.msk.bf16.mxu0 (!%p121_p2), %vm829_vm0, %v828_v0  ;;  %v830_v8 = vmov (!%p121_p2), -1e+09   ;;  %vm220_vm3 = vcmask (!%p121_p2), 64512   ;;  %s832_s19 = smov (!%p121_p2), 64   ;;  %vm236_vm4 = vcmask (!%p121_p2), 1043456  }
   0x7   : > { %744 = vmatprep.subr.bf16.mxu1 (!%p121_p2), %v828_v0  ;;  %746 = vmatprep.mubr.msk.bf16.mxu1 (!%p121_p2), %vm829_vm0, %v828_v0  ;;  %v164_v6 = vshrl.u32 (!%p121_p2), %v163_v4, 7  ;;  %s833_s20 = smov (!%p121_p2), 32   ;;  %vm634_vm5 = vcmask (!%p121_p2), 523264   ;;  %vm636_vm6 = vcmask (!%p121_p2), 785408  }
   0x9   : > { %v165_v7 = vsub.s32 (!%p121_p2), 0, %v164_v6 }
   0xd   : > { %s957_s10 = smov (!%p144_p3, %s702_s10), 1 }
   0xe   : > { %s786_s11 = smul.u32 12, %s957_s10  ;;  %s151_s17 = scalar_lea.vmem %s954_s1, %s957_s10 }
   0xf   : > { %v159_v5 = vld [vmem:[%s151_s17] sm:$0x1]  ;;  %s708_s21 = sshll.u32 %s957_s10, 2 }
  0x10   : > { %s869_s14 = scalar_lea.vmem %s953_s0, %s786_s11  ;;  %vm160_vm2 = vcmp.gt.f32.partialorder %v159_v5, 0.0  ;;  %s155_s24 = scalar_lea.vmem %s955_s2, %s708_s21 }
  0x11   : > { %v157_v1 = vld [vmem:[%s869_s14] sm:$0xff]  ;;  %v161_v9 = vsel %vm160_vm2, 0.0, %v830_v8  ;;  %v892_v24 = vld [vmem:[%s869_s14 + $0x8] sm:$0xf] }
  0x12   : > { %v709_v2 = vcombine.high %v157_v1, %v157_v1  ;;  %v881_v10 = vrot.slane %v161_v9, %v165_v7  ;;  %v712_v18 = vcombine.low %v157_v1, %v157_v1  ;;  %v238_v25 = vsel %vm236_vm4, %v892_v24, 0 }
  0x13   : > { %745 = vmatpush3.bf16.msra.mxu1 %v238_v25 }
  0x14   : > { %v176_v3 = vsel %vm171_vm1, %v709_v2, 0  ;;  %284 = vrot.lane.b32.xlu1 %v709_v2, %s831_s18  ;;  %750 = vmatprep.subr.bf16.mxu1 %v828_v0 }
  0x15   : > { %739 = vmatpush3.bf16.xpose.msra.mxu0 %v176_v3 }
  0x16   : > { %756 = vmatprep.subr.bf16.mxu0 %v828_v0 }
  0x18   : > { %282 = vrot.lane.b32.xlu1 %v712_v18, %s831_s18 }
  0x1c   : > { %741 = vmatmul.mubr.msk.bf16.vlgmr.msra.gmra.mrb[0].mxu0 %vm171_vm1, %v157_v1  ;;  %397 = vrot.lane.b32.xlu1 %v712_v18, %s832_s19 }
  0x1d   : > { %758 = vmatprep.mubr.msk.bf16.mxu0 %vm829_vm0, %v828_v0 }
  0x20   : > { %511 = vrot.lane.b32.xlu1 %v709_v2, %s833_s20 }
  0x24   : > { %509 = vrot.lane.b32.xlu1 %v712_v18, %s833_s20 }
  0x86   : > { %v285_v28 = vpop.permute.xlu1 %284 }
  0x87   : > { %v290_v30 = vsel %vm171_vm1, %v285_v28, 0 }
  0x8a   : > { %v283_v32 = vpop.permute.xlu1 %282 }
  0x8e   : > { %v398_v34 = vpop.permute.xlu1 %397 }
  0x92   : > { %v512_v36 = vpop.permute.xlu1 %511 }
  0x93   : > { %v517_v37 = vsel %vm171_vm1, %v512_v36, 0 }
  0x96   : > { %v510_v38 = vpop.permute.xlu1 %509 }
  0xef   : > { %v212_v11 = vpop.f32.mrb[0].mxu0 }
  0xf0   : > { %v218_v12 = vmul.f32 0.17677669, %v212_v11  ;;  %v742_v13 = vpop.f32.mrb[1].mxu0 }
  0xf1   : > { %v215_v14 = vpop.f32.mrb[2].mxu0 }
  0xf2   : > { %v743_v15 = vpop.f32.mrb[3].mxu0  ;;  %v219_v16 = vadd.f32 %v218_v12, %v881_v10 }
  0xf4   : > { %v221_v17 = vsel %vm220_vm3, %v219_v16, -inf }
  0xf5   : > { %222 = vmax.xlane.f32.xlu0 %v221_v17 }
 0x182   : > { %v223_v19 = vpop.xlane.xlu0 %222 }
 0x183   : > { %v224_v20 = vsub.f32 %v219_v16, %v223_v19 }
 0x185   : > { %v225_v21 = vmul.f32 1.442695, %v224_v20 }
 0x187   : > { %804 = vpow2.f32 %v225_v21 }
 0x191   : > { %v805_v22 = vpop.eup %804 }
 0x192   : > { %v227_v23 = vsel %vm220_vm3, %v805_v22, 0.0 }
 0x193   : > { %228 = vadd.xlane.f32.xlu0 %v227_v23 }
 0x1a9   : > { %399 = vrot.lane.b32.xlu0 %v709_v2, %s832_s19 }
 0x220   : > { %v229_v26 = vpop.xlane.xlu0 %228 }
 0x221   : > { %806 = vrcp.f32 %v229_v26 }
 0x224   : > { %v400_v33 = vpop.permute.xlu0 %399 }
 0x225   : > { %v405_v35 = vsel %vm171_vm1, %v400_v33, 0 }
 0x22b   : > { %v807_v27 = vpop.eup %806 }
 0x22c   : > { %v231_v29 = vmul.f32 %v807_v27, %v805_v22 }
 0x22e   : > { %v232_v31 = vpack.c.bf16 %v231_v29, %v231_v29 }
 0x230   : > { %747 = vmatmul.mubr.msk.bf16.vlgmr.msra.gmra.mrb[0].mxu1 %vm220_vm3, %v232_v31 }
 0x231   : > { %751 = vmatpush3.bf16.xpose.msra.mxu1 %v290_v30  ;;  %752 = vmatprep.mubr.msk.bf16.mxu1 %vm829_vm0, %v828_v0 }
 0x232   : > { %762 = vmatprep.subr.bf16.mxu1 %v828_v0 }
 0x238   : > { %753 = vmatmul.mubr.msk.bf16.vlgmr.msra.gmra.mrb[4].mxu1 %vm171_vm1, %v283_v32 }
 0x239   : > { %763 = vmatpush3.bf16.xpose.msra.mxu1 %v405_v35  ;;  %764 = vmatprep.mubr.msk.bf16.mxu1 %vm829_vm0, %v828_v0 }
 0x23a   : > { %774 = vmatprep.subr.bf16.mxu1 %v828_v0 }
 0x240   : > { %765 = vmatmul.mubr.msk.bf16.vlgmr.msra.gmra.mrb[8].mxu1 %vm171_vm1, %v398_v34 }
 0x241   : > { %775 = vmatpush3.bf16.xpose.msra.mxu1 %v517_v37  ;;  %776 = vmatprep.mubr.msk.bf16.mxu1 %vm829_vm0, %v828_v0 }
 0x248   : > { %777 = vmatmul.mubr.msk.bf16.vlgmr.msra.gmra.mrb[12].mxu1 %vm171_vm1, %v510_v38 }
 0x303   : > { %v913_v39 = vpop.f32.mrb[0].mxu1 }
 0x304   : > { %v748_v40 = vpop.f32.mrb[1].mxu1 }
 0x305   : > { %v277_v41 = vpop.f32.mrb[2].mxu1 }
 0x306   : > { %v749_v42 = vpop.f32.mrb[3].mxu1 }
 0x30b   : > { %v326_v43 = vpop.f32.mrb[4].mxu1 }
 0x30c   : > { %v332_v44 = vmul.f32 0.17677669, %v326_v43  ;;  %v754_v45 = vpop.f32.mrb[5].mxu1 }
 0x30d   : > { %v329_v46 = vpop.f32.mrb[6].mxu1 }
 0x30e   : > { %v755_v47 = vpop.f32.mrb[7].mxu1  ;;  %v333_v48 = vadd.f32 %v332_v44, %v881_v10 }
 0x310   : > { %v334_v49 = vsel %vm220_vm3, %v333_v48, -inf }
 0x311   : > { %335 = vmax.xlane.f32.xlu1 %v334_v49 }
 0x313   : > { %v441_v50 = vpop.f32.mrb[8].mxu1 }
 0x314   : > { %v447_v51 = vmul.f32 0.17677669, %v441_v50  ;;  %v766_v52 = vpop.f32.mrb[9].mxu1 }
 0x315   : > { %v444_v53 = vpop.f32.mrb[10].mxu1 }
 0x316   : > { %v448_v54 = vadd.f32 %v447_v51, %v881_v10  ;;  %v767_v55 = vpop.f32.mrb[11].mxu1 }
 0x318   : > { %v449_v56 = vsel %vm220_vm3, %v448_v54, -inf }
 0x319   : > { %450 = vmax.xlane.f32.xlu0 %v449_v56 }
 0x31b   : > { %v553_v57 = vpop.f32.mrb[12].mxu1 }
 0x31c   : > { %v559_v58 = vmul.f32 0.17677669, %v553_v57  ;;  %v778_v59 = vpop.f32.mrb[13].mxu1 }
 0x31d   : > { %v556_v60 = vpop.f32.mrb[14].mxu1 }
 0x31e   : > { %v560_v61 = vadd.f32 %v559_v58, %v881_v10  ;;  %v779_v62 = vpop.f32.mrb[15].mxu1  ;;  %v714_v10 = vcombine.low %v892_v24, %v892_v24 }
 0x320   : > { %v561_v63 = vsel %vm220_vm3, %v560_v61, -inf }
 0x321   : > { %562 = vmax.xlane.f32.xlu1 %v561_v63 }
 0x39e   : > { %v336_v1 = vpop.xlane.xlu1 %335 }
 0x39f   : > { %v337_v2 = vsub.f32 %v333_v48, %v336_v1 }
 0x3a1   : > { %v338_v3 = vmul.f32 1.442695, %v337_v2 }
 0x3a3   : > { %808 = vpow2.f32 %v338_v3 }
 0x3a6   : > { %v451_v4 = vpop.xlane.xlu0 %450 }
 0x3a7   : > { %v452_v5 = vsub.f32 %v448_v54, %v451_v4 }
 0x3a9   : > { %v453_v6 = vmul.f32 1.442695, %v452_v5 }
 0x3ab   : > { %810 = vpow2.f32 %v453_v6 }
 0x3ad   : > { %v809_v7 = vpop.eup %808 }
 0x3ae   : > { %v340_v8 = vsel %vm220_vm3, %v809_v7, 0.0  ;;  %v563_v12 = vpop.xlane.xlu1 %562 }
 0x3af   : > { %341 = vadd.xlane.f32.xlu1 %v340_v8  ;;  %v564_v13 = vsub.f32 %v560_v61, %v563_v12 }
 0x3b1   : > { %v565_v14 = vmul.f32 1.442695, %v564_v13 }
 0x3b3   : > { %812 = vpow2.f32 %v565_v14 }
 0x3b5   : > { %v811_v9 = vpop.eup %810 }
 0x3b6   : > { %v455_v11 = vsel %vm220_vm3, %v811_v9, 0.0 }
 0x3b7   : > { %456 = vadd.xlane.f32.xlu0 %v455_v11 }
 0x3bd   : > { %v813_v15 = vpop.eup %812 }
 0x3be   : > { %v567_v16 = vsel %vm220_vm3, %v813_v15, 0.0 }
 0x3c0   : > { %461 = vrot.lane.b32.xlu1 %v714_v10, %s832_s19 }
 0x3cd   : > { %349 = vrot.lane.b32.xlu0 %v714_v10, %s831_s18 }
 0x3e4   : > { %568 = vadd.xlane.f32.xlu1 %v567_v16 }
 0x3f5   : > { %573 = vrot.lane.b32.xlu1 %v714_v10, %s833_s20 }
 0x43c   : > { %v342_v17 = vpop.xlane.xlu1 %341 }
 0x43d   : > { %814 = vrcp.f32 %v342_v17 }
 0x440   : > { %v462_v23 = vpop.permute.xlu1 %461 }
 0x441   : > { %v467_v25 = vsel %vm236_vm4, %v462_v23, 0 }
 0x444   : > { %v457_v18 = vpop.xlane.xlu0 %456 }
 0x445   : > { %816 = vrcp.f32 %v457_v18 }
 0x447   : > { %v815_v19 = vpop.eup %814 }
 0x448   : > { %v344_v20 = vmul.f32 %v815_v19, %v809_v7  ;;  %v350_v21 = vpop.permute.xlu0 %349 }
 0x449   : > { %v355_v22 = vsel %vm236_vm4, %v350_v21, 0 }
 0x44a   : > { %757 = vmatpush3.bf16.msra.mxu0 %v355_v22  ;;  %v345_v24 = vpack.c.bf16 %v344_v20, %v344_v20 }
 0x44b   : > { %768 = vmatprep.subr.bf16.mxu0 %v828_v0 }
 0x44d   : > { %759 = vmatmul.mubr.msk.bf16.vlgmr.msra.gmra.mrb[4].mxu0 %vm220_vm3, %v345_v24 }
 0x44e   : > { %769 = vmatpush3.bf16.msra.mxu0 %v467_v25  ;;  %770 = vmatprep.mubr.msk.bf16.mxu0 %vm829_vm0, %v828_v0 }
 0x44f   : > { %v817_v26 = vpop.eup %816  ;;  %780 = vmatprep.subr.bf16.mxu0 %v828_v0 }
 0x450   : > { %v459_v27 = vmul.f32 %v817_v26, %v811_v9 }
 0x452   : > { %v460_v28 = vpack.c.bf16 %v459_v27, %v459_v27 }
 0x455   : > { %771 = vmatmul.mubr.msk.bf16.vlgmr.msra.gmra.mrb[8].mxu0 %vm220_vm3, %v460_v28 }
 0x456   : > { %782 = vmatprep.mubr.msk.bf16.mxu0 %vm829_vm0, %v828_v0 }
 0x471   : > { %v569_v29 = vpop.xlane.xlu1 %568 }
 0x472   : > { %818 = vrcp.f32 %v569_v29 }
 0x475   : > { %v574_v30 = vpop.permute.xlu1 %573 }
 0x476   : > { %v579_v31 = vsel %vm236_vm4, %v574_v30, 0 }
 0x477   : > { %781 = vmatpush3.bf16.msra.mxu0 %v579_v31 }
 0x47c   : > { %v819_v32 = vpop.eup %818 }
 0x47d   : > { %v571_v33 = vmul.f32 %v819_v32, %v813_v15 }
 0x47f   : > { %v572_v34 = vpack.c.bf16 %v571_v33, %v571_v33 }
 0x481   : > { %783 = vmatmul.mubr.msk.bf16.vlgmr.msra.gmra.mrb[12].mxu0 %vm220_vm3, %v572_v34 }
 0x520   : > { %v391_v35 = vpop.f32.mrb[4].mxu0 }
 0x521   : > { %622 = vrot.lane.b32.xlu0 %v391_v35, %s833_s20  ;;  %v760_v36 = vpop.f32.mrb[5].mxu0 }
 0x522   : > { %v394_v37 = vpop.f32.mrb[6].mxu0 }
 0x523   : > { %v761_v38 = vpop.f32.mrb[7].mxu0 }
 0x528   : > { %v503_v40 = vpop.f32.mrb[8].mxu0 }
 0x529   : > { %626 = vrot.lane.b32.xlu1 %v503_v40, %s832_s19  ;;  %v772_v0 = vpop.f32.mrb[9].mxu0 }
 0x52a   : > { %v506_v41 = vpop.f32.mrb[10].mxu0 }
 0x52b   : > { %v773_v42 = vpop.f32.mrb[11].mxu0 }
 0x554   : > { %v615_v43 = vpop.f32.mrb[12].mxu0 }
 0x555   : > { %630 = vrot.lane.b32.xlu0 %v615_v43, %s831_s18  ;;  %v784_v44 = vpop.f32.mrb[13].mxu0 }
 0x556   : > { %v618_v45 = vpop.f32.mrb[14].mxu0 }
 0x557   : > { %v785_v46 = vpop.f32.mrb[15].mxu0 }
 0x593   : > { %v623_v47 = vpop.permute.xlu0 %622 }
 0x594   : > { %v633_v49 = vsel %vm171_vm1, %v913_v39, %v623_v47 }
 0x59b   : > { %v627_v48 = vpop.permute.xlu1 %626 }
 0x59c   : > { %v635_v50 = vsel %vm634_vm5, %v633_v49, %v627_v48 }
 0x5c7   : > { %v631_v51 = vpop.permute.xlu0 %630 }
 0x5c8   : > { %v637_v52 = vsel %vm636_vm6, %v635_v50, %v631_v51 }
 0x5c9   : > { %v638_v53 = vpack.c.bf16 %v637_v52, %v637_v52 }
 0x5cb   : > { %639 = vst [vmem:[%s155_s24] sm:$0xf] %v638_v53 }
 0x5cc PF: > { %s12_s9 = sadd.s32 1, %s826_s9  }
 0x5cd   : > { %p9_p4 = scmp.ge.s32.totalorder %s12_s9, 4  }
 0x5cf   :  { %11 = sbr.rel (!%p9_p4) target bundleno = 1 (0x1), region = 61 }

// kernel: transformer_forward.38
= control target key start
LH: loop header
LB: loop body
LE: loop exit
PB: predicated region body
PF: predicated region fallthrough
CT: control target
= control target key end

     0   :  { %s912_s12 = smov 0   ;;  %s1020_s0 = inlined_call_operand.vmem [shape: bf16[2,8,128], index: 0, kind: input, shape index: {}]   ;;  %s1021_s1 = inlined_call_operand.vmem [shape: bf16[2,8,256], index: 1, kind: input, shape index: {}]   ;;  %s1022_s2 = inlined_call_operand.vmem [shape: f32[2,1,8], index: 2, kind: input, shape index: {}]   ;;  %s1023_s3 = inlined_call_operand.vmem [shape: bf16[2,8,128], index: 3, kind: output, shape index: {}]  }
   0x1 LB: > { %s758_s13 = sadd.s32 4294967295, %s884_s12   ;;  %p762_p0 = scmp.ge.s32.totalorder %s884_s12, 1  ;;  %s884_s12 = sphi %s912_s12, %s13_s12  }
   0x2   : > { %p154_p1 = scmp.lt.s32.totalorder %s884_s12, 3 }
   0x4   : > { %p155_p2 = pnand %p762_p0, %p154_p1 }
   0x5   : > { %p184_p3 = scmp.lt.s32.totalorder (!%p155_p2), %s758_s13, 1  ;;  %v886_v0 = vmov (!%p155_p2), 0.0   ;;  %vm887_vm0 = vmmov (!%p155_p2), 0   ;;  %vm212_vm1 = vcmask (!%p155_p2), 261120   ;;  %v207_v4 = vlaneseq (!%p155_p2)  ;;  %s889_s25 = smov (!%p155_p2), 96  }
   0x6   : > { %158 = sbr.rel (%p155_p2) target bundleno = 1481 (0x5c9), region = 32  ;;  %797 = vmatprep.subr.bf16.mxu0 (!%p155_p2), %v886_v0  ;;  %799 = vmatprep.mubr.msk.bf16.mxu0 (!%p155_p2), %vm887_vm0, %v886_v0  ;;  %v888_v8 = vmov (!%p155_p2), -1e+09   ;;  %vm261_vm3 = vcmask (!%p155_p2), 64512   ;;  %s890_s26 = smov (!%p155_p2), 64   ;;  %vm280_vm4 = vcmask (!%p155_p2), 1043456  }
   0x7   : > { %803 = vmatprep.subr.bf16.mxu1 (!%p155_p2), %v886_v0  ;;  %805 = vmatprep.mubr.msk.bf16.mxu1 (!%p155_p2), %vm887_vm0, %v886_v0  ;;  %v208_v6 = vshrl.u32 (!%p155_p2), %v207_v4, 7  ;;  %s891_s27 = smov (!%p155_p2), 32   ;;  %vm678_vm5 = vcmask (!%p155_p2), 523264   ;;  %vm680_vm6 = vcmask (!%p155_p2), 785408  }
   0x9   : > { %v209_v7 = vsub.s32 (!%p155_p2), 0, %v208_v6 }
   0xd   : > { %s1025_s13 = smov (!%p184_p3, %s758_s13), 1 }
   0xe   : > { %s780_s14 = sshll.u32 %s1025_s13, 3  ;;  %s763_s18 = sshll.u32 %s1025_s13, 2 }
   0xf   : > { %s192_s17 = scalar_lea.vmem %s1021_s1, %s780_s14  ;;  %s187_s21 = scalar_lea.vmem %s1020_s0, %s763_s18 }
  0x10   : > { %v202_v1 = vld [vmem:[%s192_s17] sm:$0xff]  ;;  %s195_s24 = scalar_lea.vmem %s1022_s2, %s1025_s13  ;;  %s199_s30 = scalar_lea.vmem %s1023_s3, %s763_s18 }
  0x11   : > { %v217_v2 = vsel %vm212_vm1, %v202_v1, 0  ;;  %v201_v3 = vld [vmem:[%s187_s21] sm:$0xf]  ;;  %v771_v18 = vcombine.low %v202_v1, %v202_v1  ;;  %v957_v25 = vcombine.high %v202_v1, %v202_v1 }
  0x12   : > { %798 = vmatpush3.bf16.xpose.msra.mxu0 %v217_v2  ;;  %v203_v5 = vld [vmem:[%s195_s24] sm:$0x1]  ;;  %v770_v19 = vcombine.low %v201_v3, %v201_v3 }
  0x13   : > { %815 = vmatprep.subr.bf16.mxu0 %v886_v0  ;;  %vm204_vm2 = vcmp.gt.f32.partialorder %v203_v5, 0.0  ;;  %331 = vrot.lane.b32.xlu1 %v771_v18, %s889_s25  ;;  %v282_v26 = vsel %vm280_vm4, %v957_v25, 0 }
  0x14   : > { %v205_v9 = vsel %vm204_vm2, 0.0, %v888_v8  ;;  %804 = vmatpush3.bf16.msra.mxu1 %v282_v26 }
  0x15   : > { %v947_v10 = vrot.slane %v205_v9, %v209_v7  ;;  %809 = vmatprep.subr.bf16.mxu1 %v886_v0 }
  0x17   : > { %327 = vrot.lane.b32.xlu1 %v770_v19, %s889_s25 }
  0x19   : > { %800 = vmatmul.mubr.msk.bf16.vlgmr.msra.gmra.mrb[0].mxu0 %vm212_vm1, %v201_v3 }
  0x1a   : > { %817 = vmatprep.mubr.msk.bf16.mxu0 %vm887_vm0, %v886_v0 }
  0x1b   : > { %441 = vrot.lane.b32.xlu1 %v770_v19, %s890_s26 }
  0x1f   : > { %555 = vrot.lane.b32.xlu1 %v771_v18, %s891_s27 }
  0x23   : > { %553 = vrot.lane.b32.xlu1 %v770_v19, %s891_s27 }
  0x85   : > { %v332_v29 = vpop.permute.xlu1 %331 }
  0x86   : > { %v337_v31 = vsel %vm212_vm1, %v332_v29, 0 }
  0x89   : > { %v328_v33 = vpop.permute.xlu1 %327 }
  0x8d   : > { %v442_v35 = vpop.permute.xlu1 %441 }
  0x91   : > { %v556_v37 = vpop.permute.xlu1 %555 }
  0x92   : > { %v561_v38 = vsel %vm212_vm1, %v556_v37, 0 }
  0x95   : > { %v554_v39 = vpop.permute.xlu1 %553 }
  0xec   : > { %v253_v11 = vpop.f32.mrb[0].mxu0 }
  0xed   : > { %v259_v12 = vmul.f32 0.17677669, %v253_v11  ;;  %v801_v13 = vpop.f32.mrb[1].mxu0 }
  0xee   : > { %v256_v14 = vpop.f32.mrb[2].mxu0 }
  0xef   : > { %v802_v15 = vpop.f32.mrb[3].mxu0  ;;  %v260_v16 = vadd.f32 %v259_v12, %v947_v10 }
  0xf1   : > { %v262_v17 = vsel %vm261_vm3, %v260_v16, -inf }
  0xf2   : > { %263 = vmax.xlane.f32.xlu0 %v262_v17 }
 0x17f   : > { %v264_v20 = vpop.xlane.xlu0 %263 }
 0x180   : > { %v265_v21 = vsub.f32 %v260_v16, %v264_v20 }
 0x182   : > { %v266_v22 = vmul.f32 1.442695, %v265_v21 }
 0x184   : > { %862 = vpow2.f32 %v266_v22 }
 0x18e   : > { %v863_v23 = vpop.eup %862 }
 0x18f   : > { %v268_v24 = vsel %vm261_vm3, %v863_v23, 0.0 }
 0x190   : > { %269 = vadd.xlane.f32.xlu0 %v268_v24 }
 0x1a6   : > { %443 = vrot.lane.b32.xlu0 %v771_v18, %s890_s26 }
 0x21d   : > { %v270_v27 = vpop.xlane.xlu0 %269 }
 0x21e   : > { %864 = vrcp.f32 %v270_v27 }
 0x221   : > { %v444_v34 = vpop.permute.xlu0 %443 }
 0x222   : > { %v449_v36 = vsel %vm212_vm1, %v444_v34, 0 }
 0x228   : > { %v865_v28 = vpop.eup %864 }
 0x229   : > { %v272_v30 = vmul.f32 %v865_v28, %v863_v23 }
 0x22b   : > { %v273_v32 = vpack.c.bf16 %v272_v30, %v272_v30 }
 0x22d   : > { %806 = vmatmul.mubr.msk.bf16.vlgmr.msra.gmra.mrb[0].mxu1 %vm261_vm3, %v273_v32 }
 0x22e   : > { %810 = vmatpush3.bf16.xpose.msra.mxu1 %v337_v31  ;;  %811 = vmatprep.mubr.msk.bf16.mxu1 %vm887_vm0, %v886_v0 }
 0x22f   : > { %821 = vmatprep.subr.bf16.mxu1 %v886_v0 }
 0x235   : > { %812 = vmatmul.mubr.msk.bf16.vlgmr.msra.gmra.mrb[4].mxu1 %vm212_vm1, %v328_v33 }
 0x236   : > { %822 = vmatpush3.bf16.xpose.msra.mxu1 %v449_v36  ;;  %823 = vmatprep.mubr.msk.bf16.mxu1 %vm887_vm0, %v886_v0 }
 0x237   : > { %833 = vmatprep.subr.bf16.mxu1 %v886_v0 }
 0x23d   : > { %824 = vmatmul.mubr.msk.bf16.vlgmr.msra.gmra.mrb[8].mxu1 %vm212_vm1, %v442_v35 }
 0x23e   : > { %834 = vmatpush3.bf16.xpose.msra.mxu1 %v561_v38  ;;  %835 = vmatprep.mubr.msk.bf16.mxu1 %vm887_vm0, %v886_v0 }
 0x245   : > { %836 = vmatmul.mubr.msk.bf16.vlgmr.msra.gmra.mrb[12].mxu1 %vm212_vm1, %v554_v39 }
 0x300   : > { %v978_v40 = vpop.f32.mrb[0].mxu1 }
 0x301   : > { %v807_v41 = vpop.f32.mrb[1].mxu1 }
 0x302   : > { %v321_v42 = vpop.f32.mrb[2].mxu1 }
 0x303   : > { %v808_v43 = vpop.f32.mrb[3].mxu1 }
 0x308   : > { %v373_v44 = vpop.f32.mrb[4].mxu1 }
 0x309   : > { %v379_v45 = vmul.f32 0.17677669, %v373_v44  ;;  %v813_v46 = vpop.f32.mrb[5].mxu1 }
 0x30a   : > { %v376_v47 = vpop.f32.mrb[6].mxu1 }
 0x30b   : > { %v814_v48 = vpop.f32.mrb[7].mxu1  ;;  %v380_v49 = vadd.f32 %v379_v45, %v947_v10 }
 0x30d   : > { %v381_v50 = vsel %vm261_vm3, %v380_v49, -inf }
 0x30e   : > { %382 = vmax.xlane.f32.xlu1 %v381_v50 }
 0x310   : > { %v485_v51 = vpop.f32.mrb[8].mxu1 }
 0x311   : > { %v491_v52 = vmul.f32 0.17677669, %v485_v51  ;;  %v825_v53 = vpop.f32.mrb[9].mxu1 }
 0x312   : > { %v488_v54 = vpop.f32.mrb[10].mxu1 }
 0x313   : > { %v492_v55 = vadd.f32 %v491_v52, %v947_v10  ;;  %v826_v56 = vpop.f32.mrb[11].mxu1 }
 0x315   : > { %v493_v57 = vsel %vm261_vm3, %v492_v55, -inf }
 0x316   : > { %494 = vmax.xlane.f32.xlu0 %v493_v57 }
 0x318   : > { %v597_v58 = vpop.f32.mrb[12].mxu1 }
 0x319   : > { %v603_v59 = vmul.f32 0.17677669, %v597_v58  ;;  %v837_v60 = vpop.f32.mrb[13].mxu1 }
 0x31a   : > { %v600_v61 = vpop.f32.mrb[14].mxu1 }
 0x31b   : > { %v604_v62 = vadd.f32 %v603_v59, %v947_v10  ;;  %v838_v63 = vpop.f32.mrb[15].mxu1 }
 0x31d   : > { %v605_v1 = vsel %vm261_vm3, %v604_v62, -inf }
 0x31e   : > { %606 = vmax.xlane.f32.xlu1 %v605_v1 }
 0x39b   : > { %v383_v2 = vpop.xlane.xlu1 %382 }
 0x39c   : > { %v384_v3 = vsub.f32 %v380_v49, %v383_v2 }
 0x39e   : > { %v385_v4 = vmul.f32 1.442695, %v384_v3 }
 0x3a0   : > { %866 = vpow2.f32 %v385_v4 }
 0x3a3   : > { %v495_v5 = vpop.xlane.xlu0 %494 }
 0x3a4   : > { %v496_v6 = vsub.f32 %v492_v55, %v495_v5 }
 0x3a6   : > { %v497_v7 = vmul.f32 1.442695, %v496_v6 }
 0x3a8   : > { %868 = vpow2.f32 %v497_v7 }
 0x3aa   : > { %v867_v8 = vpop.eup %866 }
 0x3ab   : > { %v387_v9 = vsel %vm261_vm3, %v867_v8, 0.0  ;;  %v607_v10 = vpop.xlane.xlu1 %606 }
 0x3ac   : > { %388 = vadd.xlane.f32.xlu1 %v387_v9  ;;  %v608_v13 = vsub.f32 %v604_v62, %v607_v10 }
 0x3ae   : > { %v609_v14 = vmul.f32 1.442695, %v608_v13 }
 0x3b0   : > { %870 = vpow2.f32 %v609_v14 }
 0x3b2   : > { %v869_v11 = vpop.eup %868 }
 0x3b3   : > { %v499_v12 = vsel %vm261_vm3, %v869_v11, 0.0 }
 0x3b4   : > { %500 = vadd.xlane.f32.xlu0 %v499_v12 }
 0x3ba   : > { %v871_v15 = vpop.eup %870 }
 0x3bb   : > { %v611_v16 = vsel %vm261_vm3, %v871_v15, 0.0 }
 0x3bd   : > { %505 = vrot.lane.b32.xlu1 %v957_v25, %s890_s26 }
 0x3ca   : > { %393 = vrot.lane.b32.xlu0 %v957_v25, %s889_s25 }
 0x3e1   : > { %612 = vadd.xlane.f32.xlu1 %v611_v16 }
 0x3f2   : > { %617 = vrot.lane.b32.xlu1 %v957_v25, %s891_s27 }
 0x439   : > { %v389_v17 = vpop.xlane.xlu1 %388 }
 0x43a   : > { %872 = vrcp.f32 %v389_v17 }
 0x43d   : > { %v506_v23 = vpop.permute.xlu1 %505 }
 0x43e   : > { %v511_v26 = vsel %vm280_vm4, %v506_v23, 0 }
 0x441   : > { %v501_v18 = vpop.xlane.xlu0 %500 }
 0x442   : > { %874 = vrcp.f32 %v501_v18 }
 0x444   : > { %v873_v19 = vpop.eup %872 }
 0x445   : > { %v391_v20 = vmul.f32 %v873_v19, %v867_v8  ;;  %v394_v21 = vpop.permute.xlu0 %393 }
 0x446   : > { %v399_v22 = vsel %vm280_vm4, %v394_v21, 0 }
 0x447   : > { %816 = vmatpush3.bf16.msra.mxu0 %v399_v22  ;;  %v392_v24 = vpack.c.bf16 %v391_v20, %v391_v20 }
 0x448   : > { %827 = vmatprep.subr.bf16.mxu0 %v886_v0 }
 0x44a   : > { %818 = vmatmul.mubr.msk.bf16.vlgmr.msra.gmra.mrb[4].mxu0 %vm261_vm3, %v392_v24 }
 0x44b   : > { %828 = vmatpush3.bf16.msra.mxu0 %v511_v26  ;;  %829 = vmatprep.mubr.msk.bf16.mxu0 %vm887_vm0, %v886_v0 }
 0x44c   : > { %v875_v25 = vpop.eup %874  ;;  %839 = vmatprep.subr.bf16.mxu0 %v886_v0 }
 0x44d   : > { %v503_v27 = vmul.f32 %v875_v25, %v869_v11 }
 0x44f   : > { %v504_v28 = vpack.c.bf16 %v503_v27, %v503_v27 }
 0x452   : > { %830 = vmatmul.mubr.msk.bf16.vlgmr.msra.gmra.mrb[8].mxu0 %vm261_vm3, %v504_v28 }
 0x453   : > { %841 = vmatprep.mubr.msk.bf16.mxu0 %vm887_vm0, %v886_v0 }
 0x46e   : > { %v613_v29 = vpop.xlane.xlu1 %612 }
 0x46f   : > { %876 = vrcp.f32 %v613_v29 }
 0x472   : > { %v618_v30 = vpop.permute.xlu1 %617 }
 0x473   : > { %v623_v31 = vsel %vm280_vm4, %v618_v30, 0 }
 0x474   : > { %840 = vmatpush3.bf16.msra.mxu0 %v623_v31 }
 0x479   : > { %v877_v32 = vpop.eup %876 }
 0x47a   : > { %v615_v33 = vmul.f32 %v877_v32, %v871_v15 }
 0x47c   : > { %v616_v34 = vpack.c.bf16 %v615_v33, %v615_v33 }
 0x47e   : > { %842 = vmatmul.mubr.msk.bf16.vlgmr.msra.gmra.mrb[12].mxu0 %vm261_vm3, %v616_v34 }
 0x51d   : > { %v435_v35 = vpop.f32.mrb[4].mxu0 }
 0x51e   : > { %666 = vrot.lane.b32.xlu0 %v435_v35, %s891_s27  ;;  %v819_v36 = vpop.f32.mrb[5].mxu0 }
 0x51f   : > { %v438_v37 = vpop.f32.mrb[6].mxu0 }
 0x520   : > { %v820_v38 = vpop.f32.mrb[7].mxu0 }
 0x525   : > { %v547_v39 = vpop.f32.mrb[8].mxu0 }
 0x526   : > { %670 = vrot.lane.b32.xlu1 %v547_v39, %s890_s26  ;;  %v831_v0 = vpop.f32.mrb[9].mxu0 }
 0x527   : > { %v550_v41 = vpop.f32.mrb[10].mxu0 }
 0x528   : > { %v832_v42 = vpop.f32.mrb[11].mxu0 }
 0x551   : > { %v659_v43 = vpop.f32.mrb[12].mxu0 }
 0x552   : > { %674 = vrot.lane.b32.xlu0 %v659_v43, %s889_s25  ;;  %v843_v44 = vpop.f32.mrb[13].mxu0 }
 0x553   : > { %v662_v45 = vpop.f32.mrb[14].mxu0 }
 0x554   : > { %v844_v46 = vpop.f32.mrb[15].mxu0 }
 0x590   : > { %v667_v47 = vpop.permute.xlu0 %666 }
 0x591   : > { %v677_v49 = vsel %vm212_vm1, %v978_v40, %v667_v47 }
 0x598   : > { %v671_v48 = vpop.permute.xlu1 %670 }
 0x599   : > { %v679_v50 = vsel %vm678_vm5, %v677_v49, %v671_v48 }
 0x5c4   : > { %v675_v51 = vpop.permute.xlu0 %674 }
 0x5c5   : > { %v681_v52 = vsel %vm680_vm6, %v679_v50, %v675_v51 }
 0x5c6   : > { %v682_v53 = vpack.c.bf16 %v681_v52, %v681_v52 }
 0x5c8   : > { %683 = vst [vmem:[%s199_s30] sm:$0xf] %v682_v53 }
 0x5c9 PF: > { %s13_s12 = sadd.s32 1, %s884_s12  }
 0x5ca   : > { %p10_p4 = scmp.ge.s32.totalorder %s13_s12, 4  }
 0x5cc   :  { %12 = sbr.rel (!%p10_p4) target bundleno = 1 (0x1), region = 68 }

// kernel: transformer_forward.28
= control target key start
LH: loop header
LB: loop body
LE: loop exit
PB: predicated region body
PF: predicated region fallthrough
CT: control target
= control target key end

     0   :  { %v568_v1 = vmov 0   ;;  %v56_v34 = vlaneseq  ;;  %s731_s1 = inlined_call_operand.vmem [shape: bf16[128,256], index: 1, kind: input, shape index: {}]   ;;  %s732_s0 = inlined_call_operand.vmem [shape: bf16[16,128], index: 0, kind: input, shape index: {}, may-alias: {0,5}]   ;;  %s733_s3 = inlined_call_operand.vmem [shape: bf16[256,128], index: 3, kind: input, shape index: {}]   ;;  %s734_s2 = inlined_call_operand.vmem [shape: f32[1,256], index: 2, kind: input, shape index: {}]   ;;  %s735_s5 = inlined_call_operand.vmem [shape: bf16[16,128], index: 5, kind: input, shape index: {}, may-alias: {0,5}]   ;;  %s736_s4 = inlined_call_operand.vmem [shape: f32[1,128], index: 4, kind: input, shape index: {}]   ;;  %s737_s6 = inlined_call_operand.vmem [shape: f32[1,128], index: 6, kind: input, shape index: {}]   ;;  %s738_s7 = inlined_call_operand.vmem [shape: f32[1,128], index: 7, kind: input, shape index: {}]   ;;  %s739_s8 = inlined_call_operand.vmem [shape: bf16[16,128], index: 8, kind: output, shape index: {}]  }
   0x1   :  { %v523_v0 = vld [vmem:[%s731_s1 + $0x4] ss:$8 sps:$4 sm:$0xff]   ;;  %184 = vmatprep.mubr.bf16.mxu0 %v568_v1  ;;  %v525_v2 = vld [vmem:[%s731_s1] ss:$8 sps:$4 sm:$0xff]   ;;  %v526_v3 = vld [vmem:[%s731_s1 + $0x14] ss:$8 sps:$4 sm:$0xff]  }
   0x2   :  { %152 = vmatprep.subr.bf16.mxu0 %v523_v0  ;;  %v528_v4 = vld [vmem:[%s731_s1 + $0x10] ss:$8 sps:$4 sm:$0xff]   ;;  %v529_v5 = vld [vmem:[%s731_s1 + $0x24] ss:$8 sps:$4 sm:$0xff]   ;;  %v531_v6 = vld [vmem:[%s731_s1 + $0x20] ss:$8 sps:$4 sm:$0xff]  }
   0x3   :  { %153 = vmatpush1.bf16.msra.mxu0 %v525_v2  ;;  %v532_v7 = vld [vmem:[%s731_s1 + $0x34] ss:$8 sps:$4 sm:$0xff]   ;;  %v534_v8 = vld [vmem:[%s731_s1 + $0x30] ss:$8 sps:$4 sm:$0xff]   ;;  %v535_v9 = vld [vmem:[%s731_s1 + $0x44] ss:$8 sps:$4 sm:$0xff]  }
   0x4   :  { %154 = vmatprep.subr.bf16.mxu0 %v526_v3  ;;  %v548_v10 = vld [vmem:[%s733_s3 + $0x40] sm:$0xff]   ;;  %v538_v13 = vld [vmem:[%s731_s1 + $0x54] ss:$8 sps:$4 sm:$0xff]   ;;  %v550_v14 = vld [vmem:[%s733_s3 + $0x48] sm:$0xff]   ;;  %v57_v35 = vshrl.u32 %v56_v34, 7 }
   0x5   :  { %v537_v11 = vld [vmem:[%s731_s1 + $0x40] ss:$8 sps:$4 sm:$0xff]   ;;  %500 = vmatprep.subr.bf16.mxu1 %v548_v10  ;;  %v552_v16 = vld [vmem:[%s733_s3 + $0x50] sm:$0xff]   ;;  %v541_v18 = vld [vmem:[%s731_s1 + $0x64] ss:$8 sps:$4 sm:$0xff]  }
   0x6   :  { %v549_v12 = vld [vmem:[%s733_s3] sm:$0xff]   ;;  %v551_v15 = vld [vmem:[%s733_s3 + $0x8] sm:$0xff]   ;;  %v540_v17 = vld [vmem:[%s731_s1 + $0x50] ss:$8 sps:$4 sm:$0xff]   ;;  %v58_v36 = vsub.s32 0, %v57_v35  ;;  %v62_v38 = vsub.s32 1, %v57_v35 }
   0x7   :  { %155 = vmatpush1.bf16.msra.mxu0 %v528_v4  ;;  %501 = vmatpush3.bf16.msra.mxu1 %v549_v12  ;;  %v553_v19 = vld [vmem:[%s733_s3 + $0x10] sm:$0xff]   ;;  %v554_v20 = vld [vmem:[%s733_s3 + $0x58] sm:$0xff]   ;;  %v543_v21 = vld [vmem:[%s731_s1 + $0x60] ss:$8 sps:$4 sm:$0xff]  }
   0x8   :  { %156 = vmatprep.subr.bf16.mxu0 %v529_v5  ;;  %502 = vmatprep.subr.bf16.mxu1 %v550_v14  ;;  %v544_v22 = vld [vmem:[%s731_s1 + $0x74] ss:$8 sps:$4 sm:$0xff]   ;;  %v556_v24 = vld [vmem:[%s733_s3 + $0x60] sm:$0xff]   ;;  %v546_v25 = vld [vmem:[%s731_s1 + $0x70] ss:$8 sps:$4 sm:$0xff]  }
   0x9   :  { %v555_v23 = vld [vmem:[%s733_s3 + $0x18] sm:$0xff]   ;;  %v557_v26 = vld [vmem:[%s733_s3 + $0x20] sm:$0xff]   ;;  %v558_v27 = vld [vmem:[%s733_s3 + $0x68] sm:$0xff]  }
   0xa   :  { %v547_v28 = vld [vmem:[%s732_s0] sm:$0xff]   ;;  %v559_v29 = vld [vmem:[%s733_s3 + $0x28] sm:$0xff]   ;;  %v560_v30 = vld [vmem:[%s733_s3 + $0x70] sm:$0xff]  }
   0xb   :  { %157 = vmatpush1.bf16.msra.mxu0 %v531_v6  ;;  %503 = vmatpush3.bf16.msra.mxu1 %v551_v15  ;;  %v561_v31 = vld [vmem:[%s733_s3 + $0x30] sm:$0xff]   ;;  %v562_v32 = vld [vmem:[%s733_s3 + $0x78] sm:$0xff]   ;;  %v54_v37 = vld [vmem:[%s734_s2] sm:$0x3] }
   0xc   :  { %158 = vmatprep.subr.bf16.mxu0 %v532_v7  ;;  %504 = vmatprep.subr.bf16.mxu1 %v552_v16  ;;  %v563_v33 = vld [vmem:[%s733_s3 + $0x38] sm:$0xff]   ;;  %v59_v39 = vrot.slane %v54_v37, %v58_v36  ;;  %v63_v40 = vrot.slane %v54_v37, %v62_v38  ;;  %v492_v55 = vld [vmem:[%s735_s5] sm:$0xff]  }
   0xd   :  { %v484_v58 = vld [vmem:[%s736_s4] ss:$0 sm:$0xff]  ;;  %v493_v61 = vunpack.c.l.bf16 %v492_v55  ;;  %v494_v3 = vunpack.c.h.bf16 %v492_v55 }
   0xf   :  { %159 = vmatpush1.bf16.msra.mxu0 %v534_v8  ;;  %505 = vmatpush3.bf16.msra.mxu1 %v553_v19 }
  0x10   :  { %160 = vmatprep.subr.bf16.mxu0 %v535_v9  ;;  %506 = vmatprep.subr.bf16.mxu1 %v554_v20 }
  0x13   :  { %161 = vmatpush1.bf16.msra.mxu0 %v537_v11  ;;  %507 = vmatpush3.bf16.msra.mxu1 %v555_v23 }
  0x14   :  { %162 = vmatprep.subr.bf16.mxu0 %v538_v13  ;;  %508 = vmatprep.subr.bf16.mxu1 %v556_v24 }
  0x17   :  { %163 = vmatpush1.bf16.msra.mxu0 %v540_v17  ;;  %509 = vmatpush3.bf16.msra.mxu1 %v557_v26 }
  0x18   :  { %164 = vmatprep.subr.bf16.mxu0 %v541_v18  ;;  %510 = vmatprep.subr.bf16.mxu1 %v558_v27 }
  0x1b   :  { %165 = vmatpush1.bf16.msra.mxu0 %v543_v21  ;;  %511 = vmatpush3.bf16.msra.mxu1 %v559_v29  ;;  %v485_v21 = vld [vmem:[%s737_s6] ss:$0 sm:$0xff] }
  0x1c   :  { %166 = vmatprep.subr.bf16.mxu0 %v544_v22  ;;  %512 = vmatprep.subr.bf16.mxu1 %v560_v30 }
  0x1f   :  { %167 = vmatpush1.bf16.msra.mxu0 %v546_v25  ;;  %513 = vmatpush3.bf16.msra.mxu1 %v561_v31  ;;  %v486_v25 = vld [vmem:[%s738_s7] ss:$0 sm:$0xff] }
  0x20   :  { %514 = vmatprep.subr.bf16.mxu1 %v562_v32 }
  0x22   :  { %185 = vmatmul.mubr.bf16.vlgmr.msra.gmra.mrb[0].mxu0 %v547_v28 }
  0x23   :  { %515 = vmatpush3.bf16.msra.mxu1 %v563_v33 }
  0xf5   :  { %v186_v41 = vpop.f32.mrb[0].mxu0 }
  0xf6   :  { %v187_v42 = vadd.f32 %v186_v41, %v59_v39  ;;  %v188_v43 = vpop.f32.mrb[1].mxu0 }
  0xf7   :  { %v189_v44 = vadd.f32 %v188_v43, %v63_v40  ;;  %v190_v45 = vpop.f32.mrb[2].mxu0 }
  0xf8   :  { %v191_v46 = vadd.f32 %v190_v45, %v59_v39  ;;  %v192_v47 = vpop.f32.mrb[3].mxu0  ;;  %v195_v49 = vmax.f32 %v187_v42, 0.0 }
  0xf9   :  { %v193_v48 = vadd.f32 %v192_v47, %v63_v40  ;;  %v196_v51 = vmax.f32 %v189_v44, 0.0 }
  0xfa   :  { %v197_v50 = vmax.f32 %v191_v46, 0.0 }
  0xfb   :  { %v198_v52 = vmax.f32 %v193_v48, 0.0 }
  0xfc   :  { %v201_v53 = vpack.c.bf16 %v197_v50, %v195_v49 }
  0xfd   :  { %v202_v54 = vpack.c.bf16 %v198_v52, %v196_v51 }
  0xff   :  { %363 = vmatprep.mubr.bf16.mxu1 %v202_v54 }
 0x100   :  { %364 = vmatmul.mubr.bf16.vlgmr.msra.gmra.mrb[0].mxu1 %v201_v53 }
 0x1d3   :  { %v516_v56 = vpop.f32.mrb[0].mxu1 }
 0x1d4   :  { %v517_v57 = vpop.f32.mrb[1].mxu1 }
 0x1d5   :  { %v518_v59 = vadd.f32 %v517_v57, %v516_v56  ;;  %v519_v60 = vpop.f32.mrb[2].mxu1 }
 0x1d6   :  { %v520_v62 = vpop.f32.mrb[3].mxu1 }
 0x1d7   :  { %v388_v63 = vadd.f32 %v518_v59, %v484_v58  ;;  %v521_v0 = vadd.f32 %v520_v62, %v519_v60 }
 0x1d9   :  { %v389_v1 = vadd.f32 %v521_v0, %v484_v58  ;;  %v394_v2 = vadd.f32 %v493_v61, %v388_v63 }
 0x1db   :  { %396 = vadd.xlane.f32.xlu0 %v394_v2  ;;  %v395_v4 = vadd.f32 %v494_v3, %v389_v1 }
 0x1df   :  { %398 = vadd.xlane.f32.xlu0 %v395_v4 }
 0x268   :  { %v397_v5 = vpop.xlane.xlu0 %396 }
 0x269   :  { %v401_v6 = vmul.f32 0.0078125, %v397_v5 }
 0x26b   :  { %v403_v7 = vsub.f32 %v394_v2, %v401_v6 }
 0x26c   :  { %v399_v8 = vpop.xlane.xlu0 %398 }
 0x26d   :  { %v402_v9 = vmul.f32 0.0078125, %v399_v8  ;;  %v405_v10 = vmul.f32 %v403_v7, %v403_v7 }
 0x26f   :  { %v404_v11 = vsub.f32 %v395_v4, %v402_v9  ;;  %407 = vadd.xlane.f32.xlu1 %v405_v10 }
 0x271   :  { %v406_v12 = vmul.f32 %v404_v11, %v404_v11 }
 0x273   :  { %409 = vadd.xlane.f32.xlu1 %v406_v12 }
 0x2fc   :  { %v408_v13 = vpop.xlane.xlu1 %407 }
 0x2fd   :  { %v411_v14 = vmul.f32 0.0078125, %v408_v13 }
 0x2ff   :  { %v413_v15 = vadd.f32 1e-05, %v411_v14 }
 0x300   :  { %v410_v16 = vpop.xlane.xlu1 %409 }
 0x301   :  { %564 = vrsqrt.f32 %v413_v15  ;;  %v412_v17 = vmul.f32 0.0078125, %v410_v16 }
 0x303   :  { %v414_v18 = vadd.f32 1e-05, %v412_v17 }
 0x305   :  { %566 = vrsqrt.f32 %v414_v18 }
 0x30b   :  { %v565_v19 = vpop.eup %564 }
 0x30c   :  { %v417_v20 = vmul.f32 %v565_v19, %v403_v7 }
 0x30e   :  { %v426_v23 = vmul.f32 %v485_v21, %v417_v20 }
 0x30f   :  { %v567_v22 = vpop.eup %566 }
 0x310   :  { %v418_v24 = vmul.f32 %v567_v22, %v404_v11  ;;  %v435_v27 = vadd.f32 %v486_v25, %v426_v23 }
 0x312   :  { %v427_v26 = vmul.f32 %v485_v21, %v418_v24 }
 0x314   :  { %v436_v28 = vadd.f32 %v486_v25, %v427_v26 }
 0x316   :  { %v498_v29 = vpack.c.bf16 %v436_v28, %v435_v27 }
 0x318   :  { %499 = vst [vmem:[%s739_s8] sm:$0xff] %v498_v29  }

// kernel: transformer_forward.49
= control target key start
LH: loop header
LB: loop body
LE: loop exit
PB: predicated region body
PF: predicated region fallthrough
CT: control target
= control target key end

     0   :  { %v250_v1 = vmov 0.0   ;;  %vm251_vm0 = vmmov 0   ;;  %s317_s0 = inlined_call_operand.vmem [shape: bf16[16,128], index: 0, kind: input, shape index: {}]   ;;  %s318_s1 = inlined_call_operand.vmem [shape: bf16[128,128], index: 1, kind: input, shape index: {}]   ;;  %s319_s2 = inlined_call_operand.vmem [shape: f32[1,128], index: 2, kind: input, shape index: {}]   ;;  %s320_s3 = inlined_call_operand.hbm [shape: f32[16,128], index: 3, kind: output, shape index: {}]  }
   0x1   :  { %v217_v0 = vld [vmem:[%s318_s1] sm:$0xff]   ;;  %192 = vmatprep.subr.bf16.mxu0 %v250_v1  ;;  %v218_v2 = vld [vmem:[%s318_s1 + $0x8] sm:$0xff]   ;;  %208 = vmatprep.mubr.msk.bf16.mxu0 %vm251_vm0, %v250_v1  ;;  %v219_v3 = vld [vmem:[%s318_s1 + $0x10] sm:$0xff]  }
   0x2   :  { %193 = vmatpush3.bf16.msra.mxu0 %v217_v0 }
   0x3   :  { %194 = vmatprep.subr.bf16.mxu0 %v250_v1 }
   0x6   :  { %195 = vmatpush3.bf16.msra.mxu0 %v218_v2 }
   0x7   :  { %196 = vmatprep.subr.bf16.mxu0 %v250_v1 }
   0x8   :  { %8 = vsyncpa [#allocation4], 0  ;;  %v220_v4 = vld [vmem:[%s318_s1 + $0x18] sm:$0xff]   ;;  %v221_v5 = vld [vmem:[%s318_s1 + $0x20] sm:$0xff]   ;;  %s252_s5 = smov [#allocation3]  }
   0x9   :  { %v222_v6 = vld [vmem:[%s318_s1 + $0x28] sm:$0xff]   ;;  %v223_v7 = vld [vmem:[%s318_s1 + $0x30] sm:$0xff]   ;;  %v224_v8 = vld [vmem:[%s318_s1 + $0x38] sm:$0xff]   ;;  %s162_s6 = sshll.u32 %s252_s5, 4  ;;  %s163_s6 = int_to_ptr.vmem [resolvable:$true] %s162_s6 }
   0xa   :  { %197 = vmatpush3.bf16.msra.mxu0 %v219_v3  ;;  %v225_v9 = vld [vmem:[%s317_s0] sm:$0xff]   ;;  %s226_s1 = scalar_lea.vmem %s163_s6, 256  ;;  %p231_p1 = scmp.lt.s32.totalorder %s163_s6, %s163_s6 }
   0xb   :  { %198 = vmatprep.subr.bf16.mxu0 %v250_v1  ;;  %v182_v10 = vld [vmem:[%s319_s2] ss:$0 sm:$0xff]  ;;  %p227_p0 = scmp.ne.s32.totalorder %s163_s6, %s226_s1  ;;  %p232_p2 = scmp.lt.s32.totalorder %s226_s1, %s226_s1 }
   0xd   :  { %p233_p3 = por %p232_p2, %p231_p1 }
   0xe   :  { %199 = vmatpush3.bf16.msra.mxu0 %v220_v4 }
   0xf   :  { %200 = vmatprep.subr.bf16.mxu0 %v250_v1  ;;  %p234_p4 = pnand %p233_p3, %p227_p0 }
  0x12   :  { %201 = vmatpush3.bf16.msra.mxu0 %v221_v5 }
  0x13   :  { %202 = vmatprep.subr.bf16.mxu0 %v250_v1 }
  0x16   :  { %203 = vmatpush3.bf16.msra.mxu0 %v222_v6 }
  0x17   :  { %204 = vmatprep.subr.bf16.mxu0 %v250_v1 }
  0x1a   :  { %205 = vmatpush3.bf16.msra.mxu0 %v223_v7 }
  0x1b   :  { %206 = vmatprep.subr.bf16.mxu0 %v250_v1 }
  0x1e   :  { %207 = vmatpush3.bf16.msra.mxu0 %v224_v8 }
  0x21   :  { %209 = vmatmul.mubr.bf16.vlgmr.msra.gmra.mrb[0].mxu0 %v225_v9 }
  0xf4   :  { %v130_v11 = vpop.f32.mrb[0].mxu0 }
  0xf5   :  { %v153_v12 = vadd.f32 %v182_v10, %v130_v11  ;;  %v210_v13 = vpop.f32.mrb[1].mxu0 }
  0xf6   :  { %v133_v14 = vpop.f32.mrb[2].mxu0 }
  0xf7   :  { %155 = vst [vmem:[#allocation3] sm:$0xff] %v153_v12  ;;  %v154_v15 = vadd.f32 %v182_v10, %v133_v14  ;;  %v211_v16 = vpop.f32.mrb[3].mxu0 }
  0xf9   :  { %156 = vst [vmem:[#allocation3 + $0x8] sm:$0xff] %v154_v15 }
  0xfa   :  { %237 = shalt.err (!%p234_p4)
}
  0xfb   :  { %s238_s7 = scalar_lea.hbm %s320_s3, 256 }
  0xfc   :  { %p239_p5 = scmp.ne.s32.totalorder %s320_s3, %s238_s7  ;;  %p242_p6 = scmp.lt.u32.totalorder %s238_s7, %s320_s3 }
  0xfe   :  { %p244_p7 = pnand %p242_p6, %p239_p5 }
 0x100   :  { %247 = shalt.err (!%p244_p7)
}
 0x101   :  { %s253_s12 = smov 128   ;;  %s254_s13 = smov 8  }
 0x102   :  { %168 = dma.vmem_to_hbm [thread:$0]  %s163_s6, 256, %s320_s3, [#allocation4], %s253_s12, %s253_s12, %s254_s13  }
 0x103   :  { %248 = dma.done.wait [#allocation4], 256  }
 0x104   :  { %249 = vsyncadd [#allocation4], 4294967040 }
 0x105   :  { %172 = vsyncpa [#allocation4], 1 }

</bundles_post_ra>
